<compile_context>
chip_gen: v5e
topology: v5e:2x2
jax: 0.10.0
libtpu: 0.0.40
codegen_flags: <defaults>
</compile_context>

<pallas_src>
import math

import jax
import jax.numpy as jnp
from jax.experimental import pallas as pl
from jax.experimental.pallas import tpu as pltpu

_SUBLANE = 8


def _round_up(x, m):
    return ((x + m - 1) // m) * m


def _choose_tiles(B, S, H, itemsize, vmem_budget_bytes=4 * 1024 * 1024):
    """Pick (batch_tile, padded_B, seq_tile, padded_S).

    Keeps one bf16 tok tile (batch_tile x seq_tile x H) under
    `vmem_budget_bytes`, so double-buffered input tiles (~2x budget) plus the
    in-kernel f32 upcast/product temporaries (~2-4x budget) plus the resident
    weights (~2.4 MiB) fit comfortably under a 32 MiB scoped VMEM limit.
    """
    if S <= 256:
        ts, s_pad = S, S                        # full seq dim (no lane constraint)
    else:
        ts = 512                                # multiple of 128 lanes
        while ts > 128 and _SUBLANE * ts * H * itemsize > vmem_budget_bytes:
            ts //= 2
        s_pad = _round_up(S, ts)

    row_bytes = max(ts * H * itemsize, 1)
    tb = (vmem_budget_bytes // row_bytes) // _SUBLANE * _SUBLANE
    tb = max(_SUBLANE, min(tb, 128))
    tb = min(tb, _round_up(B, _SUBLANE))
    b_pad = _round_up(B, tb)
    return tb, b_pad, ts, s_pad


def text_encoder_kernel(tok_ref, mask_ref, w1_ref, b1_ref, w2_ref, b2_ref,
                        out_ref, emb_acc, msk_acc):
    """grid = (batch tiles, seq tiles); seq is the reduction axis.

    tok_ref : [TB, TS, H] bf16   token-embedding tile
    mask_ref: [TB, TS]    bf16   attention-mask tile
    w1_ref  : [H, H]      f32    bert_l1 weight (transposed, VMEM-resident)
    b1_ref  : [1, H]      f32
    w2_ref  : [H, O]      f32    bert_l2 weight (transposed, VMEM-resident)
    b2_ref  : [1, O]      f32
    out_ref : [TB, O]     f32
    emb_acc : [TB, H]     f32    scratch: masked-sum accumulator
    msk_acc : [TB, 1]     f32    scratch: mask-count accumulator
    """
    k = pl.program_id(1)

    @pl.when(k == 0)
    def _init():
        emb_acc[...] = jnp.zeros_like(emb_acc)
        msk_acc[...] = jnp.zeros_like(msk_acc)

    # Upcast in-kernel (v5e VPU has no bf16); accumulate in f32.
    tok = tok_ref[...].astype(jnp.float32)        # [TB, TS, H]
    msk = mask_ref[...].astype(jnp.float32)       # [TB, TS]

    emb_acc[...] += jnp.sum(tok * msk[:, :, None], axis=1)       # [TB, H]
    msk_acc[...] += jnp.sum(msk, axis=1, keepdims=True)          # [TB, 1]

    @pl.when(k == pl.num_programs(1) - 1)
    def _finalize():
        inv = pl.reciprocal(jnp.maximum(msk_acc[...], 1e-9), approx=False)
        pooled = emb_acc[...] * inv                              # [TB, H]
        x = jnp.dot(pooled, w1_ref[...], preferred_element_type=jnp.float32)
        x = jnp.maximum(x + b1_ref[...], 0.0)
        out = jnp.dot(x, w2_ref[...], preferred_element_type=jnp.float32)
        out_ref[...] = (out + b2_ref[...]).astype(out_ref.dtype)


def text_encoder_forward(token_embeddings, attention_mask, w1, b1, w2, b2):
    """Masked-mean-pool + Linear(768,768) + ReLU + Linear(768,out_dim)."""
    B, S, H = token_embeddings.shape
    O = w2.shape[1]

    # Ship the big [B, S, H] tensor (and the mask) over HBM as bf16.
    tok = token_embeddings.astype(jnp.bfloat16)
    msk = attention_mask.astype(jnp.bfloat16)              # [B, S] (no [B,S,1])

    TB, B_pad, TS, S_pad = _choose_tiles(B, S, H, tok.dtype.itemsize)
    if (B_pad - B) or (S_pad - S):
        tok = jnp.pad(tok, ((0, B_pad - B), (0, S_pad - S), (0, 0)))
        msk = jnp.pad(msk, ((0, B_pad - B), (0, S_pad - S)))

    w1 = w1.astype(jnp.float32)
    w2 = w2.astype(jnp.float32)
    b1_2d = b1.reshape(1, H).astype(jnp.float32)
    b2_2d = b2.reshape(1, O).astype(jnp.float32)

    grid = (B_pad // TB, S_pad // TS)

    out = pl.pallas_call(
        text_encoder_kernel,
        out_shape=jax.ShapeDtypeStruct((B_pad, O), jnp.float32),
        grid_spec=pltpu.PrefetchScalarGridSpec(
            num_scalar_prefetch=0,
            grid=grid,
            in_specs=[
                pl.BlockSpec((TB, TS, H), lambda i, k: (i, k, 0)),  # tok tile
                pl.BlockSpec((TB, TS), lambda i, k: (i, k)),        # mask tile
                pl.BlockSpec((H, H), lambda i, k: (0, 0)),          # w1 resident
                pl.BlockSpec((1, H), lambda i, k: (0, 0)),          # b1 resident
                pl.BlockSpec((H, O), lambda i, k: (0, 0)),          # w2 resident
                pl.BlockSpec((1, O), lambda i, k: (0, 0)),          # b2 resident
            ],
            out_specs=pl.BlockSpec((TB, O), lambda i, k: (i, 0)),
            scratch_shapes=[
                pltpu.VMEM((TB, H), jnp.float32),
                pltpu.VMEM((TB, 1), jnp.float32),
            ],
        ),
        compiler_params=pltpu.CompilerParams(
            dimension_semantics=("parallel", "arbitrary"),
            vmem_limit_bytes=32 * 1024 * 1024,
        ),
    )(tok, msk, w1, b1_2d, w2, b2_2d)

    return out[:B]


def init_linear_params(key, in_features, out_features):
    """nn.Linear-style init: U(-1/sqrt(in), 1/sqrt(in)). Returns W^T, b."""
    kw, kb = jax.random.split(key)
    bound = 1.0 / math.sqrt(in_features)
    w_t = jax.random.uniform(kw, (in_features, out_features), jnp.float32, -bound, bound)
    b = jax.random.uniform(kb, (out_features,), jnp.float32, -bound, bound)
    return w_t, b


if __name__ == "__main__":
    B, S, H = 2, 8, 768     # hidden=768 fixed by the module (nn.Linear(768, ...))
    OUT_DIM = 128

    key = jax.random.PRNGKey(0)
    k_tok, k_l1, k_l2 = jax.random.split(key, 3)

    # Synthetic stand-in for bert_model(**encoded_inputs)[0] (last_hidden_state).
    token_embeddings = jax.random.normal(k_tok, (B, S, H), jnp.float32)
    # attention mask with padding at the tail of row 1
    attention_mask = jnp.array(
        [[1, 1, 1, 1, 1, 1, 1, 1],
         [1, 1, 1, 1, 1, 0, 0, 0]], dtype=jnp.int32)

    w1, b1 = init_linear_params(k_l1, H, H)         # bert_l1: Linear(768, 768)
    w2, b2 = init_linear_params(k_l2, H, OUT_DIM)   # bert_l2: Linear(768, out_dim)

    out = text_encoder_forward(token_embeddings, attention_mask, w1, b1, w2, b2)
    out = jax.block_until_ready(out)

    # Pure-JAX reference (same bf16-rounded embeddings the kernel consumes).
    tok_q = token_embeddings.astype(jnp.bfloat16).astype(jnp.float32)
    m = attention_mask.astype(jnp.float32)
    pooled = (jnp.einsum("bsh,bs->bh", tok_q, m)
              / jnp.maximum(jnp.sum(m, axis=1, keepdims=True), 1e-9))
    hp = jax.lax.Precision.HIGHEST
    x = jnp.maximum(jnp.dot(pooled, w1, precision=hp) + b1, 0.0)
    ref = jnp.dot(x, w2, precision=hp) + b2

    assert out.shape == (B, OUT_DIM), out.shape
    assert bool(jnp.allclose(out, ref, atol=2e-2, rtol=2e-2)), "mismatch vs JAX reference"

    print("KERNEL_OK")
</pallas_src>

<mosaic_0001>
module attributes {stable_mosaic.version = 11 : i64} {
  func.func @text_encoder_kernel(%arg0: i32, %arg1: i32, %arg2: memref<8x8x768xbf16, #tpu.memory_space<vmem>>, %arg3: memref<8x8xbf16, #tpu.memory_space<vmem>>, %arg4: memref<768x768xf32, #tpu.memory_space<vmem>>, %arg5: memref<1x768xf32, #tpu.memory_space<vmem>>, %arg6: memref<768x128xf32, #tpu.memory_space<vmem>>, %arg7: memref<1x128xf32, #tpu.memory_space<vmem>>, %arg8: memref<8x128xf32, #tpu.memory_space<vmem>>, %arg9: memref<8x768xf32, #tpu.memory_space<vmem>>, %arg10: memref<8x1xf32, #tpu.memory_space<vmem>>) attributes {dimension_semantics = [#tpu.dimension_semantics<parallel>, #tpu.dimension_semantics<arbitrary>], iteration_bounds = array<i64: 1, 1>, scalar_prefetch = 0 : i64, scratch_operands = 2 : i64, tpu.core_type = #tpu.core_type<tc>, window_params = [{transform_indices = @transform_0, window_bounds = array<i64: 8, 8, 768>}, {transform_indices = @transform_1, window_bounds = array<i64: 8, 8>}, {pipeline_mode = #tpu.pipeline_mode<synchronous>, transform_indices = @transform_2, window_bounds = array<i64: 768, 768>}, {pipeline_mode = #tpu.pipeline_mode<synchronous>, transform_indices = @transform_3, window_bounds = array<i64: 1, 768>}, {pipeline_mode = #tpu.pipeline_mode<synchronous>, transform_indices = @transform_4, window_bounds = array<i64: 768, 128>}, {pipeline_mode = #tpu.pipeline_mode<synchronous>, transform_indices = @transform_5, window_bounds = array<i64: 1, 128>}, {transform_indices = @transform_6, window_bounds = array<i64: 8, 128>}]} {
    %c0_i32 = arith.constant 0 : i32
    %0 = arith.cmpi eq, %arg1, %c0_i32 : i32
    %1 = arith.extui %0 : i1 to i32
    %c0_i32_0 = arith.constant 0 : i32
    %2 = arith.cmpi ne, %1, %c0_i32_0 : i32
    scf.if %2 {
      %cst_16 = arith.constant 0.000000e+00 : f32
      %22 = vector.broadcast %cst_16 : f32 to vector<8x768xf32>
      %c0_17 = arith.constant 0 : index
      %c0_18 = arith.constant 0 : index
      %23 = vector.load %arg9[%c0_17, %c0_18] : memref<8x768xf32, #tpu.memory_space<vmem>>, vector<8x768xf32>
      tpu.vector_store %arg9[%c0_17, %c0_18], %22 {strides = array<i32>} : memref<8x768xf32, #tpu.memory_space<vmem>>, vector<8x768xf32>,
      %cst_19 = arith.constant 0.000000e+00 : f32
      %24 = vector.broadcast %cst_19 : f32 to vector<8x1xf32>
      %c0_20 = arith.constant 0 : index
      %c0_21 = arith.constant 0 : index
      %25 = vector.load %arg10[%c0_20, %c0_21] : memref<8x1xf32, #tpu.memory_space<vmem>>, vector<8x1xf32>
      tpu.vector_store %arg10[%c0_20, %c0_21], %24 {strides = array<i32>} : memref<8x1xf32, #tpu.memory_space<vmem>>, vector<8x1xf32>,
    } else {
    }
    %c0 = arith.constant 0 : index
    %c0_1 = arith.constant 0 : index
    %c0_2 = arith.constant 0 : index
    %3 = vector.load %arg2[%c0, %c0_1, %c0_2] : memref<8x8x768xbf16, #tpu.memory_space<vmem>>, vector<8x8x768xbf16>
    %4 = arith.extf %3 : vector<8x8x768xbf16> to vector<8x8x768xf32>
    %c0_3 = arith.constant 0 : index
    %c0_4 = arith.constant 0 : index
    %5 = vector.load %arg3[%c0_3, %c0_4] : memref<8x8xbf16, #tpu.memory_space<vmem>>, vector<8x8xbf16>
    %6 = arith.extf %5 : vector<8x8xbf16> to vector<8x8xf32>
    %c0_5 = arith.constant 0 : index
    %c0_6 = arith.constant 0 : index
    %7 = vector.load %arg9[%c0_5, %c0_6] : memref<8x768xf32, #tpu.memory_space<vmem>>, vector<8x768xf32>
    %8 = vector.shape_cast %6 : vector<8x8xf32> to vector<8x8x1xf32>
    %9 = vector.broadcast %8 : vector<8x8x1xf32> to vector<8x8x768xf32>
    %10 = arith.mulf %4, %9 : vector<8x8x768xf32>
    %cst = arith.constant dense<0.000000e+00> : vector<8x768xf32>
    %11 = vector.multi_reduction <add>, %10, %cst [1] : vector<8x8x768xf32> to vector<8x768xf32>
    %12 = arith.addf %7, %11 : vector<8x768xf32>
    %c0_7 = arith.constant 0 : index
    %c0_8 = arith.constant 0 : index
    %13 = vector.load %arg9[%c0_7, %c0_8] : memref<8x768xf32, #tpu.memory_space<vmem>>, vector<8x768xf32>
    tpu.vector_store %arg9[%c0_7, %c0_8], %12 {strides = array<i32>} : memref<8x768xf32, #tpu.memory_space<vmem>>, vector<8x768xf32>,
    %c0_9 = arith.constant 0 : index
    %c0_10 = arith.constant 0 : index
    %14 = vector.load %arg10[%c0_9, %c0_10] : memref<8x1xf32, #tpu.memory_space<vmem>>, vector<8x1xf32>
    %cst_11 = arith.constant dense<0.000000e+00> : vector<8xf32>
    %15 = vector.multi_reduction <add>, %6, %cst_11 [1] : vector<8x8xf32> to vector<8xf32>
    %16 = vector.shape_cast %15 : vector<8xf32> to vector<8x1xf32>
    %17 = arith.addf %14, %16 : vector<8x1xf32>
    %c0_12 = arith.constant 0 : index
    %c0_13 = arith.constant 0 : index
    %18 = vector.load %arg10[%c0_12, %c0_13] : memref<8x1xf32, #tpu.memory_space<vmem>>, vector<8x1xf32>
    tpu.vector_store %arg10[%c0_12, %c0_13], %17 {strides = array<i32>} : memref<8x1xf32, #tpu.memory_space<vmem>>, vector<8x1xf32>,
    %c0_i32_14 = arith.constant 0 : i32
    %19 = arith.cmpi eq, %arg1, %c0_i32_14 : i32
    %20 = arith.extui %19 : i1 to i32
    %c0_i32_15 = arith.constant 0 : i32
    %21 = arith.cmpi ne, %20, %c0_i32_15 : i32
    scf.if %21 {
      %c0_16 = arith.constant 0 : index
      %c0_17 = arith.constant 0 : index
      %22 = vector.load %arg10[%c0_16, %c0_17] : memref<8x1xf32, #tpu.memory_space<vmem>>, vector<8x1xf32>
      %cst_18 = arith.constant 9.99999971E-10 : f32
      %23 = vector.broadcast %cst_18 : f32 to vector<8x1xf32>
      %24 = arith.maximumf %22, %23 : vector<8x1xf32>
      %25 = tpu.reciprocal %24 : vector<8x1xf32> -> vector<8x1xf32>
      %c0_19 = arith.constant 0 : index
      %c0_20 = arith.constant 0 : index
      %26 = vector.load %arg9[%c0_19, %c0_20] : memref<8x768xf32, #tpu.memory_space<vmem>>, vector<8x768xf32>
      %27 = vector.broadcast %25 : vector<8x1xf32> to vector<8x768xf32>
      %28 = arith.mulf %26, %27 : vector<8x768xf32>
      %c0_21 = arith.constant 0 : index
      %c0_22 = arith.constant 0 : index
      %29 = vector.load %arg4[%c0_21, %c0_22] : memref<768x768xf32, #tpu.memory_space<vmem>>, vector<768x768xf32>
      %cst_23 = arith.constant dense<0.000000e+00> : vector<8x768xf32>
      %30 = tpu.matmul %28, %29, %cst_23 {dimension_numbers = #tpu.dot_dimension_numbers<[1], [0], [0], [1], [0, 0, 1, 1], [], []>} : vector<8x768xf32>, vector<768x768xf32>, vector<8x768xf32> -> vector<8x768xf32>
      %c0_24 = arith.constant 0 : index
      %c0_25 = arith.constant 0 : index
      %31 = vector.load %arg5[%c0_24, %c0_25] : memref<1x768xf32, #tpu.memory_space<vmem>>, vector<1x768xf32>
      %32 = vector.broadcast %31 : vector<1x768xf32> to vector<8x768xf32>
      %33 = arith.addf %30, %32 : vector<8x768xf32>
      %cst_26 = arith.constant 0.000000e+00 : f32
      %34 = vector.broadcast %cst_26 : f32 to vector<8x768xf32>
      %35 = arith.maximumf %33, %34 : vector<8x768xf32>
      %c0_27 = arith.constant 0 : index
      %c0_28 = arith.constant 0 : index
      %36 = vector.load %arg6[%c0_27, %c0_28] : memref<768x128xf32, #tpu.memory_space<vmem>>, vector<768x128xf32>
      %cst_29 = arith.constant dense<0.000000e+00> : vector<8x128xf32>
      %37 = tpu.matmul %35, %36, %cst_29 {dimension_numbers = #tpu.dot_dimension_numbers<[1], [0], [0], [1], [0, 0, 1, 1], [], []>} : vector<8x768xf32>, vector<768x128xf32>, vector<8x128xf32> -> vector<8x128xf32>
      %c0_30 = arith.constant 0 : index
      %c0_31 = arith.constant 0 : index
      %38 = vector.load %arg7[%c0_30, %c0_31] : memref<1x128xf32, #tpu.memory_space<vmem>>, vector<1x128xf32>
      %39 = vector.broadcast %38 : vector<1x128xf32> to vector<8x128xf32>
      %40 = arith.addf %37, %39 : vector<8x128xf32>
      %c0_32 = arith.constant 0 : index
      %c0_33 = arith.constant 0 : index
      %41 = vector.load %arg8[%c0_32, %c0_33] : memref<8x128xf32, #tpu.memory_space<vmem>>, vector<8x128xf32>
      tpu.vector_store %arg8[%c0_32, %c0_33], %40 {strides = array<i32>} : memref<8x128xf32, #tpu.memory_space<vmem>>, vector<8x128xf32>,
    } else {
    }
    return
  }
  func.func @transform_0(%arg0: i32, %arg1: i32) -> (i32, i32, i32) {
    %c0_i32 = arith.constant 0 : i32
    %c0_i32_0 = arith.constant 0 : i32
    return %arg0, %arg1, %c0_i32 : i32, i32, i32
  }
  func.func @transform_1(%arg0: i32, %arg1: i32) -> (i32, i32) {
    %c0_i32 = arith.constant 0 : i32
    return %arg0, %arg1 : i32, i32
  }
  func.func @transform_2(%arg0: i32, %arg1: i32) -> (i32, i32) {
    %c0_i32 = arith.constant 0 : i32
    %c0_i32_0 = arith.constant 0 : i32
    %c0_i32_1 = arith.constant 0 : i32
    return %c0_i32, %c0_i32_0 : i32, i32
  }
  func.func @transform_3(%arg0: i32, %arg1: i32) -> (i32, i32) {
    %c0_i32 = arith.constant 0 : i32
    %c0_i32_0 = arith.constant 0 : i32
    %c0_i32_1 = arith.constant 0 : i32
    return %c0_i32, %c0_i32_0 : i32, i32
  }
  func.func @transform_4(%arg0: i32, %arg1: i32) -> (i32, i32) {
    %c0_i32 = arith.constant 0 : i32
    %c0_i32_0 = arith.constant 0 : i32
    %c0_i32_1 = arith.constant 0 : i32
    return %c0_i32, %c0_i32_0 : i32, i32
  }
  func.func @transform_5(%arg0: i32, %arg1: i32) -> (i32, i32) {
    %c0_i32 = arith.constant 0 : i32
    %c0_i32_0 = arith.constant 0 : i32
    %c0_i32_1 = arith.constant 0 : i32
    return %c0_i32, %c0_i32_0 : i32, i32
  }
  func.func @transform_6(%arg0: i32, %arg1: i32) -> (i32, i32) {
    %c0_i32 = arith.constant 0 : i32
    %c0_i32_0 = arith.constant 0 : i32
    return %arg0, %c0_i32 : i32, i32
  }
}

</mosaic_0001>

<bundles_post_ra>
// kernel: tpu_custom_call.1
= control target key start
LH: loop header
LB: loop body
LE: loop exit
PB: predicated region body
PF: predicated region fallthrough
CT: control target
= control target key end

     0   :  { %11 = vsyncpa [#allocation5], 0  ;;  %s3175_s0 = inlined_call_operand.hbm [shape: bf16[8,8,768], index: 0, kind: input, shape index: {}]   ;;  %s3176_s1 = inlined_call_operand.hbm [shape: bf16[8,8], index: 1, kind: input, shape index: {}]   ;;  %s3177_s2 = inlined_call_operand.hbm [shape: f32[768,768], index: 2, kind: input, shape index: {}]   ;;  %s3178_s3 = inlined_call_operand.hbm [shape: f32[1,768], index: 3, kind: input, shape index: {}]   ;;  %s3179_s4 = inlined_call_operand.hbm [shape: f32[768,128], index: 4, kind: input, shape index: {}]   ;;  %s3180_s5 = inlined_call_operand.hbm [shape: f32[1,128], index: 5, kind: input, shape index: {}]   ;;  %s3181_s6 = inlined_call_operand.hbm [shape: f32[8,128], index: 6, kind: output, shape index: {}]  }
   0x1   :  { %12 = vsyncpa [#allocation8], 0 }
   0x2   :  { %13 = vsyncpa [#allocation11], 0 }
   0x3   :  { %14 = vsyncpa [#allocation14], 0  ;;  %s34_s23 = sshll.u32 %s3176_s1, 4  ;;  %s35_s23 = int_to_ptr.hbm [resolvable:$true] %s34_s23 }
   0x4   :  { %15 = vsyncpa [#allocation6], 0  ;;  %s2533_s24 = smov [#allocation7]   ;;  %s58_s28 = sshll.u32 %s3178_s3, 4  ;;  %s59_s28 = int_to_ptr.hbm [resolvable:$true] %s58_s28 }
   0x5   :  { %s36_s25 = sshll.u32 %s2533_s24, 4  ;;  %s2534_s29 = smov [#allocation10]   ;;  %s37_s25 = int_to_ptr.vmem [resolvable:$true] %s36_s25 }
   0x6   :  { %39 = dma.hbm_to_vmem [thread:$0]  %s35_s23, 64, %s37_s25, [#allocation8]  }
   0x7   :  { %s60_s30 = sshll.u32 %s2534_s29, 4  ;;  %s20_s9 = sshll.u32 %s3175_s0, 4  ;;  %s61_s30 = int_to_ptr.vmem [resolvable:$true] %s60_s30  ;;  %s21_s9 = int_to_ptr.hbm [resolvable:$true] %s20_s9 }
   0x8   :  { %63 = dma.hbm_to_vmem [thread:$0]  %s59_s28, 96, %s61_s30, [#allocation11]  }
   0x9   :  { %s2535_s1 = smov [#allocation4]   ;;  %s44_s13 = sshll.u32 %s3177_s2, 4  ;;  %s45_s13 = int_to_ptr.hbm [resolvable:$true] %s44_s13 }
   0xa   :  { %s22_s10 = sshll.u32 %s2535_s1, 4  ;;  %s2536_s14 = smov 384   ;;  %s23_s10 = int_to_ptr.vmem [resolvable:$true] %s22_s10 }
   0xb   :  { %s2537_s3 = smov 24   ;;  %s2538_s15 = smov [#allocation9]  }
   0xc   :  { %28 = dma.hbm_to_vmem [thread:$0]  %s21_s9, 3072, %s23_s10, [#allocation5], %s2536_s14, %s2536_s14, %s2537_s3  }
   0xd   :  { %s46_s16 = sshll.u32 %s2538_s15, 4  ;;  %s2539_s17 = smov 768   ;;  %s47_s16 = int_to_ptr.vmem [resolvable:$true] %s46_s16 }
   0xe   :  { %s2540_s18 = smov 48   ;;  %s68_s20 = sshll.u32 %s3179_s4, 4  ;;  %s69_s20 = int_to_ptr.hbm [resolvable:$true] %s68_s20 }
   0xf   :  { %52 = dma.hbm_to_vmem [thread:$0]  %s45_s13, 73728, %s47_s16, [#allocation8], %s2539_s17, %s2539_s17, %s2540_s18  }
  0x10   :  { %s2541_s21 = smov [#allocation12]   ;;  %s82_s24 = sshll.u32 %s3180_s5, 4  ;;  %s83_s24 = int_to_ptr.hbm [resolvable:$true] %s82_s24 }
  0x11   :  { %s70_s22 = sshll.u32 %s2541_s21, 4  ;;  %s2542_s25 = smov 128   ;;  %s71_s22 = int_to_ptr.vmem [resolvable:$true] %s70_s22 }
  0x12   :  { %s2543_s26 = smov 8   ;;  %s2544_s27 = smov [#allocation13]  }
  0x13   :  { %76 = dma.hbm_to_vmem [thread:$0]  %s69_s20, 12288, %s71_s22, [#allocation11], %s2542_s25, %s2542_s25, %s2543_s26  }
  0x14   :  { %s84_s28 = sshll.u32 %s2544_s27, 4  ;;  %s85_s28 = int_to_ptr.vmem [resolvable:$true] %s84_s28 }
  0x15   :  { %87 = dma.hbm_to_vmem [thread:$0]  %s83_s24, 16, %s85_s28, [#allocation14]  }
  0x16   :  { %2523 = dma.done.wait [#allocation5], 3072  }
  0x17   :  { %2524 = vsyncadd [#allocation5], 4294964224 }
  0x18   :  { %2525 = dma.done.wait [#allocation8], 73792  }
  0x19   :  { %2526 = vsyncadd [#allocation8], 4294893504 }
  0x1a   :  { %2527 = dma.done.wait [#allocation11], 12384  }
  0x1b   :  { %2528 = vsyncadd [#allocation11], 4294954912 }
  0x1c   :  { %2529 = dma.done.wait [#allocation14], 16  }
  0x1d   :  { %2530 = vsyncadd [#allocation14], 4294967280  ;;  %v205_v0 = vlaneseq  ;;  %vm122_vm0 = vcmask 7168   ;;  %v2545_v1 = vmov 0.0   ;;  %v196_v3 = vld [vmem:[#allocation7] sm:$0xf] }
  0x1e   :  { %123 = vst.msk [vmem:[#allocation3] sm:$0xff] %vm122_vm0, %v2545_v1  ;;  %vm712_vm1 = vcmask 64512   ;;  %v197_v4 = vunpack.c.l.bf16 %v196_v3  ;;  %v2546_v18 = vmov 0   ;;  %v845_v20 = vld [vmem:[#allocation9 + $0x2d0] sm:$0xff]  ;;  %v839_v24 = vld [vmem:[#allocation9 + $0x2a0] sm:$0xff]  ;;  %vm644_vm6 = vcmask 1041409  }
  0x1f   :  { %v206_v2 = vshrl.u32 %v205_v0, 7  ;;  %v941_v21 = vld [vmem:[#allocation9 + $0x5d0] sm:$0xff]  ;;  %1345 = vmatpush.msra.mxu0 %v845_v20  ;;  %v935_v25 = vld [vmem:[#allocation9 + $0x5a0] sm:$0xff]  ;;  %vm646_vm7 = vcmask 1042434   ;;  %vm648_vm8 = vcmask 1043459   ;;  %vm650_vm9 = vcmask 1044484  }
  0x20   :  { %v713_v5 = vsel %vm712_vm1, %v197_v4, 0.0  ;;  %v218_v6 = vperm.slane %v197_v4, 2  ;;  %v225_v7 = vperm.slane %v197_v4, 3  ;;  %v246_v8 = vperm.slane %v197_v4, 6  ;;  %v1037_v22 = vld [vmem:[#allocation9 + $0x8d0] sm:$0xff]  ;;  %1365 = vmatpush.msra.mxu1 %v941_v21  ;;  %v1031_v27 = vld [vmem:[#allocation9 + $0x8a0] sm:$0xff] }
  0x21   :  { %2333 = vset.pattern.permute.xlu1 %v206_v2  ;;  %2327 = vset.pattern.permute.xlu0 %v206_v2  ;;  %v253_v10 = vperm.slane %v197_v4, 7  ;;  %v232_v11 = vperm.slane %v197_v4, 4  ;;  %v239_v12 = vperm.slane %v197_v4, 5  ;;  %v204_v15 = vperm.slane %v197_v4, 0  ;;  %v1133_v23 = vld [vmem:[#allocation9 + $0xbd0] sm:$0xff]  ;;  %v1127_v28 = vld [vmem:[#allocation9 + $0xba0] sm:$0xff] }
  0x22   :  { %2344 = vset.pattern.permute.xlu2 %v206_v2  ;;  %714 = vadd.xlane.f32.xlu0 %v713_v5  ;;  %v2334_v9 = vpack.i.bf16 %v225_v7, %v218_v6  ;;  %v211_v16 = vperm.slane %v197_v4, 1  ;;  %v833_v29 = vld [vmem:[#allocation9 + $0x270] sm:$0xff]  ;;  %v827_v34 = vld [vmem:[#allocation9 + $0x240] sm:$0xff]  ;;  %vm652_vm10 = vcmask 1045509   ;;  %vm654_vm11 = vcmask 1046534   ;;  %s2547_s4 = smov [#allocation15]  }
  0x23   :  { %v2345_v13 = vpack.i.bf16 %v253_v10, %v246_v8  ;;  %v2339_v14 = vpack.i.bf16 %v239_v12, %v232_v11  ;;  %1385 = vmatpush.msra.mxu2 %v1037_v22  ;;  %1405 = vmatpush.msra.mxu3 %v1133_v23  ;;  %v929_v31 = vld [vmem:[#allocation9 + $0x570] sm:$0xff]  ;;  %v923_v35 = vld [vmem:[#allocation9 + $0x540] sm:$0xff]  ;;  %vm656_vm12 = vcmask 1047559   ;;  %s2297_s5 = sshll.u32 %s2547_s4, 4  ;;  %s2299_s7 = sshll.u32 %s3181_s6, 4  ;;  %s2298_s5 = int_to_ptr.vmem [resolvable:$true] %s2297_s5  ;;  %s2300_s7 = int_to_ptr.hbm [resolvable:$true] %s2299_s7 }
  0x24   :  { %v2328_v17 = vpack.i.bf16 %v211_v16, %v204_v15  ;;  %1346 = vmatpush.msra.mxu0 %v839_v24  ;;  %1366 = vmatpush.msra.mxu1 %v935_v25  ;;  %v1025_v32 = vld [vmem:[#allocation9 + $0x870] sm:$0xff]  ;;  %v1019_v36 = vld [vmem:[#allocation9 + $0x840] sm:$0xff] }
  0x25   :  { %v711_v19 = vld [vmem:[#allocation3] sm:$0xff]  ;;  %1386 = vmatpush.msra.mxu2 %v1031_v27  ;;  %1406 = vmatpush.msra.mxu3 %v1127_v28  ;;  %v1115_v37 = vld [vmem:[#allocation9 + $0xb40] sm:$0xff]  ;;  %v130_v56 = vld [vmem:[#allocation4 + $0x30] sm:$0xff] }
  0x26   :  { %v1121_v33 = vld [vmem:[#allocation9 + $0xb70] sm:$0xff]  ;;  %1347 = vmatpush.msra.mxu0 %v833_v29  ;;  %1367 = vmatpush.msra.mxu1 %v929_v31  ;;  %v815_v42 = vld [vmem:[#allocation9 + $0x1e0] sm:$0xff]  ;;  %v160_v63 = vunpack.c.l.bf16 %v130_v56  ;;  %v161_v2 = vunpack.c.h.bf16 %v130_v56 }
  0x27   :  { %1387 = vmatpush.msra.mxu2 %v1025_v32  ;;  %1407 = vmatpush.msra.mxu3 %v1121_v33  ;;  %v821_v38 = vld [vmem:[#allocation9 + $0x210] sm:$0xff]  ;;  %v911_v43 = vld [vmem:[#allocation9 + $0x4e0] sm:$0xff] }
  0x28   :  { %v917_v39 = vld [vmem:[#allocation9 + $0x510] sm:$0xff]  ;;  %1348 = vmatpush.msra.mxu0 %v827_v34  ;;  %1368 = vmatpush.msra.mxu1 %v923_v35  ;;  %v1007_v44 = vld [vmem:[#allocation9 + $0x7e0] sm:$0xff] }
  0x29   :  { %2335 = vperm.xlu1 %2333, %v2334_v9   ;;  %v1013_v40 = vld [vmem:[#allocation9 + $0x810] sm:$0xff]  ;;  %1388 = vmatpush.msra.mxu2 %v1019_v36  ;;  %v1103_v45 = vld [vmem:[#allocation9 + $0xae0] sm:$0xff] }
  0x2a   :  { %2346 = vperm.xlu2 %2344, %v2345_v13   ;;  %v1109_v41 = vld [vmem:[#allocation9 + $0xb10] sm:$0xff]  ;;  %1408 = vmatpush.msra.mxu3 %v1115_v37  ;;  %v803_v50 = vld [vmem:[#allocation9 + $0x180] sm:$0xff] }
  0x2b   :  { %1349 = vmatpush.msra.mxu0 %v821_v38  ;;  %1369 = vmatpush.msra.mxu1 %v917_v39  ;;  %v809_v46 = vld [vmem:[#allocation9 + $0x1b0] sm:$0xff]  ;;  %v899_v51 = vld [vmem:[#allocation9 + $0x480] sm:$0xff] }
  0x2c   :  { %v905_v47 = vld [vmem:[#allocation9 + $0x4b0] sm:$0xff]  ;;  %1389 = vmatpush.msra.mxu2 %v1013_v40  ;;  %1409 = vmatpush.msra.mxu3 %v1109_v41  ;;  %v995_v52 = vld [vmem:[#allocation9 + $0x780] sm:$0xff] }
  0x2d   :  { %v1001_v48 = vld [vmem:[#allocation9 + $0x7b0] sm:$0xff]  ;;  %1350 = vmatpush.msra.mxu0 %v815_v42  ;;  %1370 = vmatpush.msra.mxu1 %v911_v43  ;;  %v1091_v53 = vld [vmem:[#allocation9 + $0xa80] sm:$0xff] }
  0x2e   :  { %v1097_v49 = vld [vmem:[#allocation9 + $0xab0] sm:$0xff]  ;;  %1390 = vmatpush.msra.mxu2 %v1007_v44  ;;  %1410 = vmatpush.msra.mxu3 %v1103_v45  ;;  %v132_v60 = vld [vmem:[#allocation4 + $0x40] sm:$0xff]  ;;  %v133_v61 = vld [vmem:[#allocation4 + $0x48] sm:$0xff] }
  0x2f   :  { %v131_v57 = vld [vmem:[#allocation4 + $0x38] sm:$0xff]  ;;  %1351 = vmatpush.msra.mxu0 %v809_v46  ;;  %1371 = vmatpush.msra.mxu1 %v905_v47  ;;  %v2605_v62 = vld [vmem:[#allocation4 + $0x50] sm:$0xff]  ;;  %v164_v7 = vunpack.c.l.bf16 %v132_v60  ;;  %v165_v8 = vunpack.c.h.bf16 %v132_v60  ;;  %v166_v11 = vunpack.c.l.bf16 %v133_v61  ;;  %v167_v12 = vunpack.c.h.bf16 %v133_v61  ;;  %v983_v22 = vld [vmem:[#allocation9 + $0x720] sm:$0xff] }
  0x30   :  { %1391 = vmatpush.msra.mxu2 %v1001_v48  ;;  %1411 = vmatpush.msra.mxu3 %v1097_v49  ;;  %v797_v0 = vld [vmem:[#allocation9 + $0x150] sm:$0xff]  ;;  %v162_v3 = vunpack.c.l.bf16 %v131_v57  ;;  %v163_v4 = vunpack.c.h.bf16 %v131_v57  ;;  %v168_v13 = vunpack.c.l.bf16 %v2605_v62  ;;  %v1079_v23 = vld [vmem:[#allocation9 + $0xa20] sm:$0xff]  ;;  %v169_v24 = vunpack.c.h.bf16 %v2605_v62 }
  0x31   :  { %2340 = vperm.xlu1 %2333, %v2339_v14   ;;  %v893_v1 = vld [vmem:[#allocation9 + $0x450] sm:$0xff]  ;;  %1352 = vmatpush.msra.mxu0 %v803_v50  ;;  %v791_v14 = vld [vmem:[#allocation9 + $0x120] sm:$0xff] }
  0x32   :  { %2350 = vset.pattern.permute.xlu2 %v2546_v18  ;;  %1372 = vmatpush.msra.mxu1 %v899_v51  ;;  %v989_v5 = vld [vmem:[#allocation9 + $0x750] sm:$0xff]  ;;  %v2631_v62 = vld [vmem:[#allocation4] sm:$0xff] }
  0x33   :  { %v1085_v6 = vld [vmem:[#allocation9 + $0xa50] sm:$0xff]  ;;  %1392 = vmatpush.msra.mxu2 %v995_v52  ;;  %1412 = vmatpush.msra.mxu3 %v1091_v53 }
  0x34   :  { %v2610_v10 = vld [vmem:[#allocation4 + $0x58] sm:$0xff]  ;;  %1353 = vmatpush.msra.mxu0 %v797_v0  ;;  %1373 = vmatpush.msra.mxu1 %v893_v1 }
  0x35   :  { %1393 = vmatpush.msra.mxu2 %v989_v5  ;;  %1413 = vmatpush.msra.mxu3 %v1085_v6  ;;  %v170_v25 = vunpack.c.l.bf16 %v2610_v10  ;;  %v785_v28 = vld [vmem:[#allocation9 + $0xf0] sm:$0xff] }
  0x36   :  { %2329 = vperm.xlu0 %2327, %v2328_v17   ;;  %v887_v17 = vld [vmem:[#allocation9 + $0x420] sm:$0xff]  ;;  %1354 = vmatpush.msra.mxu0 %v791_v14  ;;  %v881_v29 = vld [vmem:[#allocation9 + $0x3f0] sm:$0xff] }
  0x37   :  { %1374 = vmatpush.msra.mxu1 %v887_v17  ;;  %v977_v34 = vld [vmem:[#allocation9 + $0x6f0] sm:$0xff]  ;;  %1394 = vmatpush.msra.mxu2 %v983_v22 }
  0x38   :  { %1414 = vmatpush.msra.mxu3 %v1079_v23  ;;  %v1073_v40 = vld [vmem:[#allocation9 + $0x9f0] sm:$0xff]  ;;  %1355 = vmatpush.msra.mxu0 %v785_v28 }
  0x39   :  { %1375 = vmatpush.msra.mxu1 %v881_v29  ;;  %1395 = vmatpush.msra.mxu2 %v977_v34  ;;  %v971_v34 = vld [vmem:[#allocation9 + $0x6c0] sm:$0xff] }
  0x3a   :  { %1415 = vmatpush.msra.mxu3 %v1073_v40  ;;  %v773_v40 = vld [vmem:[#allocation9 + $0x90] sm:$0xff] }
  0x3b   :  { %1396 = vmatpush.msra.mxu2 %v971_v34 }
  0x3e   :  { %2351 = vset.pattern.permute.xlu0 %v2546_v18 }
  0x95   :  { %v715_v26 = vpop.xlane.xlu0 %714 }
  0x96   :  { %v716_v30 = vadd.f32 %v715_v26, %v711_v19 }
  0x98   :  { %718 = vst.msk [vmem:[#allocation3] sm:$0xff] %vm122_vm0, %v716_v30  ;;  %v171_v30 = vunpack.c.h.bf16 %v2610_v10 }
  0x9b   :  { %v2336_v55 = vpop.permute.xlu1 %2335 }
  0x9c   :  { %v2337_v59 = vunpack.i.l.bf16 %v2336_v55  ;;  %v2608_v9 = vunpack.i.h.bf16 %v2336_v55 }
  0x9e   :  { %v272_v16 = vmul.f32 %v2337_v59, %v160_v63  ;;  %v273_v19 = vmul.f32 %v2337_v59, %v161_v2  ;;  %v274_v20 = vmul.f32 %v2337_v59, %v162_v3  ;;  %v275_v21 = vmul.f32 %v2337_v59, %v163_v4 }
  0x9f   :  { %v722_v54 = vld [vmem:[#allocation3] sm:$0xff]  ;;  %v276_v26 = vmul.f32 %v2337_v59, %v164_v7  ;;  %v277_v27 = vmul.f32 %v2337_v59, %v165_v8  ;;  %v278_v31 = vmul.f32 %v2608_v9, %v166_v11  ;;  %v2621_v32 = vmul.f32 %v2608_v9, %v167_v12 }
  0xa0   :  { %v2603_v58 = vmax.f32 %v722_v54, 1e-09  ;;  %v2624_v33 = vmul.f32 %v2608_v9, %v168_v13  ;;  %v380_v36 = vrot.slane %v272_v16, 4  ;;  %v386_v37 = vrot.slane %v273_v19, 4 }
  0xa1   :  { %v392_v38 = vrot.slane %v274_v20, 4  ;;  %v398_v39 = vrot.slane %v275_v21, 4  ;;  %v404_v43 = vrot.slane %v276_v26, 4  ;;  %v410_v44 = vrot.slane %v277_v27, 4 }
  0xa2   :  { %2353 = vrcp.f32 %v2603_v58  ;;  %v733_v15 = vand.u32 2147483647, %v2603_v58  ;;  %v735_v18 = vand.u32 2147483648, %v2603_v58  ;;  %vm729_vm2 = vweird.f32 %v2603_v58 }
  0xa3   :  { %v381_v45 = vadd.f32 %v380_v36, %v272_v16  ;;  %v387_v46 = vadd.f32 %v386_v37, %v273_v19  ;;  %v393_v47 = vadd.f32 %v392_v38, %v274_v20  ;;  %v399_v48 = vadd.f32 %v398_v39, %v275_v21  ;;  %v125_v19 = vld [vmem:[#allocation4 + $0x8] sm:$0xff]  ;;  %v810_v21 = vld [vmem:[#allocation9 + $0x1b8] sm:$0xff] }
  0xa4   :  { %vm2627_vm4 = vcmp.eq.f32.partialorder %v733_v15, 8.507059e+37  ;;  %v405_v50 = vadd.f32 %v404_v43, %v276_v26  ;;  %v411_v51 = vadd.f32 %v410_v44, %v277_v27  ;;  %v416_v52 = vrot.slane %v278_v31, 4  ;;  %v1067_v39 = vld [vmem:[#allocation9 + $0x9c0] sm:$0xff]  ;;  %v906_v20 = vld [vmem:[#allocation9 + $0x4b8] sm:$0xff] }
  0xa5   :  { %v382_v53 = vrot.slane %v381_v45, 2  ;;  %v388_v54 = vrot.slane %v387_v46, 2  ;;  %v394_v55 = vrot.slane %v393_v47, 2  ;;  %v400_v56 = vrot.slane %v399_v48, 2  ;;  %v128_v43 = vld [vmem:[#allocation4 + $0x20] sm:$0xff]  ;;  %1416 = vmatpush.msra.mxu3 %v1067_v39 }
  0xa6   :  { %v406_v59 = vrot.slane %v405_v50, 2  ;;  %v412_v60 = vrot.slane %v411_v51, 2  ;;  %v417_v61 = vadd.f32 %v416_v52, %v278_v31  ;;  %v281_v63 = vmul.f32 %v2608_v9, %v169_v24  ;;  %v126_v24 = vld [vmem:[#allocation4 + $0x10] sm:$0xff]  ;;  %v875_v31 = vld [vmem:[#allocation9 + $0x3c0] sm:$0xff] }
  0xa7   :  { %v282_v0 = vmul.f32 %v2608_v9, %v170_v25  ;;  %v2635_v1 = vadd.f32 %v382_v53, %v381_v45  ;;  %v2637_v2 = vadd.f32 %v388_v54, %v387_v46  ;;  %v283_v4 = vmul.f32 %v2608_v9, %v171_v30  ;;  %v127_v25 = vld [vmem:[#allocation4 + $0x18] sm:$0xff]  ;;  %v779_v30 = vld [vmem:[#allocation9 + $0xc0] sm:$0xff]  ;;  %1376 = vmatpush.msra.mxu1 %v875_v31 }
  0xa8   :  { %v2354_v35 = vpop.eup %2353  ;;  %v2640_v5 = vadd.f32 %v394_v55, %v393_v47  ;;  %v2642_v6 = vadd.f32 %v400_v56, %v399_v48  ;;  %v736_v7 = vor.u32 1.1754944e-38, %v735_v18  ;;  %v2649_v8 = vadd.f32 %v406_v59, %v405_v50  ;;  %v2330_v18 = vpop.permute.xlu0 %2329  ;;  %1356 = vmatpush.msra.mxu0 %v779_v30  ;;  %v965_v45 = vld [vmem:[#allocation9 + $0x690] sm:$0xff]  ;;  %v129_v48 = vld [vmem:[#allocation4 + $0x28] sm:$0xff] }
  0xa9   :  { %v725_v41 = vmul.f32 %v2354_v35, %v2603_v58  ;;  %vm730_vm3 = vweird.f32 %v2354_v35  ;;  %v418_v10 = vrot.slane %v417_v61, 2  ;;  %v148_v11 = vunpack.c.l.bf16 %v2631_v62  ;;  %v1061_v46 = vld [vmem:[#allocation9 + $0x990] sm:$0xff]  ;;  %1397 = vmatpush.msra.mxu2 %v965_v45  ;;  %v1055_v45 = vld [vmem:[#allocation9 + $0x960] sm:$0xff] }
  0xaa   :  { %vm731_vm5 = vmor %vm729_vm2, %vm730_vm3  ;;  %v2654_v14 = vadd.f32 %v412_v60, %v411_v51  ;;  %v422_v16 = vrot.slane %v2621_v32, 4  ;;  %v428_v58 = vrot.slane %v2624_v33, 4  ;;  %v434_v17 = vrot.slane %v281_v63, 4  ;;  %1357 = vmatpush.msra.mxu0 %v773_v40  ;;  %1417 = vmatpush.msra.mxu3 %v1061_v46 }
  0xab   :  { %v726_v49 = vsub.f32 1.0, %v725_v41  ;;  %v440_v22 = vrot.slane %v282_v0, 4  ;;  %v446_v23 = vrot.slane %v283_v4, 4  ;;  %v2662_v26 = vadd.f32 %v418_v10, %v417_v61  ;;  %v869_v41 = vld [vmem:[#allocation9 + $0x390] sm:$0xff] }
  0xac   :  { %v423_v27 = vadd.f32 %v422_v16, %v2621_v32  ;;  %v429_v28 = vadd.f32 %v428_v58, %v2624_v33  ;;  %v2666_v29 = vadd.f32 %v434_v17, %v281_v63  ;;  %v2332_v37 = vunpack.i.h.bf16 %v2330_v18  ;;  %1377 = vmatpush.msra.mxu1 %v869_v41  ;;  %v767_v41 = vld [vmem:[#allocation9 + $0x60] sm:$0xff]  ;;  %1418 = vmatpush.msra.mxu3 %v1055_v45 }
  0xad   :  { %v727_v57 = vmul.f32 %v2354_v35, %v726_v49  ;;  %v2670_v36 = vadd.f32 %v446_v23, %v283_v4  ;;  %v2331_v38 = vunpack.i.l.bf16 %v2330_v18  ;;  %v149_v33 = vunpack.c.h.bf16 %v2631_v62  ;;  %1358 = vmatpush.msra.mxu0 %v767_v41  ;;  %v1043_v41 = vld [vmem:[#allocation9 + $0x900] sm:$0xff] }
  0xae   :  { %v424_v42 = vrot.slane %v423_v27, 2  ;;  %v430_v32 = vrot.slane %v429_v28, 2  ;;  %v150_v44 = vunpack.c.l.bf16 %v125_v19  ;;  %v436_v47 = vrot.slane %v2666_v29, 2 }
  0xaf   :  { %v728_v3 = vadd.f32 %v2354_v35, %v727_v57  ;;  %v151_v49 = vunpack.c.h.bf16 %v125_v19  ;;  %v152_v50 = vunpack.c.l.bf16 %v126_v24  ;;  %v153_v51 = vunpack.c.h.bf16 %v126_v24 }
  0xb0   :  { %v448_v53 = vrot.slane %v2670_v36, 2  ;;  %v154_v54 = vunpack.c.l.bf16 %v127_v25  ;;  %v155_v55 = vunpack.c.h.bf16 %v127_v25  ;;  %v2676_v56 = vadd.f32 %v424_v42, %v423_v27  ;;  %v863_v42 = vld [vmem:[#allocation9 + $0x360] sm:$0xff] }
  0xb1   :  { %v732_v12 = vsel %vm731_vm5, %v2354_v35, %v728_v3  ;;  %v2668_v35 = vadd.f32 %v440_v22, %v282_v0  ;;  %v2678_v57 = vadd.f32 %v430_v32, %v429_v28  ;;  %v156_v59 = vunpack.c.l.bf16 %v128_v43  ;;  %v959_v32 = vld [vmem:[#allocation9 + $0x660] sm:$0xff]  ;;  %1378 = vmatpush.msra.mxu1 %v863_v42 }
  0xb2   :  { %v737_v15 = vsel %vm2627_vm4, %v736_v7, %v732_v12  ;;  %v157_v60 = vunpack.c.h.bf16 %v128_v43  ;;  %v158_v61 = vunpack.c.l.bf16 %v129_v48  ;;  %v159_v62 = vunpack.c.h.bf16 %v129_v48  ;;  %1398 = vmatpush.msra.mxu2 %v959_v32 }
  0xb3   :  { %746 = vperm.xlu2 %2350, %v737_v15   ;;  %v442_v52 = vrot.slane %v2668_v35, 2  ;;  %v260_v63 = vmul.f32 %v2331_v38, %v148_v11  ;;  %v261_v0 = vmul.f32 %v2331_v38, %v149_v33  ;;  %v262_v3 = vmul.f32 %v2331_v38, %v150_v44 }
  0xb4   :  { %v263_v4 = vmul.f32 %v2331_v38, %v151_v49  ;;  %v264_v7 = vmul.f32 %v2331_v38, %v152_v50  ;;  %v265_v10 = vmul.f32 %v2331_v38, %v153_v51  ;;  %v266_v12 = vmul.f32 %v2332_v37, %v154_v54 }
  0xb5   :  { %v267_v15 = vmul.f32 %v2332_v37, %v155_v55  ;;  %v2680_v16 = vmul.f32 %v2332_v37, %v156_v59  ;;  %v2682_v58 = vmul.f32 %v2332_v37, %v157_v60  ;;  %v2684_v17 = vmul.f32 %v2332_v37, %v158_v61 }
  0xb6   :  { %v2686_v18 = vmul.f32 %v2332_v37, %v159_v62  ;;  %v308_v19 = vrot.slane %v260_v63, 4  ;;  %v314_v22 = vrot.slane %v261_v0, 4  ;;  %v320_v23 = vrot.slane %v262_v3, 4 }
  0xb7   :  { %v326_v24 = vrot.slane %v263_v4, 4  ;;  %v332_v11 = vrot.slane %v264_v7, 4  ;;  %v338_v25 = vrot.slane %v265_v10, 4  ;;  %v344_v30 = vrot.slane %v266_v12, 4 }
  0xb8   :  { %v309_v27 = vadd.f32 %v308_v19, %v260_v63  ;;  %v315_v28 = vadd.f32 %v314_v22, %v261_v0  ;;  %v350_v31 = vrot.slane %v267_v15, 4  ;;  %v321_v34 = vadd.f32 %v320_v23, %v262_v3  ;;  %v761_v22 = vld [vmem:[#allocation9 + $0x30] sm:$0xff] }
  0xb9   :  { %v327_v38 = vadd.f32 %v326_v24, %v263_v4  ;;  %v333_v39 = vadd.f32 %v332_v11, %v264_v7  ;;  %v339_v40 = vadd.f32 %v338_v25, %v265_v10  ;;  %v345_v33 = vadd.f32 %v344_v30, %v266_v12  ;;  %v857_v23 = vld [vmem:[#allocation9 + $0x330] sm:$0xff]  ;;  %1359 = vmatpush.msra.mxu0 %v761_v22 }
  0xba   :  { %v310_v43 = vrot.slane %v309_v27, 2  ;;  %v316_v37 = vrot.slane %v315_v28, 2  ;;  %v351_v44 = vadd.f32 %v350_v31, %v267_v15  ;;  %v322_v46 = vrot.slane %v321_v34, 2  ;;  %1379 = vmatpush.msra.mxu1 %v857_v23  ;;  %v953_v30 = vld [vmem:[#allocation9 + $0x630] sm:$0xff] }
  0xbb   :  { %v328_v48 = vrot.slane %v327_v38, 2  ;;  %v334_v49 = vrot.slane %v333_v39, 2  ;;  %v340_v50 = vrot.slane %v339_v40, 2  ;;  %v346_v55 = vrot.slane %v345_v33, 2  ;;  %v1049_v31 = vld [vmem:[#allocation9 + $0x930] sm:$0xff]  ;;  %1399 = vmatpush.msra.mxu2 %v953_v30 }
  0xbc   :  { %v311_v51 = vadd.f32 %v310_v43, %v309_v27  ;;  %v317_v54 = vadd.f32 %v316_v37, %v315_v28  ;;  %v352_v59 = vrot.slane %v351_v44, 2  ;;  %v323_v60 = vadd.f32 %v322_v46, %v321_v34  ;;  %v2698_v28 = vld [vmem:[#allocation4 + $0x60] sm:$0xff]  ;;  %1419 = vmatpush.msra.mxu3 %v1049_v31  ;;  %v1325_v37 = vld [vmem:[#allocation9 + $0x11d0] sm:$0xff] }
  0xbd   :  { %v329_v61 = vadd.f32 %v328_v48, %v327_v38  ;;  %v335_v62 = vadd.f32 %v334_v49, %v333_v39  ;;  %v341_v63 = vadd.f32 %v340_v50, %v339_v40  ;;  %v347_v4 = vadd.f32 %v346_v55, %v345_v33  ;;  %v755_v34 = vld [vmem:[#allocation9] sm:$0xff]  ;;  %v846_v33 = vld [vmem:[#allocation9 + $0x2d8] sm:$0xff] }
  0xbe   :  { %v312_v0 = vrot.slane %v311_v51, 1  ;;  %v318_v3 = vrot.slane %v317_v54, 1  ;;  %v353_v7 = vadd.f32 %v352_v59, %v351_v44  ;;  %v324_v10 = vrot.slane %v323_v60, 1  ;;  %v851_v39 = vld [vmem:[#allocation9 + $0x300] sm:$0xff]  ;;  %1360 = vmatpush.msra.mxu0 %v755_v34  ;;  %v942_v50 = vld [vmem:[#allocation9 + $0x5d8] sm:$0xff]  ;;  %1420 = vmatpush.msra.mxu3 %v1043_v41 }
  0xbf   :  { %v330_v12 = vrot.slane %v329_v61, 1  ;;  %v336_v15 = vrot.slane %v335_v62, 1  ;;  %v342_v19 = vrot.slane %v341_v63, 1  ;;  %v2691_v24 = vadd.f32 %v436_v47, %v2666_v29  ;;  %v947_v40 = vld [vmem:[#allocation9 + $0x600] sm:$0xff]  ;;  %1380 = vmatpush.msra.mxu1 %v851_v39  ;;  %v930_v34 = vld [vmem:[#allocation9 + $0x578] sm:$0xff] }
  0xc0   :  { %v2696_v11 = vadd.f32 %v442_v52, %v2668_v35  ;;  %v348_v25 = vrot.slane %v347_v4, 1  ;;  %v354_v27 = vrot.slane %v353_v7, 1  ;;  %v2703_v38 = vadd.f32 %v448_v53, %v2670_v36  ;;  %v2341_v52 = vpop.permute.xlu1 %2340  ;;  %v1229_v53 = vld [vmem:[#allocation9 + $0xed0] sm:$0xff]  ;;  %v2723_v49 = vld [vmem:[#allocation4 + $0x68] sm:$0xff]  ;;  %1400 = vmatpush.msra.mxu2 %v947_v40  ;;  %1485 = vmatpush.msrb.mxu3 %v942_v50 }
  0xc1   :  { %v2705_v29 = vadd.f32 %v312_v0, %v311_v51  ;;  %v2707_v47 = vadd.f32 %v318_v3, %v317_v54  ;;  %v2709_v35 = vadd.f32 %v324_v10, %v323_v60  ;;  %v2711_v42 = vadd.f32 %v330_v12, %v329_v61  ;;  %v1223_v51 = vld [vmem:[#allocation9 + $0xea0] sm:$0xff]  ;;  %v2731_v61 = vld [vmem:[#allocation4 + $0x70] sm:$0xff]  ;;  %1425 = vmatpush.msrb.mxu0 %v1229_v53  ;;  %v2735_v10 = vld [vmem:[#allocation4 + $0x78] sm:$0xff] }
  0xc2   :  { %v2713_v32 = vadd.f32 %v336_v15, %v335_v62  ;;  %v356_v43 = vrot.slane %v2680_v16, 4  ;;  %v362_v36 = vrot.slane %v2682_v58, 4  ;;  %v2717_v44 = vadd.f32 %v342_v19, %v341_v63  ;;  %v1319_v62 = vld [vmem:[#allocation9 + $0x11a0] sm:$0xff]  ;;  %v840_v63 = vld [vmem:[#allocation9 + $0x2a8] sm:$0xff]  ;;  %1445 = vmatpush.msrb.mxu1 %v1325_v37  ;;  %1465 = vmatpush.msrb.mxu2 %v846_v33 }
  0xc3   :  { %v2719_v45 = vadd.f32 %v348_v25, %v347_v4  ;;  %v368_v46 = vrot.slane %v2684_v17, 4  ;;  %v374_v48 = vrot.slane %v2686_v18, 4  ;;  %v2725_v54 = vadd.f32 %v354_v27, %v353_v7  ;;  %v2738_v19 = vld [vmem:[#allocation4 + $0x80] sm:$0xff]  ;;  %1426 = vmatpush.msrb.mxu0 %v1223_v51  ;;  %v2750_v33 = vld [vmem:[#allocation4 + $0x88] sm:$0xff] }
  0xc4   :  { %3184 = vst [vmem:[#allocation21_spill] sm:$0xff] %v2713_v32  ;;  %v357_v55 = vadd.f32 %v356_v43, %v2680_v16  ;;  %v363_v59 = vadd.f32 %v362_v36, %v2682_v58  ;;  %v2729_v60 = vunpack.i.h.bf16 %v2341_v52  ;;  %v2342_v4 = vunpack.i.l.bf16 %v2341_v52  ;;  %v936_v16 = vld [vmem:[#allocation9 + $0x5a8] sm:$0xff]  ;;  %v1217_v58 = vld [vmem:[#allocation9 + $0xe70] sm:$0xff]  ;;  %1446 = vmatpush.msrb.mxu1 %v1319_v62  ;;  %1466 = vmatpush.msrb.mxu2 %v840_v63  ;;  %v1211_v52 = vld [vmem:[#allocation9 + $0xe40] sm:$0xff] }
  0xc5   :  { %3185 = vst [vmem:[#allocation22_spill] sm:$0xff] %v2717_v44  ;;  %v369_v0 = vadd.f32 %v368_v46, %v2684_v17  ;;  %v375_v3 = vadd.f32 %v374_v48, %v2686_v18  ;;  %v172_v7 = vunpack.c.l.bf16 %v2698_v28  ;;  %v173_v22 = vunpack.c.h.bf16 %v2698_v28  ;;  %v1313_v17 = vld [vmem:[#allocation9 + $0x1170] sm:$0xff]  ;;  %v834_v18 = vld [vmem:[#allocation9 + $0x278] sm:$0xff]  ;;  %1486 = vmatpush.msrb.mxu3 %v936_v16  ;;  %1427 = vmatpush.msrb.mxu0 %v1217_v58  ;;  %v1307_v43 = vld [vmem:[#allocation9 + $0x1140] sm:$0xff] }
  0xc6   :  { %v358_v12 = vrot.slane %v357_v55, 2  ;;  %v364_v15 = vrot.slane %v363_v59, 2  ;;  %v174_v23 = vunpack.c.l.bf16 %v2723_v49  ;;  %v175_v30 = vunpack.c.h.bf16 %v2723_v49  ;;  %v828_v36 = vld [vmem:[#allocation9 + $0x248] sm:$0xff]  ;;  %1447 = vmatpush.msrb.mxu1 %v1313_v17  ;;  %1467 = vmatpush.msrb.mxu2 %v834_v18  ;;  %v786_v32 = vld [vmem:[#allocation9 + $0xf8] sm:$0xff] }
  0xc7   :  { %v370_v25 = vrot.slane %v369_v0, 2  ;;  %v376_v27 = vrot.slane %v375_v3, 2  ;;  %v176_v31 = vunpack.c.l.bf16 %v2731_v61  ;;  %v177_v28 = vunpack.c.h.bf16 %v2731_v61  ;;  %v924_v49 = vld [vmem:[#allocation9 + $0x548] sm:$0xff]  ;;  %1487 = vmatpush.msrb.mxu3 %v930_v34  ;;  %1428 = vmatpush.msrb.mxu0 %v1211_v52  ;;  %v1205_v61 = vld [vmem:[#allocation9 + $0xe10] sm:$0xff] }
  0xc8   :  { %v359_v39 = vadd.f32 %v358_v12, %v357_v55  ;;  %v365_v40 = vadd.f32 %v364_v15, %v363_v59  ;;  %v178_v41 = vunpack.c.l.bf16 %v2735_v10  ;;  %v179_v46 = vunpack.c.h.bf16 %v2735_v10  ;;  %1448 = vmatpush.msrb.mxu1 %v1307_v43  ;;  %1468 = vmatpush.msrb.mxu2 %v828_v36  ;;  %v1301_v10 = vld [vmem:[#allocation9 + $0x1110] sm:$0xff]  ;;  %v816_v52 = vld [vmem:[#allocation9 + $0x1e8] sm:$0xff] }
  0xc9   :  { %v2746_v53 = vadd.f32 %v370_v25, %v369_v0  ;;  %v2748_v37 = vadd.f32 %v376_v27, %v375_v3  ;;  %v180_v48 = vunpack.c.l.bf16 %v2738_v19  ;;  %v181_v55 = vunpack.c.h.bf16 %v2738_v19  ;;  %1488 = vmatpush.msrb.mxu3 %v924_v49  ;;  %v822_v19 = vld [vmem:[#allocation9 + $0x218] sm:$0xff]  ;;  %1429 = vmatpush.msrb.mxu0 %v1205_v61  ;;  %v1199_v25 = vld [vmem:[#allocation9 + $0xde0] sm:$0xff] }
  0xca   :  { %v360_v50 = vrot.slane %v359_v39, 1  ;;  %v366_v51 = vrot.slane %v365_v40, 1  ;;  %v284_v59 = vmul.f32 %v2342_v4, %v172_v7  ;;  %v285_v63 = vmul.f32 %v2342_v4, %v173_v22  ;;  %v918_v7 = vld [vmem:[#allocation9 + $0x518] sm:$0xff]  ;;  %v1295_v27 = vld [vmem:[#allocation9 + $0x10e0] sm:$0xff]  ;;  %1449 = vmatpush.msrb.mxu1 %v1301_v10  ;;  %1469 = vmatpush.msrb.mxu2 %v822_v19 }
  0xcb   :  { %v286_v0 = vmul.f32 %v2342_v4, %v174_v23  ;;  %v287_v3 = vmul.f32 %v2342_v4, %v175_v30  ;;  %v182_v16 = vunpack.c.l.bf16 %v2750_v33  ;;  %v288_v12 = vmul.f32 %v2342_v4, %v176_v31  ;;  %1489 = vmatpush.msrb.mxu3 %v918_v7  ;;  %1430 = vmatpush.msrb.mxu0 %v1199_v25  ;;  %v1187_v25 = vld [vmem:[#allocation9 + $0xd80] sm:$0xff] }
  0xcc   :  { %v289_v15 = vmul.f32 %v2342_v4, %v177_v28  ;;  %v372_v17 = vrot.slane %v2746_v53, 1  ;;  %v378_v18 = vrot.slane %v2748_v37, 1  ;;  %v290_v22 = vmul.f32 %v2729_v60, %v178_v41  ;;  %1450 = vmatpush.msrb.mxu1 %v1295_v27  ;;  %1470 = vmatpush.msrb.mxu2 %v816_v52  ;;  %v900_v52 = vld [vmem:[#allocation9 + $0x488] sm:$0xff] }
  0xcd   :  { %v291_v23 = vmul.f32 %v2729_v60, %v179_v46  ;;  %v2762_v30 = vadd.f32 %v360_v50, %v359_v39  ;;  %v2764_v34 = vadd.f32 %v366_v51, %v365_v40  ;;  %v2767_v4 = vmul.f32 %v2729_v60, %v180_v48  ;;  %v912_v46 = vld [vmem:[#allocation9 + $0x4e8] sm:$0xff]  ;;  %v1193_v48 = vld [vmem:[#allocation9 + $0xdb0] sm:$0xff] }
  0xce   :  { %v2770_v31 = vmul.f32 %v2729_v60, %v181_v55  ;;  %v452_v28 = vrot.slane %v284_v59, 4  ;;  %v458_v43 = vrot.slane %v285_v63, 4  ;;  %v464_v41 = vrot.slane %v286_v0, 4  ;;  %v1289_v51 = vld [vmem:[#allocation9 + $0x10b0] sm:$0xff]  ;;  %1490 = vmatpush.msrb.mxu3 %v912_v46  ;;  %1431 = vmatpush.msrb.mxu0 %v1193_v48  ;;  %v2796_v46 = vld [vmem:[#allocation4 + $0xa0] sm:$0xff] }
  0xcf   :  { %3186 = vst [vmem:[#allocation23_spill] sm:$0xff] %v2764_v34  ;;  %v470_v36 = vrot.slane %v287_v3, 4  ;;  %v476_v49 = vrot.slane %v288_v12, 4  ;;  %v482_v39 = vrot.slane %v289_v15, 4  ;;  %v488_v50 = vrot.slane %v290_v22, 4  ;;  %1451 = vmatpush.msrb.mxu1 %v1289_v51  ;;  %1471 = vmatpush.msrb.mxu2 %v810_v21  ;;  %v882_v34 = vld [vmem:[#allocation9 + $0x3f8] sm:$0xff] }
  0xd0   :  { %v494_v40 = vrot.slane %v291_v23, 4  ;;  %v453_v61 = vadd.f32 %v452_v28, %v284_v59  ;;  %v459_v55 = vadd.f32 %v458_v43, %v285_v63  ;;  %v465_v62 = vadd.f32 %v464_v41, %v286_v0  ;;  %v2778_v63 = vld [vmem:[#allocation4 + $0x90] sm:$0xff]  ;;  %v1283_v0 = vld [vmem:[#allocation9 + $0x1080] sm:$0xff]  ;;  %1491 = vmatpush.msrb.mxu3 %v906_v20  ;;  %1432 = vmatpush.msrb.mxu0 %v1187_v25 }
  0xd1   :  { %v471_v10 = vadd.f32 %v470_v36, %v287_v3  ;;  %v2773_v9 = vadd.f32 %v372_v17, %v2746_v53  ;;  %v2776_v19 = vadd.f32 %v378_v18, %v2748_v37  ;;  %v477_v7 = vadd.f32 %v476_v49, %v288_v12  ;;  %v2347_v12 = vpop.permute.xlu2 %2346  ;;  %v804_v18 = vld [vmem:[#allocation9 + $0x188] sm:$0xff]  ;;  %v1181_v49 = vld [vmem:[#allocation9 + $0xd50] sm:$0xff]  ;;  %1452 = vmatpush.msrb.mxu1 %v1283_v0 }
  0xd2   :  { %v483_v13 = vadd.f32 %v482_v39, %v289_v15  ;;  %v454_v27 = vrot.slane %v453_v61, 2  ;;  %v460_v58 = vrot.slane %v459_v55, 2  ;;  %v466_v44 = vrot.slane %v465_v62, 2  ;;  %v2784_v15 = vld [vmem:[#allocation4 + $0x98] sm:$0xff]  ;;  %1472 = vmatpush.msrb.mxu2 %v804_v18  ;;  %1492 = vmatpush.msrb.mxu3 %v900_v52 }
  0xd3   :  { %3187 = vst [vmem:[#allocation24_spill] sm:$0xff] %v2773_v9  ;;  %v472_v59 = vrot.slane %v471_v10, 2  ;;  %v2781_v3 = vmul.f32 %v2729_v60, %v182_v16  ;;  %v478_v53 = vrot.slane %v477_v7, 2  ;;  %v500_v37 = vrot.slane %v2767_v4, 4  ;;  %v1277_v39 = vld [vmem:[#allocation9 + $0x1050] sm:$0xff]  ;;  %1433 = vmatpush.msrb.mxu0 %v1181_v49 }
  0xd4   :  { %3188 = vst [vmem:[#allocation25_spill] sm:$0xff] %v2776_v19  ;;  %v484_v17 = vrot.slane %v483_v13, 2  ;;  %v3189_v28 = vunpack.c.h.bf16 %v2750_v33  ;;  %v2791_v41 = vadd.f32 %v488_v50, %v290_v22  ;;  %v2793_v16 = vadd.f32 %v494_v40, %v291_v23  ;;  %v798_v22 = vld [vmem:[#allocation9 + $0x158] sm:$0xff]  ;;  %1453 = vmatpush.msrb.mxu1 %v1277_v39 }
  0xd5   :  { %v506_v36 = vrot.slane %v2770_v31, 4  ;;  %v2798_v21 = vadd.f32 %v454_v27, %v453_v61  ;;  %v2800_v20 = vadd.f32 %v460_v58, %v459_v55  ;;  %v2802_v48 = vadd.f32 %v466_v44, %v465_v62  ;;  %v894_v23 = vld [vmem:[#allocation9 + $0x458] sm:$0xff]  ;;  %v146_v61 = vld [vmem:[#allocation4 + $0xb0] sm:$0xff]  ;;  %v1175_v58 = vld [vmem:[#allocation9 + $0xd20] sm:$0xff]  ;;  %1473 = vmatpush.msrb.mxu2 %v798_v22 }
  0xd6   :  { %v2789_v43 = vmul.f32 %v2729_v60, %v3189_v28  ;;  %v2804_v33 = vadd.f32 %v472_v59, %v471_v10  ;;  %v145_v60 = vld [vmem:[#allocation4 + $0xa8] sm:$0xff]  ;;  %v2806_v50 = vadd.f32 %v478_v53, %v477_v7  ;;  %v2808_v40 = vadd.f32 %v484_v17, %v483_v13  ;;  %v147_v62 = vld [vmem:[#allocation4 + $0xb8] sm:$0xff]  ;;  %1493 = vmatpush.msrb.mxu3 %v894_v23 }
  0xd7   :  { %v2811_v51 = vadd.f32 %v500_v37, %v2767_v4  ;;  %v2348_v25 = vunpack.i.l.bf16 %v2347_v12  ;;  %v1271_v44 = vld [vmem:[#allocation9 + $0x1020] sm:$0xff]  ;;  %v184_v55 = vunpack.c.l.bf16 %v2778_v63  ;;  %v185_v10 = vunpack.c.h.bf16 %v2778_v63  ;;  %v792_v13 = vld [vmem:[#allocation9 + $0x128] sm:$0xff]  ;;  %v1169_v37 = vld [vmem:[#allocation9 + $0xcf0] sm:$0xff]  ;;  %1434 = vmatpush.msrb.mxu0 %v1175_v58 }
  0xd8   :  { %v186_v27 = vunpack.c.l.bf16 %v2784_v15  ;;  %v187_v7 = vunpack.c.h.bf16 %v2784_v15  ;;  %v888_v4 = vld [vmem:[#allocation9 + $0x428] sm:$0xff]  ;;  %v512_v59 = vrot.slane %v2781_v3, 4  ;;  %v518_v0 = vrot.slane %v2789_v43, 4  ;;  %1454 = vmatpush.msrb.mxu1 %v1271_v44  ;;  %v1265_v15 = vld [vmem:[#allocation9 + $0xff0] sm:$0xff]  ;;  %1474 = vmatpush.msrb.mxu2 %v792_v13  ;;  %v1163_v23 = vld [vmem:[#allocation9 + $0xcc0] sm:$0xff] }
  0xd9   :  { %v188_v53 = vunpack.c.l.bf16 %v2796_v46  ;;  %v189_v17 = vunpack.c.h.bf16 %v2796_v46  ;;  %v2349_v63 = vunpack.i.h.bf16 %v2347_v12  ;;  %v190_v18 = vunpack.c.l.bf16 %v145_v60  ;;  %1494 = vmatpush.msrb.mxu3 %v888_v4  ;;  %1435 = vmatpush.msrb.mxu0 %v1169_v37 }
  0xda   :  { %v191_v52 = vunpack.c.h.bf16 %v145_v60  ;;  %v192_v28 = vunpack.c.l.bf16 %v146_v61  ;;  %v193_v49 = vunpack.c.h.bf16 %v146_v61  ;;  %v194_v39 = vunpack.c.l.bf16 %v147_v62  ;;  %v1259_v61 = vld [vmem:[#allocation9 + $0xfc0] sm:$0xff]  ;;  %1455 = vmatpush.msrb.mxu1 %v1265_v15  ;;  %1475 = vmatpush.msrb.mxu2 %v786_v32  ;;  %v864_v15 = vld [vmem:[#allocation9 + $0x368] sm:$0xff] }
  0xdb   :  { %v195_v19 = vunpack.c.h.bf16 %v147_v62  ;;  %v2821_v9 = vmul.f32 %v2348_v25, %v184_v55  ;;  %v2824_v46 = vadd.f32 %v506_v36, %v2770_v31  ;;  %v2826_v22 = vmul.f32 %v2348_v25, %v185_v10  ;;  %v780_v31 = vld [vmem:[#allocation9 + $0xc8] sm:$0xff]  ;;  %1495 = vmatpush.msrb.mxu3 %v882_v34  ;;  %1436 = vmatpush.msrb.mxu0 %v1163_v23  ;;  %v1151_v34 = vld [vmem:[#allocation9 + $0xc60] sm:$0xff] }
  0xdc   :  { %v2828_v12 = vmul.f32 %v2348_v25, %v186_v27  ;;  %v2830_v60 = vmul.f32 %v2348_v25, %v187_v7  ;;  %v2833_v58 = vadd.f32 %v512_v59, %v2781_v3  ;;  %v2836_v44 = vadd.f32 %v518_v0, %v2789_v43  ;;  %v876_v36 = vld [vmem:[#allocation9 + $0x3c8] sm:$0xff]  ;;  %v1157_v3 = vld [vmem:[#allocation9 + $0xc90] sm:$0xff]  ;;  %1456 = vmatpush.msrb.mxu1 %v1259_v61 }
  0xdd   :  { %v2838_v62 = vmul.f32 %v2348_v25, %v188_v53  ;;  %v2840_v55 = vmul.f32 %v2348_v25, %v189_v17  ;;  %v414_v10 = vrot.slane %v2654_v14, 1  ;;  %v2843_v27 = vmul.f32 %v2349_v63, %v190_v18  ;;  %v1253_v43 = vld [vmem:[#allocation9 + $0xf90] sm:$0xff]  ;;  %v774_v53 = vld [vmem:[#allocation9 + $0x98] sm:$0xff]  ;;  %1476 = vmatpush.msrb.mxu2 %v780_v31  ;;  %1496 = vmatpush.msrb.mxu3 %v876_v36 }
  0xde   :  { %v2845_v7 = vmul.f32 %v2349_v63, %v191_v52  ;;  %v2847_v13 = vmul.f32 %v2349_v63, %v192_v28  ;;  %v2849_v4 = vmul.f32 %v2349_v63, %v193_v49  ;;  %v2851_v59 = vmul.f32 %v2349_v63, %v194_v39  ;;  %v870_v17 = vld [vmem:[#allocation9 + $0x398] sm:$0xff]  ;;  %v1247_v52 = vld [vmem:[#allocation9 + $0xf60] sm:$0xff]  ;;  %1437 = vmatpush.msrb.mxu0 %v1157_v3  ;;  %v1145_v36 = vld [vmem:[#allocation9 + $0xc30] sm:$0xff] }
  0xdf   :  { %v2853_v25 = vmul.f32 %v2349_v63, %v195_v19  ;;  %v420_v28 = vrot.slane %v2662_v26, 1  ;;  %1457 = vmatpush.msrb.mxu1 %v1253_v43  ;;  %v768_v63 = vld [vmem:[#allocation9 + $0x68] sm:$0xff]  ;;  %v3190_v49 = vrot.slane %v2635_v1, 1  ;;  %v3191_v23 = vrot.slane %v2637_v2, 1  ;;  %1477 = vmatpush.msrb.mxu2 %v774_v53  ;;  %v1241_v19 = vld [vmem:[#allocation9 + $0xf30] sm:$0xff] }
  0xe0   :  { %v426_v31 = vrot.slane %v2676_v56, 1  ;;  %1497 = vmatpush.msrb.mxu3 %v870_v17  ;;  %v3192_v3 = vrot.slane %v2640_v5, 1  ;;  %v432_v32 = vrot.slane %v2678_v57, 1  ;;  %1438 = vmatpush.msrb.mxu0 %v1151_v34  ;;  %v3193_v53 = vrot.slane %v2642_v6, 1 }
  0xe1   :  { %v2864_v39 = vadd.f32 %v3190_v49, %v2635_v1  ;;  %v2869_v61 = vadd.f32 %v3191_v23, %v2637_v2  ;;  %v438_v1 = vrot.slane %v2691_v24, 1  ;;  %v444_v49 = vrot.slane %v2696_v11, 1  ;;  %1458 = vmatpush.msrb.mxu1 %v1247_v52  ;;  %v762_v2 = vld [vmem:[#allocation9 + $0x38] sm:$0xff]  ;;  %1478 = vmatpush.msrb.mxu2 %v768_v63 }
  0xe2   :  { %v2875_v43 = vadd.f32 %v3192_v3, %v2640_v5  ;;  %v858_v23 = vld [vmem:[#allocation9 + $0x338] sm:$0xff]  ;;  %v2883_v17 = vadd.f32 %v3193_v53, %v2642_v6  ;;  %v3194_v18 = vrot.slane %v2649_v8, 1  ;;  %v450_v3 = vrot.slane %v2703_v38, 1  ;;  %1498 = vmatpush.msrb.mxu3 %v864_v15  ;;  %1439 = vmatpush.msrb.mxu0 %v1145_v36 }
  0xe3   :  { %v456_v37 = vrot.slane %v2798_v21, 1  ;;  %v554_v0 = vrot.slane %v2840_v55, 4  ;;  %v2894_v34 = vadd.f32 %v414_v10, %v2654_v14  ;;  %v2897_v52 = vadd.f32 %v420_v28, %v2662_v26  ;;  %1459 = vmatpush.msrb.mxu1 %v1241_v19  ;;  %1479 = vmatpush.msrb.mxu2 %v762_v2 }
  0xe4   :  { %v2888_v5 = vadd.f32 %v3194_v18, %v2649_v8  ;;  %v2900_v6 = vadd.f32 %v426_v31, %v2676_v56  ;;  %v2903_v8 = vadd.f32 %v432_v32, %v2678_v57  ;;  %v2906_v18 = vadd.f32 %v438_v1, %v2691_v24  ;;  %1499 = vmatpush.msrb.mxu3 %v858_v23 }
  0xe5   :  { %v2909_v63 = vadd.f32 %v444_v49, %v2696_v11  ;;  %v462_v14 = vrot.slane %v2800_v20, 1  ;;  %v2913_v26 = vadd.f32 %v450_v3, %v2703_v38  ;;  %v2916_v56 = vadd.f32 %v456_v37, %v2798_v21 }
  0xe6   :  { %v468_v10 = vrot.slane %v2802_v48, 1  ;;  %v490_v57 = vrot.slane %v2791_v41, 2  ;;  %v474_v24 = vrot.slane %v2804_v33, 1  ;;  %v496_v32 = vrot.slane %v2793_v16, 2 }
  0xe7   :  { %3195 = vst [vmem:[#allocation26_spill] sm:$0xff] %v2913_v26  ;;  %v502_v11 = vrot.slane %v2811_v51, 2  ;;  %v508_v28 = vrot.slane %v2824_v46, 2  ;;  %v480_v19 = vrot.slane %v2806_v50, 1  ;;  %v486_v38 = vrot.slane %v2808_v40, 1 }
  0xe8   :  { %v491_v15 = vadd.f32 %v490_v57, %v2791_v41  ;;  %v514_v21 = vrot.slane %v2833_v58, 2  ;;  %v497_v37 = vadd.f32 %v496_v32, %v2793_v16  ;;  %v520_v1 = vrot.slane %v2836_v44, 2 }
  0xe9   :  { %v503_v31 = vadd.f32 %v502_v11, %v2811_v51  ;;  %v509_v36 = vadd.f32 %v508_v28, %v2824_v46  ;;  %v3196_v23 = vrot.slane %v2821_v9, 4  ;;  %v3197_v41 = vrot.slane %v2826_v22, 4 }
  0xea   :  { %v492_v49 = vrot.slane %v491_v15, 1  ;;  %v515_v2 = vadd.f32 %v514_v21, %v2833_v58  ;;  %v2940_v57 = vadd.f32 %v462_v14, %v2800_v20  ;;  %v2943_v16 = vadd.f32 %v468_v10, %v2802_v48 }
  0xeb   :  { %v525_v53 = vadd.f32 %v3196_v23, %v2821_v9  ;;  %v531_v3 = vadd.f32 %v3197_v41, %v2826_v22  ;;  %v2946_v51 = vadd.f32 %v474_v24, %v2804_v33  ;;  %v498_v46 = vrot.slane %v497_v37, 1  ;;  %v756_v23 = vld [vmem:[#allocation9 + $0x8] sm:$0xff] }
  0xec   :  { %v504_v32 = vrot.slane %v503_v31, 1  ;;  %v521_v58 = vadd.f32 %v520_v1, %v2836_v44  ;;  %v2950_v9 = vadd.f32 %v480_v19, %v2806_v50  ;;  %v2953_v22 = vadd.f32 %v486_v38, %v2808_v40  ;;  %v1139_v44 = vld [vmem:[#allocation9 + $0xc00] sm:$0xff]  ;;  %1480 = vmatpush.msrb.mxu2 %v756_v23 }
  0xed   :  { %v526_v11 = vrot.slane %v525_v53, 2  ;;  %v532_v28 = vrot.slane %v531_v3, 2  ;;  %v2955_v20 = vadd.f32 %v492_v49, %v491_v15  ;;  %v510_v14 = vrot.slane %v509_v36, 1  ;;  %v1235_v1 = vld [vmem:[#allocation9 + $0xf00] sm:$0xff]  ;;  %1440 = vmatpush.msrb.mxu0 %v1139_v44 }
  0xee   :  { %3198 = vst [vmem:[#allocation27_spill] sm:$0xff] %v2953_v22  ;;  %v2957_v48 = vadd.f32 %v498_v46, %v497_v37  ;;  %v516_v10 = vrot.slane %v515_v2, 1  ;;  %v3199_v24 = vrot.slane %v2828_v12, 4  ;;  %v3200_v50 = vrot.slane %v2830_v60, 4  ;;  %v852_v37 = vld [vmem:[#allocation9 + $0x308] sm:$0xff]  ;;  %1460 = vmatpush.msrb.mxu1 %v1235_v1 }
  0xef   :  { %v527_v33 = vadd.f32 %v526_v11, %v525_v53  ;;  %v533_v41 = vadd.f32 %v532_v28, %v531_v3  ;;  %v3201_v19 = vrot.slane %v2838_v62, 4  ;;  %v555_v15 = vadd.f32 %v554_v0, %v2840_v55  ;;  %1500 = vmatpush.msrb.mxu3 %v852_v37 }
  0xf0   :  { %v537_v21 = vadd.f32 %v3199_v24, %v2828_v12  ;;  %v543_v40 = vadd.f32 %v3200_v50, %v2830_v60  ;;  %v2969_v49 = vadd.f32 %v504_v32, %v503_v31  ;;  %v522_v53 = vrot.slane %v521_v58, 1 }
  0xf1   :  { %v549_v38 = vadd.f32 %v3201_v19, %v2838_v62  ;;  %v560_v46 = vrot.slane %v2843_v27, 4  ;;  %v556_v28 = vrot.slane %v555_v15, 2  ;;  %v566_v60 = vrot.slane %v2845_v7, 4 }
  0xf2   :  { %v538_v12 = vrot.slane %v537_v21, 2  ;;  %v544_v3 = vrot.slane %v543_v40, 2  ;;  %v2973_v24 = vadd.f32 %v510_v14, %v509_v36  ;;  %v528_v62 = vrot.slane %v527_v33, 1 }
  0xf3   :  { %v550_v11 = vrot.slane %v549_v38, 2  ;;  %v561_v0 = vadd.f32 %v560_v46, %v2843_v27  ;;  %v534_v31 = vrot.slane %v533_v41, 1  ;;  %v567_v50 = vadd.f32 %v566_v60, %v2845_v7 }
  0xf4   :  { %v539_v55 = vadd.f32 %v538_v12, %v537_v21  ;;  %v545_v32 = vadd.f32 %v544_v3, %v543_v40  ;;  %v2977_v19 = vadd.f32 %v556_v28, %v555_v15  ;;  %v572_v23 = vrot.slane %v2847_v13, 4 }
  0xf5   :  { %v551_v44 = vadd.f32 %v550_v11, %v549_v38  ;;  %v562_v1 = vrot.slane %v561_v0, 2  ;;  %v578_v22 = vrot.slane %v2849_v4, 4  ;;  %v2981_v26 = vadd.f32 %v516_v10, %v515_v2 }
  0xf6   :  { %v2983_v36 = vadd.f32 %v522_v53, %v521_v58  ;;  %v540_v14 = vrot.slane %v539_v55, 1  ;;  %v568_v21 = vrot.slane %v567_v50, 2  ;;  %v529_v37 = vadd.f32 %v528_v62, %v527_v33 }
  0xf7   :  { %v563_v27 = vadd.f32 %v562_v1, %v561_v0  ;;  %v573_v40 = vadd.f32 %v572_v23, %v2847_v13  ;;  %v579_v38 = vadd.f32 %v578_v22, %v2849_v4  ;;  %v535_v7 = vadd.f32 %v534_v31, %v533_v41 }
  0xf8   :  { %v546_v15 = vrot.slane %v545_v32, 1  ;;  %v552_v12 = vrot.slane %v551_v44, 1  ;;  %v569_v46 = vadd.f32 %v568_v21, %v567_v50  ;;  %v558_v3 = vrot.slane %v2977_v19, 1 }
  0xf9   :  { %v574_v11 = vrot.slane %v573_v40, 2  ;;  %v580_v28 = vrot.slane %v579_v38, 2  ;;  %v584_v2 = vrot.slane %v2851_v59, 4  ;;  %v541_v58 = vadd.f32 %v540_v14, %v539_v55 }
  0xfa   :  { %v590_v10 = vrot.slane %v2853_v25, 4  ;;  %v564_v33 = vrot.slane %v563_v27, 1  ;;  %v570_v22 = vrot.slane %v569_v46, 1  ;;  %v645_v60 = vsel %vm644_vm6, %v2719_v45, %v2705_v29 }
  0xfb   :  { %v575_v53 = vadd.f32 %v574_v11, %v573_v40  ;;  %v581_v13 = vadd.f32 %v580_v28, %v579_v38  ;;  %v585_v4 = vadd.f32 %v584_v2, %v2851_v59  ;;  %v647_v31 = vsel %vm646_vm7, %v2864_v39, %v645_v60 }
  0xfc   :  { %v591_v41 = vadd.f32 %v590_v10, %v2853_v25  ;;  %v649_v1 = vsel %vm648_vm8, %v2897_v52, %v647_v31  ;;  %v547_v59 = vadd.f32 %v546_v15, %v545_v32  ;;  %v2999_v23 = vadd.f32 %v552_v12, %v551_v44  ;;  %v3203_v12 = vld [vmem:[#allocation21_spill] sm:$0xff] }
  0xfd   :  { %v576_v62 = vrot.slane %v575_v53, 1  ;;  %v582_v0 = vrot.slane %v581_v13, 1  ;;  %v586_v55 = vrot.slane %v585_v4, 2  ;;  %v651_v29 = vsel %vm650_vm9, %v2916_v56, %v649_v1  ;;  %v3206_v10 = vld [vmem:[#allocation25_spill] sm:$0xff] }
  0xfe   :  { %v592_v50 = vrot.slane %v591_v41, 2  ;;  %v565_v45 = vadd.f32 %v564_v33, %v563_v27  ;;  %v571_v14 = vadd.f32 %v570_v22, %v569_v46  ;;  %v653_v39 = vsel %vm652_vm10, %v2955_v20, %v651_v29  ;;  %v1032_v29 = vld [vmem:[#allocation9 + $0x8a8] sm:$0xff] }
  0xff   :  { %v3001_v25 = vadd.f32 %v586_v55, %v585_v4  ;;  %v577_v21 = vadd.f32 %v576_v62, %v575_v53  ;;  %v583_v40 = vadd.f32 %v582_v0, %v581_v13  ;;  %v658_v52 = vsel %vm644_vm6, %v2725_v54, %v2707_v47  ;;  %v3202_v54 = vld [vmem:[#allocation23_spill] sm:$0xff]  ;;  %v1038_v53 = vld [vmem:[#allocation9 + $0x8d8] sm:$0xff] }
 0x100   :  { %v665_v32 = vsel %vm644_vm6, %v2762_v30, %v2709_v35  ;;  %v593_v44 = vadd.f32 %v592_v50, %v591_v41  ;;  %v659_v56 = vsel %vm646_vm7, %v2869_v61, %v658_v52  ;;  %v672_v35 = vsel %vm644_vm6, %v3202_v54, %v2711_v42  ;;  %v3207_v41 = vld [vmem:[#allocation26_spill] sm:$0xff]  ;;  %v3208_v50 = vld [vmem:[#allocation27_spill] sm:$0xff] }
 0x101   :  { %v666_v27 = vsel %vm646_vm7, %v2875_v43, %v665_v32  ;;  %v588_v38 = vrot.slane %v3001_v25, 1  ;;  %v660_v20 = vsel %vm648_vm8, %v2900_v6, %v659_v56  ;;  %v655_v30 = vsel %vm654_vm11, %v529_v37, %v653_v39  ;;  %v3204_v37 = vld [vmem:[#allocation24_spill] sm:$0xff]  ;;  %v1134_v0 = vld [vmem:[#allocation9 + $0xbd8] sm:$0xff] }
 0x102   :  { %v667_v47 = vsel %vm648_vm8, %v2903_v8, %v666_v27  ;;  %v661_v61 = vsel %vm650_vm9, %v2940_v57, %v660_v20  ;;  %v673_v15 = vsel %vm646_vm7, %v2883_v17, %v672_v35  ;;  %v679_v46 = vsel %vm644_vm6, %v3204_v37, %v3203_v12  ;;  %v1230_v55 = vld [vmem:[#allocation9 + $0xed8] sm:$0xff]  ;;  %v1020_v27 = vld [vmem:[#allocation9 + $0x848] sm:$0xff] }
 0x103   :  { %v668_v43 = vsel %vm650_vm9, %v2943_v16, %v667_v47  ;;  %v662_v6 = vsel %vm652_vm10, %v2957_v48, %v661_v61  ;;  %v674_v42 = vsel %vm648_vm8, %v2906_v18, %v673_v15  ;;  %v680_v48 = vsel %vm646_vm7, %v2888_v5, %v679_v46  ;;  %v1122_v52 = vld [vmem:[#allocation9 + $0xb78] sm:$0xff]  ;;  %v1008_v15 = vld [vmem:[#allocation9 + $0x7e8] sm:$0xff] }
 0x104   :  { %v669_v8 = vsel %vm652_vm10, %v2969_v49, %v668_v43  ;;  %v663_v57 = vsel %vm654_vm11, %v535_v7, %v662_v6  ;;  %v675_v17 = vsel %vm650_vm9, %v2946_v51, %v674_v42  ;;  %v657_v11 = vsel %vm656_vm12, %v565_v45, %v655_v30  ;;  %v3205_v51 = vld [vmem:[#allocation22_spill] sm:$0xff]  ;;  %v1104_v6 = vld [vmem:[#allocation9 + $0xae8] sm:$0xff] }
 0x105   :  { %v670_v16 = vsel %vm654_vm11, %v541_v58, %v669_v8  ;;  %v664_v49 = vsel %vm656_vm12, %v571_v14, %v663_v57  ;;  %v676_v18 = vsel %vm652_vm10, %v2973_v24, %v675_v17  ;;  %v681_v28 = vsel %vm648_vm8, %v2909_v63, %v680_v48  ;;  %v1128_v14 = vld [vmem:[#allocation9 + $0xba8] sm:$0xff]  ;;  %v1314_v56 = vld [vmem:[#allocation9 + $0x1178] sm:$0xff] }
 0x106   :  { %v677_v7 = vsel %vm654_vm11, %v547_v59, %v676_v18  ;;  %v682_v58 = vsel %vm650_vm9, %v2950_v9, %v681_v28  ;;  %v686_v5 = vsel %vm644_vm6, %v3206_v10, %v3205_v51  ;;  %v671_v13 = vsel %vm656_vm12, %v577_v21, %v670_v16  ;;  %v1326_v59 = vld [vmem:[#allocation9 + $0x11d8] sm:$0xff]  ;;  %v1200_v8 = vld [vmem:[#allocation9 + $0xde8] sm:$0xff] }
 0x107   :  { %v678_v24 = vsel %vm656_vm12, %v583_v40, %v677_v7  ;;  %v687_v63 = vsel %vm646_vm7, %v2894_v34, %v686_v5  ;;  %v594_v22 = vrot.slane %v593_v44, 1  ;;  %v559_v31 = vadd.f32 %v558_v3, %v2977_v19  ;;  %v1224_v19 = vld [vmem:[#allocation9 + $0xea8] sm:$0xff]  ;;  %v1026_v21 = vld [vmem:[#allocation9 + $0x878] sm:$0xff] }
 0x108   :  { %v688_v9 = vsel %vm648_vm8, %v3207_v41, %v687_v63  ;;  %v683_v34 = vsel %vm652_vm10, %v2981_v26, %v682_v58  ;;  %v589_v3 = vadd.f32 %v588_v38, %v3001_v25  ;;  %v1320_v26 = vld [vmem:[#allocation9 + $0x11a8] sm:$0xff]  ;;  %v1014_v35 = vld [vmem:[#allocation9 + $0x818] sm:$0xff] }
 0x109   :  { %v689_v1 = vsel %vm650_vm9, %v3208_v50, %v688_v9  ;;  %v595_v40 = vadd.f32 %v594_v22, %v593_v44  ;;  %v684_v39 = vsel %vm654_vm11, %v2999_v23, %v683_v34  ;;  %v1116_v25 = vld [vmem:[#allocation9 + $0xb48] sm:$0xff]  ;;  %v1110_v30 = vld [vmem:[#allocation9 + $0xb18] sm:$0xff] }
 0x10a   :  { %v690_v45 = vsel %vm652_vm10, %v2983_v36, %v689_v1  ;;  %v1218_v36 = vld [vmem:[#allocation9 + $0xe78] sm:$0xff]  ;;  %v1212_v38 = vld [vmem:[#allocation9 + $0xe48] sm:$0xff]  ;;  %v685_v20 = vsel %vm656_vm12, %v589_v3, %v684_v39 }
 0x10b   :  { %v691_v32 = vsel %vm654_vm11, %v559_v31, %v690_v45  ;;  %v1308_v44 = vld [vmem:[#allocation9 + $0x1148] sm:$0xff]  ;;  %v1206_v61 = vld [vmem:[#allocation9 + $0xe18] sm:$0xff] }
 0x10c   :  { %v692_v23 = vsel %vm656_vm12, %v595_v40, %v691_v32  ;;  %v1302_v43 = vld [vmem:[#allocation9 + $0x1118] sm:$0xff]  ;;  %v1296_v42 = vld [vmem:[#allocation9 + $0x10e8] sm:$0xff]  ;;  %v1039_v32 = vld [vmem:[#allocation9 + $0x8e0] sm:$0xff] }
 0x10d   :  { %v747_v2 = vpop.permute.xlu2 %746  ;;  %v1002_v12 = vld [vmem:[#allocation9 + $0x7b8] sm:$0xff]  ;;  %v996_v16 = vld [vmem:[#allocation9 + $0x788] sm:$0xff] }
 0x10e   :  { %v3059_v33 = vmul.f32 %v747_v2, %v657_v11  ;;  %v3065_v4 = vmul.f32 %v747_v2, %v664_v49  ;;  %v3069_v60 = vmul.f32 %v747_v2, %v671_v13  ;;  %v3071_v62 = vmul.f32 %v747_v2, %v678_v24  ;;  %v1098_v37 = vld [vmem:[#allocation9 + $0xab8] sm:$0xff]  ;;  %v1092_v17 = vld [vmem:[#allocation9 + $0xa88] sm:$0xff] }
 0x10f   :  { %v3092_v47 = vmul.f32 %v747_v2, %v685_v20  ;;  %v3094_v54 = vmul.f32 %v747_v2, %v692_v23  ;;  %v1194_v46 = vld [vmem:[#allocation9 + $0xdb8] sm:$0xff]  ;;  %v1188_v48 = vld [vmem:[#allocation9 + $0xd88] sm:$0xff]  ;;  %v1129_v20 = vld [vmem:[#allocation9 + $0xbb0] sm:$0xff] }
 0x110   :  { %1361 = vmatmul.f32.vlgmr.msra.gmra.mxu0 %v3059_v33  ;;  %1381 = vmatmul.f32.vlgmr.msra.gmra.mxu1 %v3065_v4  ;;  %v1290_v57 = vld [vmem:[#allocation9 + $0x10b8] sm:$0xff]  ;;  %v1284_v11 = vld [vmem:[#allocation9 + $0x1088] sm:$0xff]  ;;  %v931_v23 = vld [vmem:[#allocation9 + $0x580] sm:$0xff] }
 0x111   :  { %1505 = vmatpush.msra.mxu0 %v1038_v53  ;;  %1401 = vmatmul.f32.vlgmr.msra.gmra.mxu2 %v3069_v60  ;;  %v990_v49 = vld [vmem:[#allocation9 + $0x758] sm:$0xff]  ;;  %v984_v7 = vld [vmem:[#allocation9 + $0x728] sm:$0xff] }
 0x112   :  { %1421 = vmatmul.f32.vlgmr.msra.gmra.mxu3 %v3071_v62  ;;  %1525 = vmatpush.msra.mxu1 %v1134_v0  ;;  %v1086_v18 = vld [vmem:[#allocation9 + $0xa58] sm:$0xff]  ;;  %v1080_v58 = vld [vmem:[#allocation9 + $0xa28] sm:$0xff] }
 0x113   :  { %1545 = vmatpush.msra.mxu2 %v1230_v55  ;;  %1565 = vmatpush.msra.mxu3 %v1326_v59  ;;  %v1182_v28 = vld [vmem:[#allocation9 + $0xd58] sm:$0xff]  ;;  %v1176_v51 = vld [vmem:[#allocation9 + $0xd28] sm:$0xff] }
 0x114   :  { %1506 = vmatpush.msra.mxu0 %v1032_v29  ;;  %1526 = vmatpush.msra.mxu1 %v1128_v14  ;;  %v1278_v2 = vld [vmem:[#allocation9 + $0x1058] sm:$0xff]  ;;  %v1272_v10 = vld [vmem:[#allocation9 + $0x1028] sm:$0xff] }
 0x115   :  { %1546 = vmatpush.msra.mxu2 %v1224_v19  ;;  %1566 = vmatpush.msra.mxu3 %v1320_v26  ;;  %v978_v5 = vld [vmem:[#allocation9 + $0x6f8] sm:$0xff]  ;;  %v972_v63 = vld [vmem:[#allocation9 + $0x6c8] sm:$0xff] }
 0x116   :  { %1507 = vmatpush.msra.mxu0 %v1026_v21  ;;  %1527 = vmatpush.msra.mxu1 %v1122_v52  ;;  %v1074_v53 = vld [vmem:[#allocation9 + $0x9f8] sm:$0xff]  ;;  %v1068_v22 = vld [vmem:[#allocation9 + $0x9c8] sm:$0xff]  ;;  %v847_v52 = vld [vmem:[#allocation9 + $0x2e0] sm:$0xff] }
 0x117   :  { %1547 = vmatpush.msra.mxu2 %v1218_v36  ;;  %1567 = vmatpush.msra.mxu3 %v1314_v56  ;;  %v1170_v13 = vld [vmem:[#allocation9 + $0xcf8] sm:$0xff]  ;;  %v1164_v41 = vld [vmem:[#allocation9 + $0xcc8] sm:$0xff]  ;;  %v943_v36 = vld [vmem:[#allocation9 + $0x5e0] sm:$0xff] }
 0x118   :  { %1508 = vmatpush.msra.mxu0 %v1020_v27  ;;  %1528 = vmatpush.msra.mxu1 %v1116_v25  ;;  %v1266_v24 = vld [vmem:[#allocation9 + $0xff8] sm:$0xff]  ;;  %v1260_v9 = vld [vmem:[#allocation9 + $0xfc8] sm:$0xff]  ;;  %v1135_v56 = vld [vmem:[#allocation9 + $0xbe0] sm:$0xff] }
 0x119   :  { %1548 = vmatpush.msra.mxu2 %v1212_v38  ;;  %1568 = vmatpush.msra.mxu3 %v1308_v44  ;;  %v966_v0 = vld [vmem:[#allocation9 + $0x698] sm:$0xff]  ;;  %v960_v50 = vld [vmem:[#allocation9 + $0x668] sm:$0xff]  ;;  %v841_v27 = vld [vmem:[#allocation9 + $0x2b0] sm:$0xff] }
 0x11a   :  { %1441 = vmatmul.f32.vlgmr.msrb.gmra.mxu0 %v3092_v47  ;;  %1461 = vmatmul.f32.vlgmr.msrb.gmra.mxu1 %v3094_v54  ;;  %v1062_v55 = vld [vmem:[#allocation9 + $0x998] sm:$0xff]  ;;  %v1056_v1 = vld [vmem:[#allocation9 + $0x968] sm:$0xff]  ;;  %v937_v25 = vld [vmem:[#allocation9 + $0x5b0] sm:$0xff] }
 0x11b   :  { %1481 = vmatmul.f32.vlgmr.msrb.gmra.mxu2 %v3059_v33  ;;  %1501 = vmatmul.f32.vlgmr.msrb.gmra.mxu3 %v3065_v4  ;;  %v1158_v31 = vld [vmem:[#allocation9 + $0xc98] sm:$0xff]  ;;  %v1152_v59 = vld [vmem:[#allocation9 + $0xc68] sm:$0xff]  ;;  %v1033_v38 = vld [vmem:[#allocation9 + $0x8b0] sm:$0xff] }
 0x11c   :  { %1509 = vmatpush.msra.mxu0 %v1014_v35  ;;  %1529 = vmatpush.msra.mxu1 %v1110_v30  ;;  %v1254_v34 = vld [vmem:[#allocation9 + $0xf98] sm:$0xff]  ;;  %v1248_v29 = vld [vmem:[#allocation9 + $0xf68] sm:$0xff]  ;;  %v835_v44 = vld [vmem:[#allocation9 + $0x280] sm:$0xff] }
 0x11d   :  { %1549 = vmatpush.msra.mxu2 %v1206_v61  ;;  %1569 = vmatpush.msra.mxu3 %v1302_v43  ;;  %v954_v45 = vld [vmem:[#allocation9 + $0x638] sm:$0xff]  ;;  %v948_v26 = vld [vmem:[#allocation9 + $0x608] sm:$0xff]  ;;  %v1027_v35 = vld [vmem:[#allocation9 + $0x880] sm:$0xff] }
 0x11e   :  { %1510 = vmatpush.msra.mxu0 %v1008_v15  ;;  %1530 = vmatpush.msra.mxu1 %v1104_v6  ;;  %v1050_v14 = vld [vmem:[#allocation9 + $0x938] sm:$0xff]  ;;  %v1044_v21 = vld [vmem:[#allocation9 + $0x908] sm:$0xff]  ;;  %v1123_v30 = vld [vmem:[#allocation9 + $0xb80] sm:$0xff] }
 0x11f   :  { %1550 = vmatpush.msra.mxu2 %v1200_v8  ;;  %1570 = vmatpush.msra.mxu3 %v1296_v42  ;;  %v1146_v19 = vld [vmem:[#allocation9 + $0xc38] sm:$0xff]  ;;  %v1140_v40 = vld [vmem:[#allocation9 + $0xc08] sm:$0xff]  ;;  %v829_v61 = vld [vmem:[#allocation9 + $0x250] sm:$0xff] }
 0x120   :  { %1511 = vmatpush.msra.mxu0 %v1002_v12  ;;  %1531 = vmatpush.msra.mxu1 %v1098_v37  ;;  %v1242_v3 = vld [vmem:[#allocation9 + $0xf38] sm:$0xff]  ;;  %v1236_v39 = vld [vmem:[#allocation9 + $0xf08] sm:$0xff]  ;;  %v925_v43 = vld [vmem:[#allocation9 + $0x550] sm:$0xff] }
 0x121   :  { %1551 = vmatpush.msra.mxu2 %v1194_v46  ;;  %1571 = vmatpush.msra.mxu3 %v1290_v57  ;;  %v1021_v15 = vld [vmem:[#allocation9 + $0x850] sm:$0xff]  ;;  %v823_v8 = vld [vmem:[#allocation9 + $0x220] sm:$0xff] }
 0x122   :  { %1512 = vmatpush.msra.mxu0 %v996_v16  ;;  %1532 = vmatpush.msra.mxu1 %v1092_v17  ;;  %v1117_v6 = vld [vmem:[#allocation9 + $0xb50] sm:$0xff]  ;;  %v919_v42 = vld [vmem:[#allocation9 + $0x520] sm:$0xff] }
 0x123   :  { %1552 = vmatpush.msra.mxu2 %v1188_v48  ;;  %1572 = vmatpush.msra.mxu3 %v1284_v11  ;;  %v1015_v12 = vld [vmem:[#allocation9 + $0x820] sm:$0xff]  ;;  %v817_v46 = vld [vmem:[#allocation9 + $0x1f0] sm:$0xff] }
 0x124   :  { %1513 = vmatpush.msra.mxu0 %v990_v49  ;;  %1533 = vmatpush.msra.mxu1 %v1086_v18  ;;  %v1111_v37 = vld [vmem:[#allocation9 + $0xb20] sm:$0xff]  ;;  %v913_v57 = vld [vmem:[#allocation9 + $0x4f0] sm:$0xff] }
 0x125   :  { %1553 = vmatpush.msra.mxu2 %v1182_v28  ;;  %1573 = vmatpush.msra.mxu3 %v1278_v2  ;;  %v1009_v16 = vld [vmem:[#allocation9 + $0x7f0] sm:$0xff]  ;;  %v811_v48 = vld [vmem:[#allocation9 + $0x1c0] sm:$0xff] }
 0x126   :  { %1514 = vmatpush.msra.mxu0 %v984_v7  ;;  %1534 = vmatpush.msra.mxu1 %v1080_v58  ;;  %v1105_v17 = vld [vmem:[#allocation9 + $0xaf0] sm:$0xff]  ;;  %v907_v11 = vld [vmem:[#allocation9 + $0x4c0] sm:$0xff] }
 0x127   :  { %1554 = vmatpush.msra.mxu2 %v1176_v51  ;;  %1574 = vmatpush.msra.mxu3 %v1272_v10  ;;  %v1003_v49 = vld [vmem:[#allocation9 + $0x7c0] sm:$0xff]  ;;  %v805_v28 = vld [vmem:[#allocation9 + $0x190] sm:$0xff] }
 0x128   :  { %1515 = vmatpush.msra.mxu0 %v978_v5  ;;  %1535 = vmatpush.msra.mxu1 %v1074_v53  ;;  %v1099_v18 = vld [vmem:[#allocation9 + $0xac0] sm:$0xff]  ;;  %v901_v2 = vld [vmem:[#allocation9 + $0x490] sm:$0xff] }
 0x129   :  { %1555 = vmatpush.msra.mxu2 %v1170_v13  ;;  %1575 = vmatpush.msra.mxu3 %v1266_v24  ;;  %v997_v7 = vld [vmem:[#allocation9 + $0x790] sm:$0xff]  ;;  %v799_v51 = vld [vmem:[#allocation9 + $0x160] sm:$0xff] }
 0x12a   :  { %1516 = vmatpush.msra.mxu0 %v972_v63  ;;  %1536 = vmatpush.msra.mxu1 %v1068_v22  ;;  %v1093_v58 = vld [vmem:[#allocation9 + $0xa90] sm:$0xff]  ;;  %v895_v10 = vld [vmem:[#allocation9 + $0x460] sm:$0xff] }
 0x12b   :  { %1556 = vmatpush.msra.mxu2 %v1164_v41  ;;  %1576 = vmatpush.msra.mxu3 %v1260_v9  ;;  %v991_v5 = vld [vmem:[#allocation9 + $0x760] sm:$0xff]  ;;  %v793_v13 = vld [vmem:[#allocation9 + $0x130] sm:$0xff] }
 0x12c   :  { %1517 = vmatpush.msra.mxu0 %v966_v0  ;;  %1537 = vmatpush.msra.mxu1 %v1062_v55  ;;  %v1087_v53 = vld [vmem:[#allocation9 + $0xa60] sm:$0xff]  ;;  %v889_v24 = vld [vmem:[#allocation9 + $0x430] sm:$0xff] }
 0x12d   :  { %1557 = vmatpush.msra.mxu2 %v1158_v31  ;;  %1577 = vmatpush.msra.mxu3 %v1254_v34  ;;  %v985_v63 = vld [vmem:[#allocation9 + $0x730] sm:$0xff]  ;;  %v787_v41 = vld [vmem:[#allocation9 + $0x100] sm:$0xff] }
 0x12e   :  { %1518 = vmatpush.msra.mxu0 %v960_v50  ;;  %1538 = vmatpush.msra.mxu1 %v1056_v1  ;;  %v1081_v22 = vld [vmem:[#allocation9 + $0xa30] sm:$0xff]  ;;  %v883_v9 = vld [vmem:[#allocation9 + $0x400] sm:$0xff] }
 0x12f   :  { %1558 = vmatpush.msra.mxu2 %v1152_v59  ;;  %1578 = vmatpush.msra.mxu3 %v1248_v29  ;;  %v979_v0 = vld [vmem:[#allocation9 + $0x700] sm:$0xff]  ;;  %v781_v31 = vld [vmem:[#allocation9 + $0xd0] sm:$0xff] }
 0x130   :  { %1519 = vmatpush.msra.mxu0 %v954_v45  ;;  %1539 = vmatpush.msra.mxu1 %v1050_v14  ;;  %v1075_v55 = vld [vmem:[#allocation9 + $0xa00] sm:$0xff]  ;;  %v877_v34 = vld [vmem:[#allocation9 + $0x3d0] sm:$0xff] }
 0x131   :  { %1559 = vmatpush.msra.mxu2 %v1146_v19  ;;  %1579 = vmatpush.msra.mxu3 %v1242_v3  ;;  %v973_v50 = vld [vmem:[#allocation9 + $0x6d0] sm:$0xff]  ;;  %v775_v59 = vld [vmem:[#allocation9 + $0xa0] sm:$0xff] }
 0x132   :  { %1520 = vmatpush.msra.mxu0 %v948_v26  ;;  %1540 = vmatpush.msra.mxu1 %v1044_v21  ;;  %v1069_v1 = vld [vmem:[#allocation9 + $0x9d0] sm:$0xff]  ;;  %v871_v29 = vld [vmem:[#allocation9 + $0x3a0] sm:$0xff] }
 0x133   :  { %1560 = vmatpush.msra.mxu2 %v1140_v40  ;;  %1580 = vmatpush.msra.mxu3 %v1236_v39  ;;  %v967_v45 = vld [vmem:[#allocation9 + $0x6a0] sm:$0xff]  ;;  %v769_v19 = vld [vmem:[#allocation9 + $0x70] sm:$0xff] }
 0x134   :  { %1521 = vmatmul.f32.vlgmr.msra.gmra.mxu0 %v3069_v60  ;;  %1541 = vmatmul.f32.vlgmr.msra.gmra.mxu1 %v3071_v62  ;;  %v1063_v14 = vld [vmem:[#allocation9 + $0x9a0] sm:$0xff]  ;;  %v865_v3 = vld [vmem:[#allocation9 + $0x370] sm:$0xff] }
 0x135   :  { %1561 = vmatmul.f32.vlgmr.msra.gmra.mxu2 %v3092_v47  ;;  %1581 = vmatmul.f32.vlgmr.msra.gmra.mxu3 %v3094_v54  ;;  %v961_v26 = vld [vmem:[#allocation9 + $0x670] sm:$0xff]  ;;  %v763_v40 = vld [vmem:[#allocation9 + $0x40] sm:$0xff] }
 0x136   :  { %1585 = vmatpush.msrb.mxu0 %v847_v52  ;;  %1605 = vmatpush.msrb.mxu1 %v943_v36  ;;  %v1057_v21 = vld [vmem:[#allocation9 + $0x970] sm:$0xff]  ;;  %v859_v39 = vld [vmem:[#allocation9 + $0x340] sm:$0xff] }
 0x137   :  { %1625 = vmatpush.msrb.mxu2 %v1039_v32  ;;  %1645 = vmatpush.msrb.mxu3 %v1135_v56  ;;  %v955_v52 = vld [vmem:[#allocation9 + $0x640] sm:$0xff]  ;;  %v757_v32 = vld [vmem:[#allocation9 + $0x10] sm:$0xff] }
 0x138   :  { %1586 = vmatpush.msrb.mxu0 %v841_v27  ;;  %1606 = vmatpush.msrb.mxu1 %v937_v25  ;;  %v1051_v36 = vld [vmem:[#allocation9 + $0x940] sm:$0xff]  ;;  %v853_v56 = vld [vmem:[#allocation9 + $0x310] sm:$0xff] }
 0x139   :  { %1626 = vmatpush.msrb.mxu2 %v1033_v38  ;;  %1646 = vmatpush.msrb.mxu3 %v1129_v20  ;;  %v949_v27 = vld [vmem:[#allocation9 + $0x610] sm:$0xff]  ;;  %v1231_v38 = vld [vmem:[#allocation9 + $0xee0] sm:$0xff] }
 0x13a   :  { %1587 = vmatpush.msrb.mxu0 %v835_v44  ;;  %1607 = vmatpush.msrb.mxu1 %v931_v23  ;;  %v1045_v25 = vld [vmem:[#allocation9 + $0x910] sm:$0xff]  ;;  %v1327_v20 = vld [vmem:[#allocation9 + $0x11e0] sm:$0xff]  ;;  %v848_v44 = vld [vmem:[#allocation9 + $0x2e8] sm:$0xff] }
 0x13b   :  { %1627 = vmatpush.msrb.mxu2 %v1027_v35  ;;  %1647 = vmatpush.msrb.mxu3 %v1123_v30  ;;  %v944_v23 = vld [vmem:[#allocation9 + $0x5e8] sm:$0xff]  ;;  %v1225_v35 = vld [vmem:[#allocation9 + $0xeb0] sm:$0xff] }
 0x13c   :  { %1588 = vmatpush.msrb.mxu0 %v829_v61  ;;  %1608 = vmatpush.msrb.mxu1 %v925_v43  ;;  %v1321_v30 = vld [vmem:[#allocation9 + $0x11b0] sm:$0xff]  ;;  %v842_v61 = vld [vmem:[#allocation9 + $0x2b8] sm:$0xff] }
 0x13d   :  { %1628 = vmatpush.msrb.mxu2 %v1021_v15  ;;  %1648 = vmatpush.msrb.mxu3 %v1117_v6  ;;  %v938_v43 = vld [vmem:[#allocation9 + $0x5b8] sm:$0xff]  ;;  %v1219_v15 = vld [vmem:[#allocation9 + $0xe80] sm:$0xff] }
 0x13e   :  { %1589 = vmatpush.msrb.mxu0 %v823_v8  ;;  %1609 = vmatpush.msrb.mxu1 %v919_v42  ;;  %v1315_v6 = vld [vmem:[#allocation9 + $0x1180] sm:$0xff]  ;;  %v836_v8 = vld [vmem:[#allocation9 + $0x288] sm:$0xff] }
 0x13f   :  { %1629 = vmatpush.msrb.mxu2 %v1015_v12  ;;  %1649 = vmatpush.msrb.mxu3 %v1111_v37  ;;  %v932_v42 = vld [vmem:[#allocation9 + $0x588] sm:$0xff]  ;;  %v1213_v12 = vld [vmem:[#allocation9 + $0xe50] sm:$0xff] }
 0x140   :  { %1590 = vmatpush.msrb.mxu0 %v817_v46  ;;  %1610 = vmatpush.msrb.mxu1 %v913_v57  ;;  %v1309_v37 = vld [vmem:[#allocation9 + $0x1150] sm:$0xff]  ;;  %v830_v46 = vld [vmem:[#allocation9 + $0x258] sm:$0xff] }
 0x141   :  { %1630 = vmatpush.msrb.mxu2 %v1009_v16  ;;  %1650 = vmatpush.msrb.mxu3 %v1105_v17  ;;  %v926_v57 = vld [vmem:[#allocation9 + $0x558] sm:$0xff]  ;;  %v1207_v16 = vld [vmem:[#allocation9 + $0xe20] sm:$0xff] }
 0x142   :  { %1591 = vmatpush.msrb.mxu0 %v811_v48  ;;  %1611 = vmatpush.msrb.mxu1 %v907_v11  ;;  %v1303_v17 = vld [vmem:[#allocation9 + $0x1120] sm:$0xff]  ;;  %v824_v48 = vld [vmem:[#allocation9 + $0x228] sm:$0xff] }
 0x143   :  { %1631 = vmatpush.msrb.mxu2 %v1003_v49  ;;  %1651 = vmatpush.msrb.mxu3 %v1099_v18  ;;  %v920_v11 = vld [vmem:[#allocation9 + $0x528] sm:$0xff]  ;;  %v1201_v49 = vld [vmem:[#allocation9 + $0xdf0] sm:$0xff] }
 0x144   :  { %1592 = vmatpush.msrb.mxu0 %v805_v28  ;;  %1612 = vmatpush.msrb.mxu1 %v901_v2  ;;  %v1297_v18 = vld [vmem:[#allocation9 + $0x10f0] sm:$0xff]  ;;  %v818_v28 = vld [vmem:[#allocation9 + $0x1f8] sm:$0xff] }
 0x145   :  { %1632 = vmatpush.msrb.mxu2 %v997_v7  ;;  %1652 = vmatpush.msrb.mxu3 %v1093_v58  ;;  %v914_v2 = vld [vmem:[#allocation9 + $0x4f8] sm:$0xff]  ;;  %v1195_v7 = vld [vmem:[#allocation9 + $0xdc0] sm:$0xff] }
 0x146   :  { %1593 = vmatpush.msrb.mxu0 %v799_v51  ;;  %1613 = vmatpush.msrb.mxu1 %v895_v10  ;;  %v1291_v58 = vld [vmem:[#allocation9 + $0x10c0] sm:$0xff]  ;;  %v812_v51 = vld [vmem:[#allocation9 + $0x1c8] sm:$0xff] }
 0x147   :  { %1633 = vmatpush.msrb.mxu2 %v991_v5  ;;  %1653 = vmatpush.msrb.mxu3 %v1087_v53  ;;  %v908_v10 = vld [vmem:[#allocation9 + $0x4c8] sm:$0xff]  ;;  %v1189_v5 = vld [vmem:[#allocation9 + $0xd90] sm:$0xff] }
 0x148   :  { %1594 = vmatpush.msrb.mxu0 %v793_v13  ;;  %1614 = vmatpush.msrb.mxu1 %v889_v24  ;;  %v1285_v53 = vld [vmem:[#allocation9 + $0x1090] sm:$0xff]  ;;  %v806_v13 = vld [vmem:[#allocation9 + $0x198] sm:$0xff] }
 0x149   :  { %1634 = vmatpush.msrb.mxu2 %v985_v63  ;;  %1654 = vmatpush.msrb.mxu3 %v1081_v22  ;;  %v902_v24 = vld [vmem:[#allocation9 + $0x498] sm:$0xff]  ;;  %v1183_v63 = vld [vmem:[#allocation9 + $0xd60] sm:$0xff] }
 0x14a   :  { %1595 = vmatpush.msrb.mxu0 %v787_v41  ;;  %1615 = vmatpush.msrb.mxu1 %v883_v9  ;;  %v1279_v22 = vld [vmem:[#allocation9 + $0x1060] sm:$0xff]  ;;  %v800_v41 = vld [vmem:[#allocation9 + $0x168] sm:$0xff] }
 0x14b   :  { %1635 = vmatpush.msrb.mxu2 %v979_v0  ;;  %1655 = vmatpush.msrb.mxu3 %v1075_v55  ;;  %v896_v9 = vld [vmem:[#allocation9 + $0x468] sm:$0xff]  ;;  %v1177_v0 = vld [vmem:[#allocation9 + $0xd30] sm:$0xff] }
 0x14c   :  { %1596 = vmatpush.msrb.mxu0 %v781_v31  ;;  %1616 = vmatpush.msrb.mxu1 %v877_v34  ;;  %v1273_v55 = vld [vmem:[#allocation9 + $0x1030] sm:$0xff]  ;;  %v794_v31 = vld [vmem:[#allocation9 + $0x138] sm:$0xff] }
 0x14d   :  { %1636 = vmatpush.msrb.mxu2 %v973_v50  ;;  %1656 = vmatpush.msrb.mxu3 %v1069_v1  ;;  %v890_v34 = vld [vmem:[#allocation9 + $0x438] sm:$0xff]  ;;  %v1171_v50 = vld [vmem:[#allocation9 + $0xd00] sm:$0xff] }
 0x14e   :  { %1597 = vmatpush.msrb.mxu0 %v775_v59  ;;  %1617 = vmatpush.msrb.mxu1 %v871_v29  ;;  %v1267_v1 = vld [vmem:[#allocation9 + $0x1000] sm:$0xff]  ;;  %v788_v59 = vld [vmem:[#allocation9 + $0x108] sm:$0xff] }
 0x14f   :  { %1637 = vmatpush.msrb.mxu2 %v967_v45  ;;  %1657 = vmatpush.msrb.mxu3 %v1063_v14  ;;  %v884_v29 = vld [vmem:[#allocation9 + $0x408] sm:$0xff]  ;;  %v1165_v45 = vld [vmem:[#allocation9 + $0xcd0] sm:$0xff] }
 0x150   :  { %1598 = vmatpush.msrb.mxu0 %v769_v19  ;;  %1618 = vmatpush.msrb.mxu1 %v865_v3  ;;  %v1261_v14 = vld [vmem:[#allocation9 + $0xfd0] sm:$0xff]  ;;  %v782_v19 = vld [vmem:[#allocation9 + $0xd8] sm:$0xff] }
 0x151   :  { %1638 = vmatpush.msrb.mxu2 %v961_v26  ;;  %1658 = vmatpush.msrb.mxu3 %v1057_v21  ;;  %v878_v3 = vld [vmem:[#allocation9 + $0x3d8] sm:$0xff]  ;;  %v1159_v26 = vld [vmem:[#allocation9 + $0xca0] sm:$0xff] }
 0x152   :  { %1599 = vmatpush.msrb.mxu0 %v763_v40  ;;  %1619 = vmatpush.msrb.mxu1 %v859_v39  ;;  %v1255_v21 = vld [vmem:[#allocation9 + $0xfa0] sm:$0xff]  ;;  %v776_v40 = vld [vmem:[#allocation9 + $0xa8] sm:$0xff] }
 0x153   :  { %1639 = vmatpush.msrb.mxu2 %v955_v52  ;;  %1659 = vmatpush.msrb.mxu3 %v1051_v36  ;;  %v872_v39 = vld [vmem:[#allocation9 + $0x3a8] sm:$0xff]  ;;  %v1153_v52 = vld [vmem:[#allocation9 + $0xc70] sm:$0xff] }
 0x154   :  { %1600 = vmatpush.msrb.mxu0 %v757_v32  ;;  %1620 = vmatpush.msrb.mxu1 %v853_v56  ;;  %v1249_v36 = vld [vmem:[#allocation9 + $0xf70] sm:$0xff]  ;;  %v770_v32 = vld [vmem:[#allocation9 + $0x78] sm:$0xff] }
 0x155   :  { %1640 = vmatpush.msrb.mxu2 %v949_v27  ;;  %1660 = vmatpush.msrb.mxu3 %v1045_v25  ;;  %v866_v56 = vld [vmem:[#allocation9 + $0x378] sm:$0xff]  ;;  %v1147_v27 = vld [vmem:[#allocation9 + $0xc40] sm:$0xff] }
 0x156   :  { %1601 = vmatmul.f32.vlgmr.msrb.gmra.mxu0 %v3059_v33  ;;  %1621 = vmatmul.f32.vlgmr.msrb.gmra.mxu1 %v3065_v4  ;;  %v1243_v25 = vld [vmem:[#allocation9 + $0xf40] sm:$0xff] }
 0x157   :  { %1641 = vmatmul.f32.vlgmr.msrb.gmra.mxu2 %v3069_v60  ;;  %1661 = vmatmul.f32.vlgmr.msrb.gmra.mxu3 %v3071_v62 }
 0x158   :  { %1665 = vmatpush.msra.mxu0 %v1231_v38  ;;  %1685 = vmatpush.msra.mxu1 %v1327_v20  ;;  %v764_v38 = vld [vmem:[#allocation9 + $0x48] sm:$0xff] }
 0x159   :  { %1705 = vmatpush.msra.mxu2 %v848_v44  ;;  %1725 = vmatpush.msra.mxu3 %v944_v23  ;;  %v860_v20 = vld [vmem:[#allocation9 + $0x348] sm:$0xff]  ;;  %v1141_v44 = vld [vmem:[#allocation9 + $0xc10] sm:$0xff] }
 0x15a   :  { %1666 = vmatpush.msra.mxu0 %v1225_v35  ;;  %1686 = vmatpush.msra.mxu1 %v1321_v30  ;;  %v1237_v23 = vld [vmem:[#allocation9 + $0xf10] sm:$0xff]  ;;  %v758_v35 = vld [vmem:[#allocation9 + $0x18] sm:$0xff] }
 0x15b   :  { %1706 = vmatpush.msra.mxu2 %v842_v61  ;;  %1726 = vmatpush.msra.mxu3 %v938_v43  ;;  %v854_v30 = vld [vmem:[#allocation9 + $0x318] sm:$0xff]  ;;  %v1040_v61 = vld [vmem:[#allocation9 + $0x8e8] sm:$0xff] }
 0x15c   :  { %1667 = vmatpush.msra.mxu0 %v1219_v15  ;;  %1687 = vmatpush.msra.mxu1 %v1315_v6  ;;  %v1136_v43 = vld [vmem:[#allocation9 + $0xbe8] sm:$0xff] }
 0x15d   :  { %1707 = vmatpush.msra.mxu2 %v836_v8  ;;  %1727 = vmatpush.msra.mxu3 %v932_v42  ;;  %v1232_v15 = vld [vmem:[#allocation9 + $0xee8] sm:$0xff]  ;;  %v1034_v8 = vld [vmem:[#allocation9 + $0x8b8] sm:$0xff] }
 0x15e   :  { %1668 = vmatpush.msra.mxu0 %v1213_v12  ;;  %1688 = vmatpush.msra.mxu1 %v1309_v37  ;;  %v1328_v6 = vld [vmem:[#allocation9 + $0x11e8] sm:$0xff]  ;;  %v1130_v42 = vld [vmem:[#allocation9 + $0xbb8] sm:$0xff] }
 0x15f   :  { %1708 = vmatpush.msra.mxu2 %v830_v46  ;;  %1728 = vmatpush.msra.mxu3 %v926_v57  ;;  %v1226_v12 = vld [vmem:[#allocation9 + $0xeb8] sm:$0xff]  ;;  %v1028_v46 = vld [vmem:[#allocation9 + $0x888] sm:$0xff] }
 0x160   :  { %1669 = vmatpush.msra.mxu0 %v1207_v16  ;;  %1689 = vmatpush.msra.mxu1 %v1303_v17  ;;  %v1322_v37 = vld [vmem:[#allocation9 + $0x11b8] sm:$0xff]  ;;  %v1124_v57 = vld [vmem:[#allocation9 + $0xb88] sm:$0xff] }
 0x161   :  { %1709 = vmatpush.msra.mxu2 %v824_v48  ;;  %1729 = vmatpush.msra.mxu3 %v920_v11  ;;  %v1220_v16 = vld [vmem:[#allocation9 + $0xe88] sm:$0xff]  ;;  %v1022_v48 = vld [vmem:[#allocation9 + $0x858] sm:$0xff] }
 0x162   :  { %1670 = vmatpush.msra.mxu0 %v1201_v49  ;;  %1690 = vmatpush.msra.mxu1 %v1297_v18  ;;  %v1316_v17 = vld [vmem:[#allocation9 + $0x1188] sm:$0xff]  ;;  %v1118_v11 = vld [vmem:[#allocation9 + $0xb58] sm:$0xff] }
 0x163   :  { %1710 = vmatpush.msra.mxu2 %v818_v28  ;;  %1730 = vmatpush.msra.mxu3 %v914_v2  ;;  %v1214_v49 = vld [vmem:[#allocation9 + $0xe58] sm:$0xff]  ;;  %v1016_v28 = vld [vmem:[#allocation9 + $0x828] sm:$0xff] }
 0x164   :  { %1671 = vmatpush.msra.mxu0 %v1195_v7  ;;  %1691 = vmatpush.msra.mxu1 %v1291_v58  ;;  %v1310_v18 = vld [vmem:[#allocation9 + $0x1158] sm:$0xff]  ;;  %v1112_v2 = vld [vmem:[#allocation9 + $0xb28] sm:$0xff] }
 0x165   :  { %1711 = vmatpush.msra.mxu2 %v812_v51  ;;  %1731 = vmatpush.msra.mxu3 %v908_v10  ;;  %v1208_v7 = vld [vmem:[#allocation9 + $0xe28] sm:$0xff]  ;;  %v1010_v51 = vld [vmem:[#allocation9 + $0x7f8] sm:$0xff] }
 0x166   :  { %1672 = vmatpush.msra.mxu0 %v1189_v5  ;;  %1692 = vmatpush.msra.mxu1 %v1285_v53  ;;  %v1304_v58 = vld [vmem:[#allocation9 + $0x1128] sm:$0xff]  ;;  %v1106_v10 = vld [vmem:[#allocation9 + $0xaf8] sm:$0xff] }
 0x167   :  { %1712 = vmatpush.msra.mxu2 %v806_v13  ;;  %1732 = vmatpush.msra.mxu3 %v902_v24  ;;  %v1202_v5 = vld [vmem:[#allocation9 + $0xdf8] sm:$0xff]  ;;  %v1004_v13 = vld [vmem:[#allocation9 + $0x7c8] sm:$0xff] }
 0x168   :  { %1673 = vmatpush.msra.mxu0 %v1183_v63  ;;  %1693 = vmatpush.msra.mxu1 %v1279_v22  ;;  %v1298_v53 = vld [vmem:[#allocation9 + $0x10f8] sm:$0xff]  ;;  %v1100_v24 = vld [vmem:[#allocation9 + $0xac8] sm:$0xff] }
 0x169   :  { %1713 = vmatpush.msra.mxu2 %v800_v41  ;;  %1733 = vmatpush.msra.mxu3 %v896_v9  ;;  %v1196_v63 = vld [vmem:[#allocation9 + $0xdc8] sm:$0xff]  ;;  %v998_v41 = vld [vmem:[#allocation9 + $0x798] sm:$0xff] }
 0x16a   :  { %1674 = vmatpush.msra.mxu0 %v1177_v0  ;;  %1694 = vmatpush.msra.mxu1 %v1273_v55  ;;  %v1292_v22 = vld [vmem:[#allocation9 + $0x10c8] sm:$0xff]  ;;  %v1094_v9 = vld [vmem:[#allocation9 + $0xa98] sm:$0xff] }
 0x16b   :  { %1714 = vmatpush.msra.mxu2 %v794_v31  ;;  %1734 = vmatpush.msra.mxu3 %v890_v34  ;;  %v1190_v0 = vld [vmem:[#allocation9 + $0xd98] sm:$0xff]  ;;  %v992_v31 = vld [vmem:[#allocation9 + $0x768] sm:$0xff] }
 0x16c   :  { %1675 = vmatpush.msra.mxu0 %v1171_v50  ;;  %1695 = vmatpush.msra.mxu1 %v1267_v1  ;;  %v1286_v55 = vld [vmem:[#allocation9 + $0x1098] sm:$0xff]  ;;  %v1088_v34 = vld [vmem:[#allocation9 + $0xa68] sm:$0xff] }
 0x16d   :  { %1715 = vmatpush.msra.mxu2 %v788_v59  ;;  %1735 = vmatpush.msra.mxu3 %v884_v29  ;;  %v1184_v50 = vld [vmem:[#allocation9 + $0xd68] sm:$0xff]  ;;  %v986_v59 = vld [vmem:[#allocation9 + $0x738] sm:$0xff] }
 0x16e   :  { %1676 = vmatpush.msra.mxu0 %v1165_v45  ;;  %1696 = vmatpush.msra.mxu1 %v1261_v14  ;;  %v1280_v1 = vld [vmem:[#allocation9 + $0x1068] sm:$0xff]  ;;  %v1082_v29 = vld [vmem:[#allocation9 + $0xa38] sm:$0xff] }
 0x16f   :  { %1716 = vmatpush.msra.mxu2 %v782_v19  ;;  %1736 = vmatpush.msra.mxu3 %v878_v3  ;;  %v1178_v45 = vld [vmem:[#allocation9 + $0xd38] sm:$0xff]  ;;  %v980_v19 = vld [vmem:[#allocation9 + $0x708] sm:$0xff] }
 0x170   :  { %1677 = vmatpush.msra.mxu0 %v1159_v26  ;;  %1697 = vmatpush.msra.mxu1 %v1255_v21  ;;  %v1274_v14 = vld [vmem:[#allocation9 + $0x1038] sm:$0xff]  ;;  %v1076_v3 = vld [vmem:[#allocation9 + $0xa08] sm:$0xff] }
 0x171   :  { %1717 = vmatpush.msra.mxu2 %v776_v40  ;;  %1737 = vmatpush.msra.mxu3 %v872_v39  ;;  %v1172_v26 = vld [vmem:[#allocation9 + $0xd08] sm:$0xff]  ;;  %v974_v40 = vld [vmem:[#allocation9 + $0x6d8] sm:$0xff] }
 0x172   :  { %1678 = vmatpush.msra.mxu0 %v1153_v52  ;;  %1698 = vmatpush.msra.mxu1 %v1249_v36  ;;  %v1268_v21 = vld [vmem:[#allocation9 + $0x1008] sm:$0xff]  ;;  %v1070_v39 = vld [vmem:[#allocation9 + $0x9d8] sm:$0xff] }
 0x173   :  { %1718 = vmatpush.msra.mxu2 %v770_v32  ;;  %1738 = vmatpush.msra.mxu3 %v866_v56  ;;  %v1166_v52 = vld [vmem:[#allocation9 + $0xcd8] sm:$0xff]  ;;  %v968_v32 = vld [vmem:[#allocation9 + $0x6a8] sm:$0xff] }
 0x174   :  { %1679 = vmatpush.msra.mxu0 %v1147_v27  ;;  %1699 = vmatpush.msra.mxu1 %v1243_v25  ;;  %v1262_v36 = vld [vmem:[#allocation9 + $0xfd8] sm:$0xff]  ;;  %v1064_v56 = vld [vmem:[#allocation9 + $0x9a8] sm:$0xff] }
 0x175   :  { %1719 = vmatpush.msra.mxu2 %v764_v38  ;;  %1739 = vmatpush.msra.mxu3 %v860_v20  ;;  %v1160_v27 = vld [vmem:[#allocation9 + $0xca8] sm:$0xff]  ;;  %v962_v38 = vld [vmem:[#allocation9 + $0x678] sm:$0xff] }
 0x176   :  { %1680 = vmatpush.msra.mxu0 %v1141_v44  ;;  %1700 = vmatpush.msra.mxu1 %v1237_v23  ;;  %v1256_v25 = vld [vmem:[#allocation9 + $0xfa8] sm:$0xff]  ;;  %v1058_v20 = vld [vmem:[#allocation9 + $0x978] sm:$0xff] }
 0x177   :  { %1720 = vmatpush.msra.mxu2 %v758_v35  ;;  %1740 = vmatpush.msra.mxu3 %v854_v30  ;;  %v1154_v44 = vld [vmem:[#allocation9 + $0xc78] sm:$0xff]  ;;  %v956_v35 = vld [vmem:[#allocation9 + $0x648] sm:$0xff] }
 0x178   :  { %1681 = vmatmul.f32.vlgmr.msra.gmra.mxu0 %v3092_v47  ;;  %1701 = vmatmul.f32.vlgmr.msra.gmra.mxu1 %v3094_v54  ;;  %v1250_v23 = vld [vmem:[#allocation9 + $0xf78] sm:$0xff]  ;;  %v1052_v30 = vld [vmem:[#allocation9 + $0x948] sm:$0xff] }
 0x179   :  { %1721 = vmatmul.f32.vlgmr.msra.gmra.mxu2 %v3059_v33  ;;  %1741 = vmatmul.f32.vlgmr.msra.gmra.mxu3 %v3065_v4 }
 0x17a   :  { %1745 = vmatpush.msrb.mxu0 %v1040_v61  ;;  %1765 = vmatpush.msrb.mxu1 %v1136_v43  ;;  %v1148_v61 = vld [vmem:[#allocation9 + $0xc48] sm:$0xff] }
 0x17b   :  { %1785 = vmatpush.msrb.mxu2 %v1232_v15  ;;  %1805 = vmatpush.msrb.mxu3 %v1328_v6  ;;  %v1244_v43 = vld [vmem:[#allocation9 + $0xf48] sm:$0xff]  ;;  %v950_v15 = vld [vmem:[#allocation9 + $0x618] sm:$0xff] }
 0x17c   :  { %1746 = vmatpush.msrb.mxu0 %v1034_v8  ;;  %1766 = vmatpush.msrb.mxu1 %v1130_v42  ;;  %v1046_v6 = vld [vmem:[#allocation9 + $0x918] sm:$0xff] }
 0x17d   :  { %1786 = vmatpush.msrb.mxu2 %v1226_v12  ;;  %1806 = vmatpush.msrb.mxu3 %v1322_v37  ;;  %v1142_v8 = vld [vmem:[#allocation9 + $0xc18] sm:$0xff]  ;;  %v849_v12 = vld [vmem:[#allocation9 + $0x2f0] sm:$0xff] }
 0x17e   :  { %1747 = vmatpush.msrb.mxu0 %v1028_v46  ;;  %1767 = vmatpush.msrb.mxu1 %v1124_v57  ;;  %v1238_v42 = vld [vmem:[#allocation9 + $0xf18] sm:$0xff]  ;;  %v945_v37 = vld [vmem:[#allocation9 + $0x5f0] sm:$0xff] }
 0x17f   :  { %1787 = vmatpush.msrb.mxu2 %v1220_v16  ;;  %1807 = vmatpush.msrb.mxu3 %v1316_v17  ;;  %v1041_v46 = vld [vmem:[#allocation9 + $0x8f0] sm:$0xff]  ;;  %v843_v16 = vld [vmem:[#allocation9 + $0x2c0] sm:$0xff] }
 0x180   :  { %1748 = vmatpush.msrb.mxu0 %v1022_v48  ;;  %1768 = vmatpush.msrb.mxu1 %v1118_v11  ;;  %v1137_v57 = vld [vmem:[#allocation9 + $0xbf0] sm:$0xff]  ;;  %v939_v17 = vld [vmem:[#allocation9 + $0x5c0] sm:$0xff] }
 0x181   :  { %1788 = vmatpush.msrb.mxu2 %v1214_v49  ;;  %1808 = vmatpush.msrb.mxu3 %v1310_v18  ;;  %v1035_v48 = vld [vmem:[#allocation9 + $0x8c0] sm:$0xff]  ;;  %v837_v49 = vld [vmem:[#allocation9 + $0x290] sm:$0xff] }
 0x182   :  { %1749 = vmatpush.msrb.mxu0 %v1016_v28  ;;  %1769 = vmatpush.msrb.mxu1 %v1112_v2  ;;  %v1131_v11 = vld [vmem:[#allocation9 + $0xbc0] sm:$0xff]  ;;  %v933_v18 = vld [vmem:[#allocation9 + $0x590] sm:$0xff] }
 0x183   :  { %1789 = vmatpush.msrb.mxu2 %v1208_v7  ;;  %1809 = vmatpush.msrb.mxu3 %v1304_v58  ;;  %v1029_v28 = vld [vmem:[#allocation9 + $0x890] sm:$0xff]  ;;  %v831_v7 = vld [vmem:[#allocation9 + $0x260] sm:$0xff] }
 0x184   :  { %1750 = vmatpush.msrb.mxu0 %v1010_v51  ;;  %1770 = vmatpush.msrb.mxu1 %v1106_v10  ;;  %v1125_v2 = vld [vmem:[#allocation9 + $0xb90] sm:$0xff]  ;;  %v927_v58 = vld [vmem:[#allocation9 + $0x560] sm:$0xff] }
 0x185   :  { %1790 = vmatpush.msrb.mxu2 %v1202_v5  ;;  %1810 = vmatpush.msrb.mxu3 %v1298_v53  ;;  %v1023_v51 = vld [vmem:[#allocation9 + $0x860] sm:$0xff]  ;;  %v825_v5 = vld [vmem:[#allocation9 + $0x230] sm:$0xff] }
 0x186   :  { %1751 = vmatpush.msrb.mxu0 %v1004_v13  ;;  %1771 = vmatpush.msrb.mxu1 %v1100_v24  ;;  %v1119_v10 = vld [vmem:[#allocation9 + $0xb60] sm:$0xff]  ;;  %v921_v53 = vld [vmem:[#allocation9 + $0x530] sm:$0xff] }
 0x187   :  { %1791 = vmatpush.msrb.mxu2 %v1196_v63  ;;  %1811 = vmatpush.msrb.mxu3 %v1292_v22  ;;  %v1017_v13 = vld [vmem:[#allocation9 + $0x830] sm:$0xff]  ;;  %v819_v63 = vld [vmem:[#allocation9 + $0x200] sm:$0xff] }
 0x188   :  { %1752 = vmatpush.msrb.mxu0 %v998_v41  ;;  %1772 = vmatpush.msrb.mxu1 %v1094_v9  ;;  %v1113_v24 = vld [vmem:[#allocation9 + $0xb30] sm:$0xff]  ;;  %v915_v22 = vld [vmem:[#allocation9 + $0x500] sm:$0xff] }
 0x189   :  { %1792 = vmatpush.msrb.mxu2 %v1190_v0  ;;  %1812 = vmatpush.msrb.mxu3 %v1286_v55  ;;  %v1011_v41 = vld [vmem:[#allocation9 + $0x800] sm:$0xff]  ;;  %v813_v0 = vld [vmem:[#allocation9 + $0x1d0] sm:$0xff] }
 0x18a   :  { %1753 = vmatpush.msrb.mxu0 %v992_v31  ;;  %1773 = vmatpush.msrb.mxu1 %v1088_v34  ;;  %v1107_v9 = vld [vmem:[#allocation9 + $0xb00] sm:$0xff]  ;;  %v909_v55 = vld [vmem:[#allocation9 + $0x4d0] sm:$0xff] }
 0x18b   :  { %1793 = vmatpush.msrb.mxu2 %v1184_v50  ;;  %1813 = vmatpush.msrb.mxu3 %v1280_v1  ;;  %v1005_v31 = vld [vmem:[#allocation9 + $0x7d0] sm:$0xff]  ;;  %v807_v50 = vld [vmem:[#allocation9 + $0x1a0] sm:$0xff] }
 0x18c   :  { %1754 = vmatpush.msrb.mxu0 %v986_v59  ;;  %1774 = vmatpush.msrb.mxu1 %v1082_v29  ;;  %v1101_v34 = vld [vmem:[#allocation9 + $0xad0] sm:$0xff]  ;;  %v903_v1 = vld [vmem:[#allocation9 + $0x4a0] sm:$0xff] }
 0x18d   :  { %1794 = vmatpush.msrb.mxu2 %v1178_v45  ;;  %1814 = vmatpush.msrb.mxu3 %v1274_v14  ;;  %v999_v59 = vld [vmem:[#allocation9 + $0x7a0] sm:$0xff]  ;;  %v801_v45 = vld [vmem:[#allocation9 + $0x170] sm:$0xff] }
 0x18e   :  { %1755 = vmatpush.msrb.mxu0 %v980_v19  ;;  %1775 = vmatpush.msrb.mxu1 %v1076_v3  ;;  %v1095_v29 = vld [vmem:[#allocation9 + $0xaa0] sm:$0xff]  ;;  %v897_v14 = vld [vmem:[#allocation9 + $0x470] sm:$0xff] }
 0x18f   :  { %1795 = vmatpush.msrb.mxu2 %v1172_v26  ;;  %1815 = vmatpush.msrb.mxu3 %v1268_v21  ;;  %v993_v19 = vld [vmem:[#allocation9 + $0x770] sm:$0xff]  ;;  %v795_v26 = vld [vmem:[#allocation9 + $0x140] sm:$0xff] }
 0x190   :  { %1756 = vmatpush.msrb.mxu0 %v974_v40  ;;  %1776 = vmatpush.msrb.mxu1 %v1070_v39  ;;  %v1089_v3 = vld [vmem:[#allocation9 + $0xa70] sm:$0xff]  ;;  %v891_v21 = vld [vmem:[#allocation9 + $0x440] sm:$0xff] }
 0x191   :  { %1796 = vmatpush.msrb.mxu2 %v1166_v52  ;;  %1816 = vmatpush.msrb.mxu3 %v1262_v36  ;;  %v987_v40 = vld [vmem:[#allocation9 + $0x740] sm:$0xff]  ;;  %v789_v52 = vld [vmem:[#allocation9 + $0x110] sm:$0xff] }
 0x192   :  { %1757 = vmatpush.msrb.mxu0 %v968_v32  ;;  %1777 = vmatpush.msrb.mxu1 %v1064_v56  ;;  %v1083_v39 = vld [vmem:[#allocation9 + $0xa40] sm:$0xff]  ;;  %v885_v36 = vld [vmem:[#allocation9 + $0x410] sm:$0xff] }
 0x193   :  { %1797 = vmatpush.msrb.mxu2 %v1160_v27  ;;  %1817 = vmatpush.msrb.mxu3 %v1256_v25  ;;  %v981_v32 = vld [vmem:[#allocation9 + $0x710] sm:$0xff]  ;;  %v783_v27 = vld [vmem:[#allocation9 + $0xe0] sm:$0xff] }
 0x194   :  { %1758 = vmatpush.msrb.mxu0 %v962_v38  ;;  %1778 = vmatpush.msrb.mxu1 %v1058_v20  ;;  %v1077_v56 = vld [vmem:[#allocation9 + $0xa10] sm:$0xff]  ;;  %v879_v25 = vld [vmem:[#allocation9 + $0x3e0] sm:$0xff] }
 0x195   :  { %1798 = vmatpush.msrb.mxu2 %v1154_v44  ;;  %1818 = vmatpush.msrb.mxu3 %v1250_v23  ;;  %v975_v38 = vld [vmem:[#allocation9 + $0x6e0] sm:$0xff]  ;;  %v777_v44 = vld [vmem:[#allocation9 + $0xb0] sm:$0xff] }
 0x196   :  { %1759 = vmatpush.msrb.mxu0 %v956_v35  ;;  %1779 = vmatpush.msrb.mxu1 %v1052_v30  ;;  %v1071_v20 = vld [vmem:[#allocation9 + $0x9e0] sm:$0xff]  ;;  %v873_v23 = vld [vmem:[#allocation9 + $0x3b0] sm:$0xff] }
 0x197   :  { %1799 = vmatpush.msrb.mxu2 %v1148_v61  ;;  %1819 = vmatpush.msrb.mxu3 %v1244_v43  ;;  %v969_v35 = vld [vmem:[#allocation9 + $0x6b0] sm:$0xff]  ;;  %v771_v61 = vld [vmem:[#allocation9 + $0x80] sm:$0xff] }
 0x198   :  { %1760 = vmatpush.msrb.mxu0 %v950_v15  ;;  %1780 = vmatpush.msrb.mxu1 %v1046_v6  ;;  %v1065_v30 = vld [vmem:[#allocation9 + $0x9b0] sm:$0xff]  ;;  %v867_v43 = vld [vmem:[#allocation9 + $0x380] sm:$0xff] }
 0x199   :  { %1800 = vmatpush.msrb.mxu2 %v1142_v8  ;;  %1820 = vmatpush.msrb.mxu3 %v1238_v42  ;;  %v963_v15 = vld [vmem:[#allocation9 + $0x680] sm:$0xff]  ;;  %v765_v8 = vld [vmem:[#allocation9 + $0x50] sm:$0xff] }
 0x19a   :  { %1761 = vmatmul.f32.vlgmr.msrb.gmra.mxu0 %v3069_v60  ;;  %1781 = vmatmul.f32.vlgmr.msrb.gmra.mxu1 %v3071_v62  ;;  %v1059_v6 = vld [vmem:[#allocation9 + $0x980] sm:$0xff]  ;;  %v861_v42 = vld [vmem:[#allocation9 + $0x350] sm:$0xff] }
 0x19b   :  { %1801 = vmatmul.f32.vlgmr.msrb.gmra.mxu2 %v3092_v47  ;;  %1821 = vmatmul.f32.vlgmr.msrb.gmra.mxu3 %v3094_v54 }
 0x19c   :  { %1825 = vmatpush.msra.mxu0 %v849_v12  ;;  %1845 = vmatpush.msra.mxu1 %v945_v37  ;;  %v957_v12 = vld [vmem:[#allocation9 + $0x650] sm:$0xff] }
 0x19d   :  { %1865 = vmatpush.msra.mxu2 %v1041_v46  ;;  %1885 = vmatpush.msra.mxu3 %v1137_v57  ;;  %v1053_v37 = vld [vmem:[#allocation9 + $0x950] sm:$0xff]  ;;  %v759_v46 = vld [vmem:[#allocation9 + $0x20] sm:$0xff] }
 0x19e   :  { %1826 = vmatpush.msra.mxu0 %v843_v16  ;;  %1846 = vmatpush.msra.mxu1 %v939_v17  ;;  %v855_v57 = vld [vmem:[#allocation9 + $0x320] sm:$0xff] }
 0x19f   :  { %1866 = vmatpush.msra.mxu2 %v1035_v48  ;;  %1886 = vmatpush.msra.mxu3 %v1131_v11  ;;  %v951_v16 = vld [vmem:[#allocation9 + $0x620] sm:$0xff]  ;;  %v1233_v48 = vld [vmem:[#allocation9 + $0xef0] sm:$0xff] }
 0x1a0   :  { %1827 = vmatpush.msra.mxu0 %v837_v49  ;;  %1847 = vmatpush.msra.mxu1 %v933_v18  ;;  %v1047_v17 = vld [vmem:[#allocation9 + $0x920] sm:$0xff]  ;;  %v1329_v11 = vld [vmem:[#allocation9 + $0x11f0] sm:$0xff]  ;;  %v850_v49 = vld [vmem:[#allocation9 + $0x2f8] sm:$0xff] }
 0x1a1   :  { %1867 = vmatpush.msra.mxu2 %v1029_v28  ;;  %1887 = vmatpush.msra.mxu3 %v1125_v2  ;;  %v946_v18 = vld [vmem:[#allocation9 + $0x5f8] sm:$0xff]  ;;  %v1227_v28 = vld [vmem:[#allocation9 + $0xec0] sm:$0xff] }
 0x1a2   :  { %1828 = vmatpush.msra.mxu0 %v831_v7  ;;  %1848 = vmatpush.msra.mxu1 %v927_v58  ;;  %v1323_v2 = vld [vmem:[#allocation9 + $0x11c0] sm:$0xff]  ;;  %v844_v7 = vld [vmem:[#allocation9 + $0x2c8] sm:$0xff] }
 0x1a3   :  { %1868 = vmatpush.msra.mxu2 %v1023_v51  ;;  %1888 = vmatpush.msra.mxu3 %v1119_v10  ;;  %v940_v58 = vld [vmem:[#allocation9 + $0x5c8] sm:$0xff]  ;;  %v1221_v51 = vld [vmem:[#allocation9 + $0xe90] sm:$0xff] }
 0x1a4   :  { %1829 = vmatpush.msra.mxu0 %v825_v5  ;;  %1849 = vmatpush.msra.mxu1 %v921_v53  ;;  %v1317_v10 = vld [vmem:[#allocation9 + $0x1190] sm:$0xff]  ;;  %v838_v5 = vld [vmem:[#allocation9 + $0x298] sm:$0xff] }
 0x1a5   :  { %1869 = vmatpush.msra.mxu2 %v1017_v13  ;;  %1889 = vmatpush.msra.mxu3 %v1113_v24  ;;  %v934_v53 = vld [vmem:[#allocation9 + $0x598] sm:$0xff]  ;;  %v1215_v13 = vld [vmem:[#allocation9 + $0xe60] sm:$0xff] }
 0x1a6   :  { %1830 = vmatpush.msra.mxu0 %v819_v63  ;;  %1850 = vmatpush.msra.mxu1 %v915_v22  ;;  %v1311_v24 = vld [vmem:[#allocation9 + $0x1160] sm:$0xff]  ;;  %v832_v63 = vld [vmem:[#allocation9 + $0x268] sm:$0xff] }
 0x1a7   :  { %1870 = vmatpush.msra.mxu2 %v1011_v41  ;;  %1890 = vmatpush.msra.mxu3 %v1107_v9  ;;  %v928_v22 = vld [vmem:[#allocation9 + $0x568] sm:$0xff]  ;;  %v1209_v41 = vld [vmem:[#allocation9 + $0xe30] sm:$0xff] }
 0x1a8   :  { %1831 = vmatpush.msra.mxu0 %v813_v0  ;;  %1851 = vmatpush.msra.mxu1 %v909_v55  ;;  %v1305_v9 = vld [vmem:[#allocation9 + $0x1130] sm:$0xff]  ;;  %v826_v0 = vld [vmem:[#allocation9 + $0x238] sm:$0xff] }
 0x1a9   :  { %1871 = vmatpush.msra.mxu2 %v1005_v31  ;;  %1891 = vmatpush.msra.mxu3 %v1101_v34  ;;  %v922_v55 = vld [vmem:[#allocation9 + $0x538] sm:$0xff]  ;;  %v1203_v31 = vld [vmem:[#allocation9 + $0xe00] sm:$0xff] }
 0x1aa   :  { %1832 = vmatpush.msra.mxu0 %v807_v50  ;;  %1852 = vmatpush.msra.mxu1 %v903_v1  ;;  %v1299_v34 = vld [vmem:[#allocation9 + $0x1100] sm:$0xff]  ;;  %v820_v50 = vld [vmem:[#allocation9 + $0x208] sm:$0xff] }
 0x1ab   :  { %1872 = vmatpush.msra.mxu2 %v999_v59  ;;  %1892 = vmatpush.msra.mxu3 %v1095_v29  ;;  %v916_v1 = vld [vmem:[#allocation9 + $0x508] sm:$0xff]  ;;  %v1197_v59 = vld [vmem:[#allocation9 + $0xdd0] sm:$0xff] }
 0x1ac   :  { %1833 = vmatpush.msra.mxu0 %v801_v45  ;;  %1853 = vmatpush.msra.mxu1 %v897_v14  ;;  %v1293_v29 = vld [vmem:[#allocation9 + $0x10d0] sm:$0xff]  ;;  %v814_v45 = vld [vmem:[#allocation9 + $0x1d8] sm:$0xff] }
 0x1ad   :  { %1873 = vmatpush.msra.mxu2 %v993_v19  ;;  %1893 = vmatpush.msra.mxu3 %v1089_v3  ;;  %v910_v14 = vld [vmem:[#allocation9 + $0x4d8] sm:$0xff]  ;;  %v1191_v19 = vld [vmem:[#allocation9 + $0xda0] sm:$0xff] }
 0x1ae   :  { %1834 = vmatpush.msra.mxu0 %v795_v26  ;;  %1854 = vmatpush.msra.mxu1 %v891_v21  ;;  %v1287_v3 = vld [vmem:[#allocation9 + $0x10a0] sm:$0xff]  ;;  %v808_v26 = vld [vmem:[#allocation9 + $0x1a8] sm:$0xff] }
 0x1af   :  { %1874 = vmatpush.msra.mxu2 %v987_v40  ;;  %1894 = vmatpush.msra.mxu3 %v1083_v39  ;;  %v904_v21 = vld [vmem:[#allocation9 + $0x4a8] sm:$0xff]  ;;  %v1185_v40 = vld [vmem:[#allocation9 + $0xd70] sm:$0xff] }
 0x1b0   :  { %1835 = vmatpush.msra.mxu0 %v789_v52  ;;  %1855 = vmatpush.msra.mxu1 %v885_v36  ;;  %v1281_v39 = vld [vmem:[#allocation9 + $0x1070] sm:$0xff]  ;;  %v802_v52 = vld [vmem:[#allocation9 + $0x178] sm:$0xff] }
 0x1b1   :  { %1875 = vmatpush.msra.mxu2 %v981_v32  ;;  %1895 = vmatpush.msra.mxu3 %v1077_v56  ;;  %v898_v36 = vld [vmem:[#allocation9 + $0x478] sm:$0xff]  ;;  %v1179_v32 = vld [vmem:[#allocation9 + $0xd40] sm:$0xff] }
 0x1b2   :  { %1836 = vmatpush.msra.mxu0 %v783_v27  ;;  %1856 = vmatpush.msra.mxu1 %v879_v25  ;;  %v1275_v56 = vld [vmem:[#allocation9 + $0x1040] sm:$0xff]  ;;  %v796_v27 = vld [vmem:[#allocation9 + $0x148] sm:$0xff] }
 0x1b3   :  { %1876 = vmatpush.msra.mxu2 %v975_v38  ;;  %1896 = vmatpush.msra.mxu3 %v1071_v20  ;;  %v892_v25 = vld [vmem:[#allocation9 + $0x448] sm:$0xff]  ;;  %v1173_v38 = vld [vmem:[#allocation9 + $0xd10] sm:$0xff] }
 0x1b4   :  { %1837 = vmatpush.msra.mxu0 %v777_v44  ;;  %1857 = vmatpush.msra.mxu1 %v873_v23  ;;  %v1269_v20 = vld [vmem:[#allocation9 + $0x1010] sm:$0xff]  ;;  %v790_v44 = vld [vmem:[#allocation9 + $0x118] sm:$0xff] }
 0x1b5   :  { %1877 = vmatpush.msra.mxu2 %v969_v35  ;;  %1897 = vmatpush.msra.mxu3 %v1065_v30  ;;  %v886_v23 = vld [vmem:[#allocation9 + $0x418] sm:$0xff]  ;;  %v1167_v35 = vld [vmem:[#allocation9 + $0xce0] sm:$0xff] }
 0x1b6   :  { %1838 = vmatpush.msra.mxu0 %v771_v61  ;;  %1858 = vmatpush.msra.mxu1 %v867_v43  ;;  %v1263_v30 = vld [vmem:[#allocation9 + $0xfe0] sm:$0xff]  ;;  %v784_v61 = vld [vmem:[#allocation9 + $0xe8] sm:$0xff] }
 0x1b7   :  { %1878 = vmatpush.msra.mxu2 %v963_v15  ;;  %1898 = vmatpush.msra.mxu3 %v1059_v6  ;;  %v880_v43 = vld [vmem:[#allocation9 + $0x3e8] sm:$0xff]  ;;  %v1161_v15 = vld [vmem:[#allocation9 + $0xcb0] sm:$0xff] }
 0x1b8   :  { %1839 = vmatpush.msra.mxu0 %v765_v8  ;;  %1859 = vmatpush.msra.mxu1 %v861_v42  ;;  %v1257_v6 = vld [vmem:[#allocation9 + $0xfb0] sm:$0xff]  ;;  %v778_v8 = vld [vmem:[#allocation9 + $0xb8] sm:$0xff] }
 0x1b9   :  { %1879 = vmatpush.msra.mxu2 %v957_v12  ;;  %1899 = vmatpush.msra.mxu3 %v1053_v37  ;;  %v874_v42 = vld [vmem:[#allocation9 + $0x3b8] sm:$0xff]  ;;  %v1155_v12 = vld [vmem:[#allocation9 + $0xc80] sm:$0xff] }
 0x1ba   :  { %1840 = vmatpush.msra.mxu0 %v759_v46  ;;  %1860 = vmatpush.msra.mxu1 %v855_v57  ;;  %v1251_v37 = vld [vmem:[#allocation9 + $0xf80] sm:$0xff]  ;;  %v772_v46 = vld [vmem:[#allocation9 + $0x88] sm:$0xff] }
 0x1bb   :  { %1880 = vmatpush.msra.mxu2 %v951_v16  ;;  %1900 = vmatpush.msra.mxu3 %v1047_v17  ;;  %v868_v57 = vld [vmem:[#allocation9 + $0x388] sm:$0xff]  ;;  %v1149_v16 = vld [vmem:[#allocation9 + $0xc50] sm:$0xff] }
 0x1bc   :  { %1841 = vmatmul.f32.vlgmr.msra.gmra.mxu0 %v3059_v33  ;;  %1861 = vmatmul.f32.vlgmr.msra.gmra.mxu1 %v3065_v4  ;;  %v1245_v17 = vld [vmem:[#allocation9 + $0xf50] sm:$0xff] }
 0x1bd   :  { %1881 = vmatmul.f32.vlgmr.msra.gmra.mxu2 %v3069_v60  ;;  %1901 = vmatmul.f32.vlgmr.msra.gmra.mxu3 %v3071_v62 }
 0x1be   :  { %1905 = vmatpush.msrb.mxu0 %v1233_v48  ;;  %1925 = vmatpush.msrb.mxu1 %v1329_v11  ;;  %v766_v48 = vld [vmem:[#allocation9 + $0x58] sm:$0xff] }
 0x1bf   :  { %1945 = vmatpush.msrb.mxu2 %v850_v49  ;;  %1965 = vmatpush.msrb.mxu3 %v946_v18  ;;  %v862_v11 = vld [vmem:[#allocation9 + $0x358] sm:$0xff]  ;;  %v1143_v49 = vld [vmem:[#allocation9 + $0xc20] sm:$0xff] }
 0x1c0   :  { %1906 = vmatpush.msrb.mxu0 %v1227_v28  ;;  %1926 = vmatpush.msrb.mxu1 %v1323_v2  ;;  %v1239_v18 = vld [vmem:[#allocation9 + $0xf20] sm:$0xff]  ;;  %v760_v28 = vld [vmem:[#allocation9 + $0x28] sm:$0xff] }
 0x1c1   :  { %1946 = vmatpush.msrb.mxu2 %v844_v7  ;;  %1966 = vmatpush.msrb.mxu3 %v940_v58  ;;  %v856_v2 = vld [vmem:[#allocation9 + $0x328] sm:$0xff]  ;;  %v1042_v7 = vld [vmem:[#allocation9 + $0x8f8] sm:$0xff] }
 0x1c2   :  { %1907 = vmatpush.msrb.mxu0 %v1221_v51  ;;  %1927 = vmatpush.msrb.mxu1 %v1317_v10  ;;  %v1138_v58 = vld [vmem:[#allocation9 + $0xbf8] sm:$0xff] }
 0x1c3   :  { %1947 = vmatpush.msrb.mxu2 %v838_v5  ;;  %1967 = vmatpush.msrb.mxu3 %v934_v53  ;;  %v1234_v51 = vld [vmem:[#allocation9 + $0xef8] sm:$0xff]  ;;  %v1036_v5 = vld [vmem:[#allocation9 + $0x8c8] sm:$0xff] }
 0x1c4   :  { %1908 = vmatpush.msrb.mxu0 %v1215_v13  ;;  %1928 = vmatpush.msrb.mxu1 %v1311_v24  ;;  %v1330_v10 = vld [vmem:[#allocation9 + $0x11f8] sm:$0xff]  ;;  %v1132_v53 = vld [vmem:[#allocation9 + $0xbc8] sm:$0xff] }
 0x1c5   :  { %1948 = vmatpush.msrb.mxu2 %v832_v63  ;;  %1968 = vmatpush.msrb.mxu3 %v928_v22  ;;  %v1228_v13 = vld [vmem:[#allocation9 + $0xec8] sm:$0xff]  ;;  %v1030_v63 = vld [vmem:[#allocation9 + $0x898] sm:$0xff] }
 0x1c6   :  { %1909 = vmatpush.msrb.mxu0 %v1209_v41  ;;  %1929 = vmatpush.msrb.mxu1 %v1305_v9  ;;  %v1324_v24 = vld [vmem:[#allocation9 + $0x11c8] sm:$0xff]  ;;  %v1126_v22 = vld [vmem:[#allocation9 + $0xb98] sm:$0xff] }
 0x1c7   :  { %1949 = vmatpush.msrb.mxu2 %v826_v0  ;;  %1969 = vmatpush.msrb.mxu3 %v922_v55  ;;  %v1222_v41 = vld [vmem:[#allocation9 + $0xe98] sm:$0xff]  ;;  %v1024_v0 = vld [vmem:[#allocation9 + $0x868] sm:$0xff] }
 0x1c8   :  { %1910 = vmatpush.msrb.mxu0 %v1203_v31  ;;  %1930 = vmatpush.msrb.mxu1 %v1299_v34  ;;  %v1318_v9 = vld [vmem:[#allocation9 + $0x1198] sm:$0xff]  ;;  %v1216_v55 = vld [vmem:[#allocation9 + $0xe68] sm:$0xff] }
 0x1c9   :  { %1950 = vmatpush.msrb.mxu2 %v820_v50  ;;  %1970 = vmatpush.msrb.mxu3 %v916_v1  ;;  %v1018_v31 = vld [vmem:[#allocation9 + $0x838] sm:$0xff] }
 0x1ca   :  { %1911 = vmatpush.msrb.mxu0 %v1197_v59  ;;  %1931 = vmatpush.msrb.mxu1 %v1293_v29  ;;  %v1114_v34 = vld [vmem:[#allocation9 + $0xb38] sm:$0xff]  ;;  %v1012_v59 = vld [vmem:[#allocation9 + $0x808] sm:$0xff] }
 0x1cb   :  { %1951 = vmatpush.msrb.mxu2 %v814_v45  ;;  %1971 = vmatpush.msrb.mxu3 %v910_v14  ;;  %v1210_v50 = vld [vmem:[#allocation9 + $0xe38] sm:$0xff]  ;;  %v1108_v29 = vld [vmem:[#allocation9 + $0xb08] sm:$0xff] }
 0x1cc   :  { %1912 = vmatpush.msrb.mxu0 %v1191_v19  ;;  %1932 = vmatpush.msrb.mxu1 %v1287_v3  ;;  %v1306_v1 = vld [vmem:[#allocation9 + $0x1138] sm:$0xff]  ;;  %v1204_v45 = vld [vmem:[#allocation9 + $0xe08] sm:$0xff] }
 0x1cd   :  { %1952 = vmatpush.msrb.mxu2 %v808_v26  ;;  %1972 = vmatpush.msrb.mxu3 %v904_v21  ;;  %v1300_v14 = vld [vmem:[#allocation9 + $0x1108] sm:$0xff]  ;;  %v1006_v19 = vld [vmem:[#allocation9 + $0x7d8] sm:$0xff] }
 0x1ce   :  { %1913 = vmatpush.msrb.mxu0 %v1185_v40  ;;  %1933 = vmatpush.msrb.mxu1 %v1281_v39  ;;  %v1102_v3 = vld [vmem:[#allocation9 + $0xad8] sm:$0xff]  ;;  %v1000_v40 = vld [vmem:[#allocation9 + $0x7a8] sm:$0xff] }
 0x1cf   :  { %1953 = vmatpush.msrb.mxu2 %v802_v52  ;;  %1973 = vmatpush.msrb.mxu3 %v898_v36  ;;  %v1198_v26 = vld [vmem:[#allocation9 + $0xdd8] sm:$0xff]  ;;  %v1096_v39 = vld [vmem:[#allocation9 + $0xaa8] sm:$0xff]  ;;  %v3124_v36 = vpop.f32.mrf.mxu0 }
 0x1d0   :  { %1914 = vmatpush.msrb.mxu0 %v1179_v32  ;;  %1934 = vmatpush.msrb.mxu1 %v1275_v56  ;;  %v1294_v21 = vld [vmem:[#allocation9 + $0x10d8] sm:$0xff]  ;;  %v1192_v52 = vld [vmem:[#allocation9 + $0xda8] sm:$0xff] }
 0x1d1   :  { %1954 = vmatpush.msrb.mxu2 %v796_v27  ;;  %1974 = vmatpush.msrb.mxu3 %v892_v25  ;;  %v1288_v32 = vld [vmem:[#allocation9 + $0x10a8] sm:$0xff]  ;;  %v994_v56 = vld [vmem:[#allocation9 + $0x778] sm:$0xff]  ;;  %v3126_v27 = vpop.f32.mrf.mxu2 }
 0x1d2   :  { %1915 = vmatpush.msrb.mxu0 %v1173_v38  ;;  %1935 = vmatpush.msrb.mxu1 %v1269_v20  ;;  %v1090_v25 = vld [vmem:[#allocation9 + $0xa78] sm:$0xff] }
 0x1d3   :  { %1955 = vmatpush.msrb.mxu2 %v790_v44  ;;  %1975 = vmatpush.msrb.mxu3 %v886_v23  ;;  %v1186_v38 = vld [vmem:[#allocation9 + $0xd78] sm:$0xff]  ;;  %v988_v44 = vld [vmem:[#allocation9 + $0x748] sm:$0xff] }
 0x1d4   :  { %1916 = vmatpush.msrb.mxu0 %v1167_v35  ;;  %1936 = vmatpush.msrb.mxu1 %v1263_v30  ;;  %v1282_v20 = vld [vmem:[#allocation9 + $0x1078] sm:$0xff]  ;;  %v1084_v23 = vld [vmem:[#allocation9 + $0xa48] sm:$0xff] }
 0x1d5   :  { %1956 = vmatpush.msrb.mxu2 %v784_v61  ;;  %1976 = vmatpush.msrb.mxu3 %v880_v43  ;;  %v1180_v35 = vld [vmem:[#allocation9 + $0xd48] sm:$0xff]  ;;  %v982_v61 = vld [vmem:[#allocation9 + $0x718] sm:$0xff]  ;;  %v3128_v43 = vpop.f32.mrf.mxu1 }
 0x1d6   :  { %1917 = vmatpush.msrb.mxu0 %v1161_v15  ;;  %1937 = vmatpush.msrb.mxu1 %v1257_v6  ;;  %v1276_v30 = vld [vmem:[#allocation9 + $0x1048] sm:$0xff]  ;;  %v1078_v15 = vld [vmem:[#allocation9 + $0xa18] sm:$0xff] }
 0x1d7   :  { %1957 = vmatpush.msrb.mxu2 %v778_v8  ;;  %1977 = vmatpush.msrb.mxu3 %v874_v42  ;;  %v1174_v6 = vld [vmem:[#allocation9 + $0xd18] sm:$0xff]  ;;  %v976_v42 = vld [vmem:[#allocation9 + $0x6e8] sm:$0xff] }
 0x1d8   :  { %1918 = vmatpush.msrb.mxu0 %v1155_v12  ;;  %1938 = vmatpush.msrb.mxu1 %v1251_v37  ;;  %v1270_v8 = vld [vmem:[#allocation9 + $0x1018] sm:$0xff]  ;;  %v3130_v12 = vpop.f32.mrf.mxu3  ;;  %v1072_v37 = vld [vmem:[#allocation9 + $0x9e8] sm:$0xff] }
 0x1d9   :  { %1958 = vmatpush.msrb.mxu2 %v772_v46  ;;  %1978 = vmatpush.msrb.mxu3 %v868_v57  ;;  %v1168_v46 = vld [vmem:[#allocation9 + $0xce8] sm:$0xff] }
 0x1da   :  { %1919 = vmatpush.msrb.mxu0 %v1149_v16  ;;  %1939 = vmatpush.msrb.mxu1 %v1245_v17  ;;  %v1264_v57 = vld [vmem:[#allocation9 + $0xfe8] sm:$0xff]  ;;  %v970_v16 = vld [vmem:[#allocation9 + $0x6b8] sm:$0xff] }
 0x1db   :  { %1959 = vmatpush.msrb.mxu2 %v766_v48  ;;  %1979 = vmatpush.msrb.mxu3 %v862_v11  ;;  %v1066_v17 = vld [vmem:[#allocation9 + $0x9b8] sm:$0xff]  ;;  %v3132_v11 = vpop.f32.mrf.mxu0 }
 0x1dc   :  { %1920 = vmatpush.msrb.mxu0 %v1143_v49  ;;  %1940 = vmatpush.msrb.mxu1 %v1239_v18  ;;  %v1162_v48 = vld [vmem:[#allocation9 + $0xcb8] sm:$0xff]  ;;  %v964_v18 = vld [vmem:[#allocation9 + $0x688] sm:$0xff] }
 0x1dd   :  { %1960 = vmatpush.msrb.mxu2 %v760_v28  ;;  %1980 = vmatpush.msrb.mxu3 %v856_v2  ;;  %v1258_v49 = vld [vmem:[#allocation9 + $0xfb8] sm:$0xff]  ;;  %v3134_v28 = vpop.f32.mrf.mxu2  ;;  %v1060_v2 = vld [vmem:[#allocation9 + $0x988] sm:$0xff] }
 0x1de   :  { %1921 = vmatmul.f32.vlgmr.msrb.gmra.mxu0 %v3092_v47  ;;  %1941 = vmatmul.f32.vlgmr.msrb.gmra.mxu1 %v3094_v54 }
 0x1df   :  { %1961 = vmatmul.f32.vlgmr.msrb.gmra.mxu2 %v3059_v33  ;;  %1981 = vmatmul.f32.vlgmr.msrb.gmra.mxu3 %v3065_v4  ;;  %v1120_v33 = vld [vmem:[#allocation9 + $0xb68] sm:$0xff] }
 0x1e0   :  { %1985 = vmatpush.msra.mxu0 %v1042_v7  ;;  %2005 = vmatpush.msra.mxu1 %v1138_v58  ;;  %v1312_v4 = vld [vmem:[#allocation9 + $0x1168] sm:$0xff] }
 0x1e1   :  { %2025 = vmatpush.msra.mxu2 %v1234_v51  ;;  %2045 = vmatpush.msra.mxu3 %v1330_v10  ;;  %v1156_v7 = vld [vmem:[#allocation9 + $0xc88] sm:$0xff]  ;;  %v958_v51 = vld [vmem:[#allocation9 + $0x658] sm:$0xff] }
 0x1e2   :  { %1986 = vmatpush.msra.mxu0 %v1036_v5  ;;  %2006 = vmatpush.msra.mxu1 %v1132_v53  ;;  %v1252_v58 = vld [vmem:[#allocation9 + $0xf88] sm:$0xff]  ;;  %v1054_v10 = vld [vmem:[#allocation9 + $0x958] sm:$0xff] }
 0x1e3   :  { %2026 = vmatpush.msra.mxu2 %v1228_v13  ;;  %2046 = vmatpush.msra.mxu3 %v1324_v24  ;;  %v1150_v5 = vld [vmem:[#allocation9 + $0xc58] sm:$0xff]  ;;  %v952_v13 = vld [vmem:[#allocation9 + $0x628] sm:$0xff]  ;;  %v3136_v24 = vpop.f32.mrf.mxu1 }
 0x1e4   :  { %1987 = vmatpush.msra.mxu0 %v1030_v63  ;;  %2007 = vmatpush.msra.mxu1 %v1126_v22  ;;  %v1246_v53 = vld [vmem:[#allocation9 + $0xf58] sm:$0xff]  ;;  %v1048_v63 = vld [vmem:[#allocation9 + $0x928] sm:$0xff] }
 0x1e5   :  { %2027 = vmatpush.msra.mxu2 %v1222_v41  ;;  %2047 = vmatpush.msra.mxu3 %v1318_v9  ;;  %v1144_v22 = vld [vmem:[#allocation9 + $0xc28] sm:$0xff]  ;;  %v3138_v9 = vpop.f32.mrf.mxu3 }
 0x1e6   :  { %1988 = vmatpush.msra.mxu0 %v1024_v0  ;;  %2008 = vmatpush.msra.mxu1 %v1120_v33  ;;  %v1240_v41 = vld [vmem:[#allocation9 + $0xf28] sm:$0xff]  ;;  %v3140_v0 = vpop.f32.mrf.mxu0  ;;  %v2086_v33 = vld [vmem:[#allocation12 + $0x78] sm:$0xff] }
 0x1e7   :  { %2028 = vmatpush.msra.mxu2 %v1216_v55  ;;  %2048 = vmatpush.msra.mxu3 %v1312_v4  ;;  %v3142_v55 = vpop.f32.mrf.mxu2  ;;  %v2102_v4 = vld [vmem:[#allocation12 + $0xf8] sm:$0xff] }
 0x1e8   :  { %1989 = vmatpush.msra.mxu0 %v1018_v31  ;;  %2009 = vmatpush.msra.mxu1 %v1114_v34  ;;  %v2118_v31 = vld [vmem:[#allocation12 + $0x178] sm:$0xff]  ;;  %v2085_v34 = vld [vmem:[#allocation12 + $0x70] sm:$0xff] }
 0x1e9   :  { %2029 = vmatpush.msra.mxu2 %v1210_v50  ;;  %2049 = vmatpush.msra.mxu3 %v1306_v1  ;;  %v2134_v50 = vld [vmem:[#allocation12 + $0x1f8] sm:$0xff]  ;;  %v2101_v1 = vld [vmem:[#allocation12 + $0xf0] sm:$0xff] }
 0x1ea   :  { %1990 = vmatpush.msra.mxu0 %v1012_v59  ;;  %2010 = vmatpush.msra.mxu1 %v1108_v29  ;;  %v2117_v59 = vld [vmem:[#allocation12 + $0x170] sm:$0xff]  ;;  %v3148_v29 = vld [vmem:[#allocation10] sm:$0x3f] }
 0x1eb   :  { %2030 = vmatpush.msra.mxu2 %v1204_v45  ;;  %2050 = vmatpush.msra.mxu3 %v1300_v14  ;;  %v2084_v45 = vld [vmem:[#allocation12 + $0x68] sm:$0xff]  ;;  %v2133_v14 = vld [vmem:[#allocation12 + $0x1f0] sm:$0xff] }
 0x1ec   :  { %1991 = vmatpush.msra.mxu0 %v1006_v19  ;;  %2011 = vmatpush.msra.mxu1 %v1102_v3  ;;  %v2100_v19 = vld [vmem:[#allocation12 + $0xe8] sm:$0xff] }
 0x1ed   :  { %2031 = vmatpush.msra.mxu2 %v1198_v26  ;;  %2051 = vmatpush.msra.mxu3 %v1294_v21  ;;  %v2132_v3 = vld [vmem:[#allocation12 + $0x1e8] sm:$0xff]  ;;  %v3153_v26 = vpop.f32.mrf.mxu3  ;;  %v2099_v21 = vld [vmem:[#allocation12 + $0xe0] sm:$0xff] }
 0x1ee   :  { %1992 = vmatpush.msra.mxu0 %v1000_v40  ;;  %2012 = vmatpush.msra.mxu1 %v1096_v39  ;;  %v2115_v40 = vld [vmem:[#allocation12 + $0x160] sm:$0xff]  ;;  %v1602_v39 = vpop.f32.mrf.mxu0 }
 0x1ef   :  { %2032 = vmatpush.msra.mxu2 %v1192_v52  ;;  %2052 = vmatpush.msra.mxu3 %v1288_v32  ;;  %v2082_v52 = vld [vmem:[#allocation12 + $0x58] sm:$0xff]  ;;  %v2131_v32 = vld [vmem:[#allocation12 + $0x1e0] sm:$0xff] }
 0x1f0   :  { %1993 = vmatpush.msra.mxu0 %v994_v56  ;;  %2013 = vmatpush.msra.mxu1 %v1090_v25  ;;  %v1334_v56 = vperm.slane %v3148_v29, 1  ;;  %v1642_v25 = vpop.f32.mrf.mxu2 }
 0x1f1   :  { %2033 = vmatpush.msra.mxu2 %v1186_v38  ;;  %2053 = vmatpush.msra.mxu3 %v1282_v20  ;;  %v2098_v38 = vld [vmem:[#allocation12 + $0xd8] sm:$0xff] }
 0x1f2   :  { %1994 = vmatpush.msra.mxu0 %v988_v44  ;;  %2014 = vmatpush.msra.mxu1 %v1084_v23  ;;  %v2114_v20 = vld [vmem:[#allocation12 + $0x158] sm:$0xff]  ;;  %v1335_v44 = vperm.slane %v3148_v29, 2  ;;  %v2081_v23 = vld [vmem:[#allocation12 + $0x50] sm:$0xff] }
 0x1f3   :  { %2034 = vmatpush.msra.mxu2 %v1180_v35  ;;  %2054 = vmatpush.msra.mxu3 %v1276_v30  ;;  %v2130_v35 = vld [vmem:[#allocation12 + $0x1d8] sm:$0xff] }
 0x1f4   :  { %1995 = vmatpush.msra.mxu0 %v982_v61  ;;  %2015 = vmatpush.msra.mxu1 %v1078_v15  ;;  %v2097_v61 = vld [vmem:[#allocation12 + $0xd0] sm:$0xff] }
 0x1f5   :  { %2035 = vmatpush.msra.mxu2 %v1174_v6  ;;  %2055 = vmatpush.msra.mxu3 %v1270_v8  ;;  %v2113_v15 = vld [vmem:[#allocation12 + $0x150] sm:$0xff]  ;;  %v2080_v6 = vld [vmem:[#allocation12 + $0x48] sm:$0xff] }
 0x1f6   :  { %1996 = vmatpush.msra.mxu0 %v976_v42  ;;  %2016 = vmatpush.msra.mxu1 %v1072_v37  ;;  %v2129_v8 = vld [vmem:[#allocation12 + $0x1d0] sm:$0xff]  ;;  %v1483_v42 = vadd.f32 %v3134_v28, %v1334_v56  ;;  %v1336_v28 = vperm.slane %v3148_v29, 3 }
 0x1f7   :  { %2036 = vmatpush.msra.mxu2 %v1168_v46  ;;  %2056 = vmatpush.msra.mxu3 %v1264_v57  ;;  %v2096_v46 = vld [vmem:[#allocation12 + $0xc8] sm:$0xff] }
 0x1f8   :  { %1997 = vmatpush.msra.mxu0 %v970_v16  ;;  %2017 = vmatpush.msra.mxu1 %v1066_v17  ;;  %v2112_v57 = vld [vmem:[#allocation12 + $0x148] sm:$0xff]  ;;  %v1603_v16 = vadd.f32 %v1602_v39, %v1335_v44  ;;  %v2079_v17 = vld [vmem:[#allocation12 + $0x40] sm:$0xff] }
 0x1f9   :  { %2037 = vmatpush.msra.mxu2 %v1162_v48  ;;  %2057 = vmatpush.msra.mxu3 %v1258_v49  ;;  %v1662_v49 = vpop.f32.mrf.mxu3 }
 0x1fa   :  { %1998 = vmatpush.msra.mxu0 %v964_v18  ;;  %2018 = vmatpush.msra.mxu1 %v1060_v2  ;;  %v2095_v18 = vld [vmem:[#allocation12 + $0xc0] sm:$0xff] }
 0x1fb   :  { %2038 = vmatpush.msra.mxu2 %v1156_v7  ;;  %2058 = vmatpush.msra.mxu3 %v1252_v58  ;;  %v2111_v2 = vld [vmem:[#allocation12 + $0x140] sm:$0xff]  ;;  %v1682_v7 = vpop.f32.mrf.mxu0  ;;  %v2078_v58 = vld [vmem:[#allocation12 + $0x38] sm:$0xff] }
 0x1fc   :  { %1999 = vmatpush.msra.mxu0 %v958_v51  ;;  %2019 = vmatpush.msra.mxu1 %v1054_v10  ;;  %v2127_v51 = vld [vmem:[#allocation12 + $0x1c0] sm:$0xff] }
 0x1fd   :  { %2039 = vmatpush.msra.mxu2 %v1150_v5  ;;  %2059 = vmatpush.msra.mxu3 %v1246_v53  ;;  %v1503_v5 = vadd.f32 %v3138_v9, %v1483_v42  ;;  %v1722_v53 = vpop.f32.mrf.mxu2  ;;  %v2076_v9 = vld [vmem:[#allocation12 + $0x28] sm:$0xff] }
 0x1fe   :  { %2000 = vmatpush.msra.mxu0 %v952_v13  ;;  %2020 = vmatpush.msra.mxu1 %v1048_v63  ;;  %v2094_v13 = vld [vmem:[#allocation12 + $0xb8] sm:$0xff] }
 0x1ff   :  { %2040 = vmatpush.msra.mxu2 %v1144_v22  ;;  %2060 = vmatpush.msra.mxu3 %v1240_v41  ;;  %v2077_v22 = vld [vmem:[#allocation12 + $0x30] sm:$0xff]  ;;  %v2126_v41 = vld [vmem:[#allocation12 + $0x1b8] sm:$0xff] }
 0x200   :  { %2001 = vmatmul.f32.vlgmr.msra.gmra.mxu0 %v3069_v60  ;;  %2021 = vmatmul.f32.vlgmr.msra.gmra.mxu1 %v3071_v62  ;;  %v3150_v60 = vpop.f32.mrf.mxu1  ;;  %v2116_v62 = vld [vmem:[#allocation12 + $0x168] sm:$0xff] }
 0x201   :  { %2041 = vmatmul.f32.vlgmr.msra.gmra.mxu2 %v3092_v47  ;;  %2061 = vmatmul.f32.vlgmr.msra.gmra.mxu3 %v3094_v54  ;;  %v2083_v47 = vld [vmem:[#allocation12 + $0x60] sm:$0xff]  ;;  %v1333_v54 = vperm.slane %v3148_v29, 0 }
 0x202   :  { %2171 = vmatpush.msrb.mxu0 %v2086_v33  ;;  %2191 = vmatpush.msrb.mxu1 %v2102_v4  ;;  %v1523_v33 = vadd.f32 %v3140_v0, %v1503_v5  ;;  %v2093_v4 = vld [vmem:[#allocation12 + $0xb0] sm:$0xff]  ;;  %v2075_v0 = vld [vmem:[#allocation12 + $0x20] sm:$0xff]  ;;  %v2148_v5 = vld [vmem:[#allocation12 + $0x268] sm:$0xff] }
 0x203   :  { %2211 = vmatpush.msrb.mxu2 %v2118_v31  ;;  %2231 = vmatpush.msrb.mxu3 %v2134_v50  ;;  %v1363_v30 = vadd.f32 %v3124_v36, %v1333_v54  ;;  %v2128_v36 = vld [vmem:[#allocation12 + $0x1c8] sm:$0xff]  ;;  %v2109_v31 = vld [vmem:[#allocation12 + $0x130] sm:$0xff]  ;;  %v2107_v54 = vld [vmem:[#allocation12 + $0x120] sm:$0xff] }
 0x204   :  { %2172 = vmatpush.msrb.mxu0 %v2085_v34  ;;  %2192 = vmatpush.msrb.mxu1 %v2101_v1  ;;  %v2125_v50 = vld [vmem:[#allocation12 + $0x1b0] sm:$0xff] }
 0x205   :  { %2212 = vmatpush.msrb.mxu2 %v2117_v59  ;;  %2232 = vmatpush.msrb.mxu3 %v2133_v14  ;;  %v1383_v48 = vadd.f32 %v3128_v43, %v1363_v30  ;;  %v2110_v43 = vld [vmem:[#allocation12 + $0x138] sm:$0xff]  ;;  %v2108_v14 = vld [vmem:[#allocation12 + $0x128] sm:$0xff]  ;;  %v2105_v30 = vld [vmem:[#allocation12 + $0x110] sm:$0xff] }
 0x206   :  { %2173 = vmatpush.msrb.mxu0 %v2084_v45  ;;  %2193 = vmatpush.msrb.mxu1 %v2100_v19  ;;  %v2092_v45 = vld [vmem:[#allocation12 + $0xa8] sm:$0xff] }
 0x207   :  { %2213 = vmatpush.msrb.mxu2 %v2116_v62  ;;  %2233 = vmatpush.msrb.mxu3 %v2132_v3  ;;  %v1403_v10 = vadd.f32 %v3126_v27, %v1383_v48  ;;  %v1723_v27 = vadd.f32 %v1722_v53, %v1336_v28  ;;  %v2124_v19 = vld [vmem:[#allocation12 + $0x1a8] sm:$0xff]  ;;  %v1543_v62 = vadd.f32 %v3150_v60, %v1523_v33  ;;  %v2091_v3 = vld [vmem:[#allocation12 + $0xa0] sm:$0xff]  ;;  %v2141_v33 = vld [vmem:[#allocation12 + $0x230] sm:$0xff] }
 0x208   :  { %2174 = vmatpush.msrb.mxu0 %v2083_v47  ;;  %2194 = vmatpush.msrb.mxu1 %v2099_v21  ;;  %v1622_v37 = vpop.f32.mrf.mxu1  ;;  %v1742_v47 = vpop.f32.mrf.mxu3  ;;  %v2147_v53 = vld [vmem:[#allocation12 + $0x260] sm:$0xff] }
 0x209   :  { %2214 = vmatpush.msrb.mxu2 %v2115_v40  ;;  %2234 = vmatpush.msrb.mxu3 %v2131_v32  ;;  %v1623_v63 = vadd.f32 %v1622_v37, %v1603_v16  ;;  %v1423_v1 = vadd.f32 %v3130_v12, %v1403_v10  ;;  %v1743_v40 = vadd.f32 %v1742_v47, %v1723_v27  ;;  %v2074_v12 = vld [vmem:[#allocation12 + $0x18] sm:$0xff]  ;;  %v2120_v16 = vld [vmem:[#allocation12 + $0x188] sm:$0xff]  ;;  %v2149_v10 = vld [vmem:[#allocation12 + $0x270] sm:$0xff] }
 0x20a   :  { %2175 = vmatpush.msrb.mxu0 %v2082_v52  ;;  %2195 = vmatpush.msrb.mxu1 %v2098_v38  ;;  %v2123_v52 = vld [vmem:[#allocation12 + $0x1a0] sm:$0xff]  ;;  %v1563_v56 = vadd.f32 %v3142_v55, %v1543_v62  ;;  %v2106_v38 = vld [vmem:[#allocation12 + $0x118] sm:$0xff]  ;;  %v2137_v27 = vld [vmem:[#allocation12 + $0x210] sm:$0xff] }
 0x20b   :  { %2215 = vmatpush.msrb.mxu2 %v2114_v20  ;;  %2235 = vmatpush.msrb.mxu3 %v2130_v35  ;;  %v1643_v34 = vadd.f32 %v1642_v25, %v1623_v63  ;;  %v1443_v32 = vadd.f32 %v3132_v11, %v1423_v1  ;;  %v2090_v25 = vld [vmem:[#allocation12 + $0x98] sm:$0xff]  ;;  %v2073_v20 = vld [vmem:[#allocation12 + $0x10] sm:$0xff]  ;;  %v2144_v63 = vld [vmem:[#allocation12 + $0x248] sm:$0xff] }
 0x20c   :  { %2176 = vmatpush.msrb.mxu0 %v2081_v23  ;;  %2196 = vmatpush.msrb.mxu1 %v2097_v61  ;;  %v2122_v23 = vld [vmem:[#allocation12 + $0x198] sm:$0xff]  ;;  %v2089_v35 = vld [vmem:[#allocation12 + $0x90] sm:$0xff]  ;;  %v2072_v61 = vld [vmem:[#allocation12 + $0x8] sm:$0xff] }
 0x20d   :  { %2216 = vmatpush.msrb.mxu2 %v2113_v15  ;;  %2236 = vmatpush.msrb.mxu3 %v2129_v8  ;;  %v1663_v21 = vadd.f32 %v1662_v49, %v1643_v34  ;;  %v2121_v11 = vld [vmem:[#allocation12 + $0x190] sm:$0xff]  ;;  %v1463_v55 = vadd.f32 %v3136_v24, %v1443_v32  ;;  %v1583_v15 = vadd.f32 %v3153_v26, %v1563_v56  ;;  %v2104_v8 = vld [vmem:[#allocation12 + $0x108] sm:$0xff]  ;;  %v2138_v34 = vld [vmem:[#allocation12 + $0x218] sm:$0xff] }
 0x20e   :  { %2177 = vmatpush.msrb.mxu0 %v2080_v6  ;;  %2197 = vmatpush.msrb.mxu1 %v2096_v46  ;;  %v2088_v6 = vld [vmem:[#allocation12 + $0x88] sm:$0xff]  ;;  %v2071_v46 = vld [vmem:[#allocation12] sm:$0xff]  ;;  %v2166_v1 = vld [vmem:[#allocation12 + $0x2f8] sm:$0xff] }
 0x20f   :  { %2217 = vmatpush.msrb.mxu2 %v2112_v57  ;;  %2237 = vmatpush.msrb.mxu3 %v2128_v36  ;;  %v1683_v60 = vadd.f32 %v1682_v7, %v1663_v21  ;;  %v2103_v36 = vld [vmem:[#allocation12 + $0x100] sm:$0xff]  ;;  %v2065_v26 = vmax.f32 %v1463_v55, 0.0  ;;  %v2066_v49 = vmax.f32 %v1583_v15, 0.0  ;;  %v2161_v47 = vld [vmem:[#allocation12 + $0x2d0] sm:$0xff]  ;;  %v2152_v15 = vld [vmem:[#allocation12 + $0x288] sm:$0xff] }
 0x210   :  { %2178 = vmatpush.msrb.mxu0 %v2079_v17  ;;  %2198 = vmatpush.msrb.mxu1 %v2095_v18  ;;  %v1702_v59 = vpop.f32.mrf.mxu1  ;;  %v2087_v17 = vld [vmem:[#allocation12 + $0x80] sm:$0xff]  ;;  %v2153_v55 = vld [vmem:[#allocation12 + $0x290] sm:$0xff] }
 0x211   :  { %2218 = vmatpush.msrb.mxu2 %v2111_v2  ;;  %2238 = vmatpush.msrb.mxu3 %v2127_v51  ;;  %v1703_v37 = vadd.f32 %v1702_v59, %v1683_v60  ;;  %v2119_v2 = vld [vmem:[#allocation12 + $0x180] sm:$0xff]  ;;  %v2150_v51 = vld [vmem:[#allocation12 + $0x278] sm:$0xff]  ;;  %v2165_v59 = vld [vmem:[#allocation12 + $0x2f0] sm:$0xff] }
 0x212   :  { %2179 = vmatpush.msrb.mxu0 %v2078_v58  ;;  %2199 = vmatpush.msrb.mxu1 %v2094_v13  ;;  %v2146_v13 = vld [vmem:[#allocation12 + $0x258] sm:$0xff]  ;;  %v2159_v21 = vld [vmem:[#allocation12 + $0x2c0] sm:$0xff] }
 0x213   :  { %2219 = vmatpush.msrb.mxu2 %v2110_v43  ;;  %2239 = vmatpush.msrb.mxu3 %v2126_v41  ;;  %v2067_v7 = vmax.f32 %v1703_v37, 0.0  ;;  %v2145_v43 = vld [vmem:[#allocation12 + $0x250] sm:$0xff]  ;;  %v2142_v41 = vld [vmem:[#allocation12 + $0x238] sm:$0xff] }
 0x214   :  { %2180 = vmatpush.msrb.mxu0 %v2077_v22  ;;  %2200 = vmatpush.msrb.mxu1 %v2093_v4  ;;  %v2143_v22 = vld [vmem:[#allocation12 + $0x240] sm:$0xff]  ;;  %v2140_v4 = vld [vmem:[#allocation12 + $0x228] sm:$0xff] }
 0x215   :  { %2220 = vmatpush.msrb.mxu2 %v2109_v31  ;;  %2240 = vmatpush.msrb.mxu3 %v2125_v50  ;;  %v2139_v31 = vld [vmem:[#allocation12 + $0x220] sm:$0xff] }
 0x216   :  { %2181 = vmatpush.msrb.mxu0 %v2076_v9  ;;  %2201 = vmatpush.msrb.mxu1 %v2092_v45  ;;  %v2136_v9 = vld [vmem:[#allocation12 + $0x208] sm:$0xff]  ;;  %v2135_v50 = vld [vmem:[#allocation12 + $0x200] sm:$0xff] }
 0x217   :  { %2221 = vmatpush.msrb.mxu2 %v2108_v14  ;;  %v1762_v39 = vpop.f32.mrf.mxu0  ;;  %2241 = vmatpush.msrb.mxu3 %v2124_v19  ;;  %v2164_v45 = vld [vmem:[#allocation12 + $0x2e8] sm:$0xff]  ;;  %v2163_v14 = vld [vmem:[#allocation12 + $0x2e0] sm:$0xff]  ;;  %v1337_v19 = vperm.slane %v3148_v29, 4 }
 0x218   :  { %2182 = vmatpush.msrb.mxu0 %v2075_v0  ;;  %2202 = vmatpush.msrb.mxu1 %v2091_v3  ;;  %v1763_v44 = vadd.f32 %v1762_v39, %v1743_v40  ;;  %v1782_v42 = vpop.f32.mrf.mxu1  ;;  %v2162_v0 = vld [vmem:[#allocation12 + $0x2d8] sm:$0xff]  ;;  %v2160_v3 = vld [vmem:[#allocation12 + $0x2c8] sm:$0xff] }
 0x219   :  { %2222 = vmatpush.msrb.mxu2 %v2107_v54  ;;  %2242 = vmatpush.msrb.mxu3 %v2123_v52  ;;  %v2158_v39 = vld [vmem:[#allocation12 + $0x2b8] sm:$0xff] }
 0x21a   :  { %2183 = vmatpush.msrb.mxu0 %v2074_v12  ;;  %2203 = vmatpush.msrb.mxu1 %v2090_v25  ;;  %v1783_v57 = vadd.f32 %v1782_v42, %v1763_v44 }
 0x21b   :  { %2223 = vmatpush.msrb.mxu2 %v2106_v38  ;;  %2243 = vmatpush.msrb.mxu3 %v2122_v23 }
 0x21c   :  { %2184 = vmatpush.msrb.mxu0 %v2073_v20  ;;  %2204 = vmatpush.msrb.mxu1 %v2089_v35  ;;  %v2157_v35 = vld [vmem:[#allocation12 + $0x2b0] sm:$0xff] }
 0x21d   :  { %2224 = vmatpush.msrb.mxu2 %v2105_v30  ;;  %2244 = vmatpush.msrb.mxu3 %v2121_v11  ;;  %v2156_v30 = vld [vmem:[#allocation12 + $0x2a8] sm:$0xff]  ;;  %v2154_v11 = vld [vmem:[#allocation12 + $0x298] sm:$0xff] }
 0x21e   :  { %2185 = vmatpush.msrb.mxu0 %v2072_v61  ;;  %v1802_v48 = vpop.f32.mrf.mxu2  ;;  %2205 = vmatpush.msrb.mxu1 %v2088_v6  ;;  %v1822_v18 = vpop.f32.mrf.mxu3  ;;  %v2155_v61 = vld [vmem:[#allocation12 + $0x2a0] sm:$0xff] }
 0x21f   :  { %2225 = vmatpush.msrb.mxu2 %v2104_v8  ;;  %v1803_v24 = vadd.f32 %v1802_v48, %v1783_v57  ;;  %2245 = vmatpush.msrb.mxu3 %v2120_v16  ;;  %v2151_v6 = vld [vmem:[#allocation12 + $0x280] sm:$0xff]  ;;  %v1338_v8 = vperm.slane %v3148_v29, 5 }
 0x220   :  { %2186 = vmatpush.msrb.mxu0 %v2071_v46  ;;  %2206 = vmatpush.msrb.mxu1 %v2087_v17 }
 0x221   :  { %2226 = vmatpush.msrb.mxu2 %v2103_v36  ;;  %v1823_v28 = vadd.f32 %v1822_v18, %v1803_v24  ;;  %2187 = vmatmul.f32.vlgmr.msrb.gmra.mxu0 %v2065_v26 }
 0x222   :  { %2207 = vmatmul.f32.vlgmr.msrb.gmra.mxu1 %v2066_v49  ;;  %2227 = vmatmul.f32.vlgmr.msrb.gmra.mxu2 %v2067_v7  ;;  %v2352_v7 = vld [vmem:[#allocation13] ss:$0 sm:$0xff] }
 0x223   :  { %v2068_v58 = vmax.f32 %v1823_v28, 0.0  ;;  %2246 = vmatpush.msrb.mxu3 %v2119_v2  ;;  %2251 = vmatpush.msra.mxu0 %v2150_v51 }
 0x224   :  { %2271 = vmatpush.msra.mxu1 %v2166_v1 }
 0x225   :  { %2247 = vmatmul.f32.vlgmr.msrb.gmra.mxu3 %v2068_v58  ;;  %2252 = vmatpush.msra.mxu0 %v2149_v10 }
 0x226   :  { %2272 = vmatpush.msra.mxu1 %v2165_v59 }
 0x227   :  { %2253 = vmatpush.msra.mxu0 %v2148_v5 }
 0x228   :  { %2273 = vmatpush.msra.mxu1 %v2164_v45 }
 0x229   :  { %2254 = vmatpush.msra.mxu0 %v2147_v53 }
 0x22a   :  { %2274 = vmatpush.msra.mxu1 %v2163_v14 }
 0x22b   :  { %2255 = vmatpush.msra.mxu0 %v2146_v13 }
 0x22c   :  { %2275 = vmatpush.msra.mxu1 %v2162_v0 }
 0x22d   :  { %2256 = vmatpush.msra.mxu0 %v2145_v43 }
 0x22e   :  { %2276 = vmatpush.msra.mxu1 %v2161_v47 }
 0x22f   :  { %2257 = vmatpush.msra.mxu0 %v2144_v63 }
 0x230   :  { %2277 = vmatpush.msra.mxu1 %v2160_v3 }
 0x231   :  { %2258 = vmatpush.msra.mxu0 %v2143_v22 }
 0x232   :  { %2278 = vmatpush.msra.mxu1 %v2159_v21 }
 0x233   :  { %2259 = vmatpush.msra.mxu0 %v2142_v41 }
 0x234   :  { %2279 = vmatpush.msra.mxu1 %v2158_v39 }
 0x235   :  { %2260 = vmatpush.msra.mxu0 %v2141_v33 }
 0x236   :  { %2280 = vmatpush.msra.mxu1 %v2157_v35 }
 0x237   :  { %2261 = vmatpush.msra.mxu0 %v2140_v4 }
 0x238   :  { %2281 = vmatpush.msra.mxu1 %v2156_v30 }
 0x239   :  { %2262 = vmatpush.msra.mxu0 %v2139_v31  ;;  %v1842_v62 = vpop.f32.mrf.mxu0  ;;  %v1862_v40 = vpop.f32.mrf.mxu1 }
 0x23a   :  { %v1843_v54 = vadd.f32 %v1842_v62, %v1337_v19  ;;  %2282 = vmatpush.msra.mxu1 %v2155_v61 }
 0x23b   :  { %2263 = vmatpush.msra.mxu0 %v2138_v34 }
 0x23c   :  { %v1863_v52 = vadd.f32 %v1862_v40, %v1843_v54  ;;  %2283 = vmatpush.msra.mxu1 %v2154_v11 }
 0x23d   :  { %2264 = vmatpush.msra.mxu0 %v2137_v27 }
 0x23e   :  { %2284 = vmatpush.msra.mxu1 %v2153_v55 }
 0x23f   :  { %2265 = vmatpush.msra.mxu0 %v2136_v9 }
 0x240   :  { %v1882_v12 = vpop.f32.mrf.mxu2  ;;  %v1902_v56 = vpop.f32.mrf.mxu3  ;;  %2285 = vmatpush.msra.mxu1 %v2152_v15 }
 0x241   :  { %2266 = vmatpush.msra.mxu0 %v2135_v50  ;;  %v1883_v32 = vadd.f32 %v1882_v12, %v1863_v52 }
 0x242   :  { %2286 = vmatpush.msra.mxu1 %v2151_v6 }
 0x243   :  { %v1903_v25 = vadd.f32 %v1902_v56, %v1883_v32 }
 0x25b   :  { %v1922_v38 = vpop.f32.mrf.mxu0  ;;  %v1942_v20 = vpop.f32.mrf.mxu1 }
 0x25c   :  { %v1923_v60 = vadd.f32 %v1922_v38, %v1903_v25 }
 0x25e   :  { %v1943_v44 = vadd.f32 %v1942_v20, %v1923_v60 }
 0x260   :  { %v2069_v23 = vmax.f32 %v1943_v44, 0.0 }
 0x262   :  { %2267 = vmatmul.f32.vlgmr.msra.gmra.mxu0 %v2069_v23  ;;  %v1962_v42 = vpop.f32.mrf.mxu2  ;;  %v1982_v46 = vpop.f32.mrf.mxu3 }
 0x263   :  { %v1963_v37 = vadd.f32 %v1962_v42, %v1338_v8 }
 0x265   :  { %v1983_v57 = vadd.f32 %v1982_v46, %v1963_v37 }
 0x27d   :  { %v2002_v16 = vpop.f32.mrf.mxu0  ;;  %v2022_v36 = vpop.f32.mrf.mxu1 }
 0x27e   :  { %v2003_v17 = vadd.f32 %v2002_v16, %v1983_v57 }
 0x280   :  { %v2023_v48 = vadd.f32 %v2022_v36, %v2003_v17 }
 0x284   :  { %v2042_v24 = vpop.f32.mrf.mxu2  ;;  %v2062_v49 = vpop.f32.mrf.mxu3 }
 0x285   :  { %v2043_v26 = vadd.f32 %v2042_v24, %v2023_v48 }
 0x287   :  { %v2063_v18 = vadd.f32 %v2062_v49, %v2043_v26 }
 0x289   :  { %v2070_v2 = vmax.f32 %v2063_v18, 0.0 }
 0x28b   :  { %2287 = vmatmul.f32.vlgmr.msra.gmra.mxu1 %v2070_v2 }
 0x29e   :  { %v2188_v28 = vpop.f32.mrf.mxu0 }
 0x29f   :  { %v2189_v58 = vadd.f32 %v2352_v7, %v2188_v28  ;;  %v2208_v51 = vpop.f32.mrf.mxu1 }
 0x2a1   :  { %v2209_v29 = vadd.f32 %v2208_v51, %v2189_v58 }
 0x2a5   :  { %v2228_v10 = vpop.f32.mrf.mxu2 }
 0x2a6   :  { %v2229_v53 = vadd.f32 %v2228_v10, %v2209_v29 }
 0x2a8   :  { %v2248_v5 = vpop.f32.mrf.mxu3 }
 0x2a9   :  { %v2249_v43 = vadd.f32 %v2248_v5, %v2229_v53 }
 0x2df   :  { %v2268_v13 = vpop.f32.mrf.mxu0 }
 0x2e0   :  { %v2269_v63 = vadd.f32 %v2268_v13, %v2249_v43 }
 0x308   :  { %v2288_v22 = vpop.f32.mrf.mxu1 }
 0x309   :  { %v2289_v41 = vadd.f32 %v2288_v22, %v2269_v63 }
 0x30b   :  { %2291 = vst [vmem:[#allocation15] sm:$0xff] %v2289_v41 }
 0x30c   :  { %2302 = dma.vmem_to_hbm [thread:$0]  %s2298_s5, 128, %s2300_s7, [#allocation6]  }
 0x30d   :  { %2531 = dma.done.wait [#allocation6], 128  }
 0x30e   :  { %2532 = vsyncadd [#allocation6], 4294967168 }
 0x30f   :  { %2307 = vsyncpa [#allocation5], 1 }
 0x310   :  { %2308 = vsyncpa [#allocation8], 1 }
 0x311   :  { %2309 = vsyncpa [#allocation11], 1 }
 0x312   :  { %2310 = vsyncpa [#allocation14], 1 }
 0x313   :  { %2311 = vsyncpa [#allocation6], 1 }

</bundles_post_ra>
